<compile_context>
chip_gen: v7x
topology: tpu7x:2x2x1
jax: 0.10.0
libtpu: 0.0.40
codegen_flags: <defaults>
</compile_context>

<pallas_src>
import math

import jax
import jax.numpy as jnp
from jax.experimental import pallas as pl
from jax.experimental.pallas import tpu as pltpu

EPS = 1e-10      # added to std (not var), exactly as in the PyTorch source
NEG_INF = -1e9   # masked_fill value from the source
LANE = 128


# ---------------------------------------------------------------------------
# shared LN-over-seq + residual epilogue (runs inside both kernels)
# ---------------------------------------------------------------------------
def _ln_seq_residual(x, y, gamma, beta):
    """x + gamma * (y - mean) / (std + eps) + beta, stats over axis=1 (seq).

    Single-pass sum / sum-of-squares (unbiased var, like torch.std) and an EUP
    reciprocal so the per-element hot loop is one mul + one add.
    """
    seq = y.shape[1]
    ysum = jnp.sum(y, axis=1, keepdims=True)                 # (Bt, 1, H)
    ysq = jnp.sum(y * y, axis=1, keepdims=True)              # (Bt, 1, H)
    mean = ysum * (1.0 / seq)
    var = jnp.maximum(ysq - seq * mean * mean, 0.0) * (1.0 / (seq - 1))
    inv = pl.reciprocal(jnp.sqrt(var) + EPS, approx=True)    # EUP, ~free slot
    scale = gamma * inv                                      # (Bt, 1, H)
    return x + (y - mean) * scale + beta


# ---------------------------------------------------------------------------
# kernel 1:  x + LN_seq( MultiHeadAttention(x, x, x, mask) )
# ---------------------------------------------------------------------------
def _attn_residual_kernel(x_ref, mask_ref, wq_ref, bq_ref, wk_ref, bk_ref,
                          wv_ref, bv_ref, wo_ref, bo_ref, gamma_ref, beta_ref,
                          o_ref):
    """Head weights arrive pre-split ((nH, Hp, d_k) / (nH, d_k, Hp)) so no
    lane-dim reshapes/slices are needed in-kernel.  Softmax is over the HEAD
    axis (dim=1 of the scores), faithful to the source.  Dropout == identity."""
    bt, seq, hp = x_ref.shape
    n_heads, _, d_k = wq_ref.shape
    sm_scale = 1.0 / math.sqrt(d_k)

    x = x_ref[...]                                         # (Bt, S, Hp) f32
    x2 = x.reshape(bt * seq, hp).astype(jnp.bfloat16)      # Bt*S rows -> MXU
    masked = mask_ref[...] == 0.0                          # (Bt, S, S)

    scores = []
    values = []
    for h in range(n_heads):
        q_h = (jnp.dot(x2, wq_ref[h], preferred_element_type=jnp.float32)
               + bq_ref[h]).reshape(bt, seq, d_k)
        k_h = (jnp.dot(x2, wk_ref[h], preferred_element_type=jnp.float32)
               + bk_ref[h]).reshape(bt, seq, d_k)
        v_h = (jnp.dot(x2, wv_ref[h], preferred_element_type=jnp.float32)
               + bv_ref[h]).reshape(bt, seq, d_k)
        s_h = jnp.einsum("bqd,bkd->bqk",
                         q_h.astype(jnp.bfloat16), k_h.astype(jnp.bfloat16),
                         preferred_element_type=jnp.float32) * sm_scale
        scores.append(jnp.where(masked, NEG_INF, s_h))
        values.append(v_h)

    # softmax over heads, computed elementwise across per-head arrays (no stack)
    m = scores[0]
    for h in range(1, n_heads):
        m = jnp.maximum(m, scores[h])
    exps = [jnp.exp(s_h - m) for s_h in scores]
    den = exps[0]
    for h in range(1, n_heads):
        den = den + exps[h]
    inv_den = 1.0 / den

    # per-head context + output projection (== concat-heads @ Wo), accumulated
    y2 = None
    for h in range(n_heads):
        a_h = (exps[h] * inv_den).astype(jnp.bfloat16)               # (Bt,S,S)
        c_h = jnp.einsum("bqk,bkd->bqd", a_h, values[h].astype(jnp.bfloat16),
                         preferred_element_type=jnp.float32)         # (Bt,S,dk)
        p_h = jnp.dot(c_h.reshape(bt * seq, d_k).astype(jnp.bfloat16),
                      wo_ref[h], preferred_element_type=jnp.float32)
        y2 = p_h if y2 is None else y2 + p_h
    y = (y2 + bo_ref[...]).reshape(bt, seq, hp)                      # (Bt,S,Hp)

    o_ref[...] = _ln_seq_residual(x, y, gamma_ref[...],
                                  beta_ref[...]).astype(o_ref.dtype)


# ---------------------------------------------------------------------------
# kernel 2:  x + LN_seq( FeedForward(x) )
# ---------------------------------------------------------------------------
def _ffn_residual_kernel(x_ref, w1_ref, b1_ref, w2_ref, b2_ref,
                         gamma_ref, beta_ref, o_ref):
    bt, seq, hp = x_ref.shape
    x = x_ref[...]                                         # (Bt, S, Hp) f32
    x2 = x.reshape(bt * seq, hp).astype(jnp.bfloat16)
    h1 = jnp.dot(x2, w1_ref[...], preferred_element_type=jnp.float32) + b1_ref[...]
    h1 = jnp.maximum(h1, 0.0)                              # relu; dropout == id
    y2 = jnp.dot(h1.astype(jnp.bfloat16), w2_ref[...],
                 preferred_element_type=jnp.float32) + b2_ref[...]
    y = y2.reshape(bt, seq, hp)
    o_ref[...] = _ln_seq_residual(x, y, gamma_ref[...],
                                  beta_ref[...]).astype(o_ref.dtype)


# ---------------------------------------------------------------------------
# wrapper
# ---------------------------------------------------------------------------
def _pad_lane(a, axis, multiple=LANE):
    pad = (-a.shape[axis]) % multiple
    if pad == 0:
        return a
    widths = [(0, 0)] * a.ndim
    widths[axis] = (0, pad)
    return jnp.pad(a, widths)


def _row(v):
    """(N,) -> (1, N padded to a multiple of 128), f32."""
    return _pad_lane(v.reshape(1, -1), axis=1).astype(jnp.float32)


def _pick_batch_block(batch, seq, hidden, itemsize=4,
                      target_rows=512, block_budget=4 << 20):
    """Batch elements per grid step: feed the MXU >= target_rows rows per step
    when possible, stay under a per-block VMEM budget, and once the target is
    met keep >= 2 grid steps so v7x's two TensorCores both get work."""
    max_rows = max(seq, block_budget // (hidden * itemsize))
    best = 1
    for cand in range(1, batch + 1):
        if batch % cand != 0 or cand * seq > max_rows:
            continue
        best = cand
        if cand * seq >= target_rows and batch // cand >= 2:
            break
    return best


def _const_spec(shape, single_buffer):
    ndim = len(shape)
    if single_buffer:
        # constant index_map -> no pipelining benefit; keep ONE VMEM copy.
        return pl.BlockSpec(shape, lambda i: (0,) * ndim,
                            pipeline_mode=pl.Buffered(1))
    return pl.BlockSpec(shape, lambda i: (0,) * ndim)


def _nbytes(*arrays):
    return sum(int(a.size) * a.dtype.itemsize for a in arrays)


def _vmem_limit(io_block_bytes, const_bytes, scratch_bytes):
    est = 2 * io_block_bytes + const_bytes + scratch_bytes + (4 << 20)
    return int(min(max(est, 16 << 20), 60 << 20))


def encoder_forward(x, mask, params, n_heads, single_buffer_consts=True):
    """Encoder.forward(x, mask).

    x: (B, S, H) f32, mask: (B, S, S) (0 == masked key), params: f32 weights in
    math convention (w maps in->out, i.e. torch nn.Linear weight transposed).
    """
    B, S, H = x.shape
    assert S >= 2, "seq-axis LinearNormalization (unbiased std) needs S >= 2"
    assert H % n_heads == 0
    d_k = H // n_heads
    d_ff = params["w1"].shape[1]

    # pad hidden / d_ff (lane) dims to multiples of 128 -> lane-dense stores;
    # padded columns stay exactly zero end-to-end and are sliced off at the end.
    xp = _pad_lane(x, axis=2)
    Hp = xp.shape[2]
    Fp = ((d_ff + LANE - 1) // LANE) * LANE

    def heads_in(w):     # (H, H) -> (nH, Hp, d_k) bf16
        w = w.reshape(H, n_heads, d_k).transpose(1, 0, 2)
        return _pad_lane(w, axis=1).astype(jnp.bfloat16)

    def heads_bias(b):   # (H,) -> (nH, 1, d_k) f32
        return b.reshape(n_heads, 1, d_k).astype(jnp.float32)

    def heads_out(w):    # (H, H) -> (nH, d_k, Hp) bf16
        return _pad_lane(w.reshape(n_heads, d_k, H), axis=2).astype(jnp.bfloat16)

    wq, bq = heads_in(params["wq"]), heads_bias(params["bq"])
    wk, bk = heads_in(params["wk"]), heads_bias(params["bk"])
    wv, bv = heads_in(params["wv"]), heads_bias(params["bv"])
    wo, bo = heads_out(params["wo"]), _row(params["bo"])
    g1, be1 = _row(params["gamma1"]), _row(params["beta1"])
    w1 = _pad_lane(_pad_lane(params["w1"], axis=0), axis=1).astype(jnp.bfloat16)
    b1 = _row(params["b1"])
    w2 = _pad_lane(_pad_lane(params["w2"], axis=0), axis=1).astype(jnp.bfloat16)
    b2 = _row(params["b2"])
    g2, be2 = _row(params["gamma2"]), _row(params["beta2"])
    mask = mask.astype(jnp.float32)

    bt = _pick_batch_block(B, S, Hp)
    grid = (B // bt,)
    blk_x = bt * S * Hp * 4
    blk_m = bt * S * S * 4
    xspec = pl.BlockSpec((bt, S, Hp), lambda i: (i, 0, 0))

    # ---- residual[0]: x + LN_seq( self-attention(x, x, x, mask) ) ----
    attn_consts = (wq, bq, wk, bk, wv, bv, wo, bo, g1, be1)
    x1 = pl.pallas_call(
        _attn_residual_kernel,
        out_shape=jax.ShapeDtypeStruct((B, S, Hp), x.dtype),
        grid_spec=pltpu.PrefetchScalarGridSpec(
            num_scalar_prefetch=0,
            grid=grid,
            in_specs=[xspec,
                      pl.BlockSpec((bt, S, S), lambda i: (i, 0, 0))]
                     + [_const_spec(a.shape, single_buffer_consts)
                        for a in attn_consts],
            out_specs=xspec,
        ),
        compiler_params=pltpu.CompilerParams(
            dimension_semantics=("parallel",),
            vmem_limit_bytes=_vmem_limit(
                2 * blk_x + blk_m, _nbytes(*attn_consts),
                8 * blk_x + 6 * n_heads * blk_m)),
    )(xp, mask, *attn_consts)

    # ---- residual[1]: x1 + LN_seq( feed_forward(x1) ) ----
    ffn_consts = (w1, b1, w2, b2, g2, be2)
    x2 = pl.pallas_call(
        _ffn_residual_kernel,
        out_shape=jax.ShapeDtypeStruct((B, S, Hp), x.dtype),
        grid_spec=pltpu.PrefetchScalarGridSpec(
            num_scalar_prefetch=0,
            grid=grid,
            in_specs=[xspec] + [_const_spec(a.shape, single_buffer_consts)
                                for a in ffn_consts],
            out_specs=xspec,
        ),
        compiler_params=pltpu.CompilerParams(
            dimension_semantics=("parallel",),
            vmem_limit_bytes=_vmem_limit(
                2 * blk_x, _nbytes(*ffn_consts),
                4 * blk_x + 2 * bt * S * Fp * 4)),
    )(x1, *ffn_consts)

    return x2[:, :, :H]


# ---------------------------------------------------------------------------
# pure-JAX reference (mirrors the kernel's bf16-input / f32-accum matmuls)
# ---------------------------------------------------------------------------
def _reference(x, mask, params, n_heads):
    B, S, H = x.shape
    d_k = H // n_heads
    bf = lambda a: a.astype(jnp.bfloat16)

    def dense(a, w, b):
        return jnp.einsum("...i,io->...o", bf(a), bf(w),
                          preferred_element_type=jnp.float32) + b

    def ln_seq(y, gamma, beta):
        mean = jnp.mean(y, axis=1, keepdims=True)
        std = jnp.std(y, axis=1, keepdims=True, ddof=1)   # unbiased (torch.std)
        return gamma * (y - mean) / (std + EPS) + beta

    def split_heads(t):
        return t.reshape(B, S, n_heads, d_k).transpose(0, 2, 1, 3)

    q = split_heads(dense(x, params["wq"], params["bq"]))
    k = split_heads(dense(x, params["wk"], params["bk"]))
    v = split_heads(dense(x, params["wv"], params["bv"]))
    scores = jnp.einsum("bhqd,bhkd->bhqk", bf(q), bf(k),
                        preferred_element_type=jnp.float32) / math.sqrt(d_k)
    scores = jnp.where(mask[:, None, :, :] == 0, NEG_INF, scores)
    attn = jax.nn.softmax(scores, axis=1)      # over HEADS (dim=1), as in source
    ctx = jnp.einsum("bhqk,bhkd->bhqd", bf(attn), bf(v),
                     preferred_element_type=jnp.float32)
    ctx = ctx.transpose(0, 2, 1, 3).reshape(B, S, H)
    y = dense(ctx, params["wo"], params["bo"])
    x1 = x + ln_seq(y, params["gamma1"], params["beta1"])

    h1 = jax.nn.relu(dense(x1, params["w1"], params["b1"]))
    y2 = dense(h1, params["w2"], params["b2"])
    return x1 + ln_seq(y2, params["gamma2"], params["beta2"])


if __name__ == "__main__":
    B, S, H, N_HEADS, D_FF = 2, 8, 32, 4, 64

    key = jax.random.PRNGKey(0)
    ks = jax.random.split(key, 16)
    x = jax.random.normal(ks[0], (B, S, H), dtype=jnp.float32)

    # padding mask: mask out the last two key positions of batch element 1
    mask = jnp.ones((B, S, S), dtype=jnp.float32)
    mask = mask.at[1, :, -2:].set(0.0)

    def w_init(k, fan_in, shape):
        return jax.random.normal(k, shape, dtype=jnp.float32) / math.sqrt(fan_in)

    def b_init(k, shape):
        return 0.1 * jax.random.normal(k, shape, dtype=jnp.float32)

    params = {
        "wq": w_init(ks[1], H, (H, H)), "bq": b_init(ks[2], (H,)),
        "wk": w_init(ks[3], H, (H, H)), "bk": b_init(ks[4], (H,)),
        "wv": w_init(ks[5], H, (H, H)), "bv": b_init(ks[6], (H,)),
        "wo": w_init(ks[7], H, (H, H)), "bo": b_init(ks[8], (H,)),
        "gamma1": jnp.ones((H,), jnp.float32),
        "beta1": jnp.zeros((H,), jnp.float32),
        "w1": w_init(ks[9], H, (H, D_FF)), "b1": b_init(ks[10], (D_FF,)),
        "w2": w_init(ks[11], D_FF, (D_FF, H)), "b2": b_init(ks[12], (H,)),
        "gamma2": jnp.ones((H,), jnp.float32),
        "beta2": jnp.zeros((H,), jnp.float32),
    }

    try:
        out = jax.block_until_ready(
            encoder_forward(x, mask, params, n_heads=N_HEADS))
    except Exception:
        # pl.Buffered(1) single-buffering of constants is a newer pipeline_mode;
        # fall back to default double-buffering if this build rejects it.
        out = jax.block_until_ready(
            encoder_forward(x, mask, params, n_heads=N_HEADS,
                            single_buffer_consts=False))

    ref = _reference(x, mask, params, N_HEADS)
    assert out.shape == (B, S, H)
    assert jnp.allclose(out, ref, atol=2e-2, rtol=2e-2), "mismatch vs reference"
    print("KERNEL_OK")
</pallas_src>

<mosaic_0001>
module attributes {stable_mosaic.version = 11 : i64} {
  func.func @_attn_residual_kernel(%arg0: i32, %arg1: memref<2x8x128xf32, #tpu.memory_space<vmem>>, %arg2: memref<2x8x8xf32, #tpu.memory_space<vmem>>, %arg3: memref<4x128x8xbf16, #tpu.memory_space<vmem>>, %arg4: memref<4x1x8xf32, #tpu.memory_space<vmem>>, %arg5: memref<4x128x8xbf16, #tpu.memory_space<vmem>>, %arg6: memref<4x1x8xf32, #tpu.memory_space<vmem>>, %arg7: memref<4x128x8xbf16, #tpu.memory_space<vmem>>, %arg8: memref<4x1x8xf32, #tpu.memory_space<vmem>>, %arg9: memref<4x8x128xbf16, #tpu.memory_space<vmem>>, %arg10: memref<1x128xf32, #tpu.memory_space<vmem>>, %arg11: memref<1x128xf32, #tpu.memory_space<vmem>>, %arg12: memref<1x128xf32, #tpu.memory_space<vmem>>, %arg13: memref<2x8x128xf32, #tpu.memory_space<vmem>>) attributes {dimension_semantics = [#tpu.dimension_semantics<parallel>], iteration_bounds = array<i64: 1>, scalar_prefetch = 0 : i64, scratch_operands = 0 : i64, tpu.core_type = #tpu.core_type<tc>, window_params = [{transform_indices = @transform_0, window_bounds = array<i64: 2, 8, 128>}, {transform_indices = @transform_1, window_bounds = array<i64: 2, 8, 8>}, {pipeline_mode = #tpu.pipeline_mode<synchronous>, transform_indices = @transform_2, window_bounds = array<i64: 4, 128, 8>}, {pipeline_mode = #tpu.pipeline_mode<synchronous>, transform_indices = @transform_3, window_bounds = array<i64: 4, 1, 8>}, {pipeline_mode = #tpu.pipeline_mode<synchronous>, transform_indices = @transform_4, window_bounds = array<i64: 4, 128, 8>}, {pipeline_mode = #tpu.pipeline_mode<synchronous>, transform_indices = @transform_5, window_bounds = array<i64: 4, 1, 8>}, {pipeline_mode = #tpu.pipeline_mode<synchronous>, transform_indices = @transform_6, window_bounds = array<i64: 4, 128, 8>}, {pipeline_mode = #tpu.pipeline_mode<synchronous>, transform_indices = @transform_7, window_bounds = array<i64: 4, 1, 8>}, {pipeline_mode = #tpu.pipeline_mode<synchronous>, transform_indices = @transform_8, window_bounds = array<i64: 4, 8, 128>}, {pipeline_mode = #tpu.pipeline_mode<synchronous>, transform_indices = @transform_9, window_bounds = array<i64: 1, 128>}, {pipeline_mode = #tpu.pipeline_mode<synchronous>, transform_indices = @transform_10, window_bounds = array<i64: 1, 128>}, {pipeline_mode = #tpu.pipeline_mode<synchronous>, transform_indices = @transform_11, window_bounds = array<i64: 1, 128>}, {transform_indices = @transform_12, window_bounds = array<i64: 2, 8, 128>}]} {
    %c0 = arith.constant 0 : index
    %c0_0 = arith.constant 0 : index
    %c0_1 = arith.constant 0 : index
    %0 = vector.load %arg1[%c0, %c0_0, %c0_1] : memref<2x8x128xf32, #tpu.memory_space<vmem>>, vector<2x8x128xf32>
    %1 = vector.shape_cast %0 : vector<2x8x128xf32> to vector<16x128xf32>
    %2 = arith.truncf %1 : vector<16x128xf32> to vector<16x128xbf16>
    %c0_2 = arith.constant 0 : index
    %c0_3 = arith.constant 0 : index
    %c0_4 = arith.constant 0 : index
    %3 = vector.load %arg2[%c0_2, %c0_3, %c0_4] : memref<2x8x8xf32, #tpu.memory_space<vmem>>, vector<2x8x8xf32>
    %cst = arith.constant 0.000000e+00 : f32
    %4 = vector.broadcast %cst : f32 to vector<2x8x8xf32>
    %5 = arith.cmpf oeq, %3, %4 : vector<2x8x8xf32>
    %c0_5 = arith.constant 0 : index
    %c0_6 = arith.constant 0 : index
    %c0_7 = arith.constant 0 : index
    %6 = vector.load %arg3[%c0_5, %c0_6, %c0_7] : memref<4x128x8xbf16, #tpu.memory_space<vmem>>, vector<1x128x8xbf16>
    %7 = vector.shape_cast %6 : vector<1x128x8xbf16> to vector<128x8xbf16>
    %cst_8 = arith.constant dense<0.000000e+00> : vector<16x8xf32>
    %8 = tpu.matmul %2, %7, %cst_8 {dimension_numbers = #tpu.dot_dimension_numbers<[1], [0], [0], [1], [0, 0, 1, 1], [], []>} : vector<16x128xbf16>, vector<128x8xbf16>, vector<16x8xf32> -> vector<16x8xf32>
    %c0_9 = arith.constant 0 : index
    %c0_10 = arith.constant 0 : index
    %c0_11 = arith.constant 0 : index
    %9 = vector.load %arg4[%c0_9, %c0_10, %c0_11] : memref<4x1x8xf32, #tpu.memory_space<vmem>>, vector<1x1x8xf32>
    %10 = vector.shape_cast %9 : vector<1x1x8xf32> to vector<1x8xf32>
    %11 = vector.broadcast %10 : vector<1x8xf32> to vector<16x8xf32>
    %12 = arith.addf %8, %11 : vector<16x8xf32>
    %13 = vector.shape_cast %12 : vector<16x8xf32> to vector<2x8x8xf32>
    %c0_12 = arith.constant 0 : index
    %c0_13 = arith.constant 0 : index
    %c0_14 = arith.constant 0 : index
    %14 = vector.load %arg5[%c0_12, %c0_13, %c0_14] : memref<4x128x8xbf16, #tpu.memory_space<vmem>>, vector<1x128x8xbf16>
    %15 = vector.shape_cast %14 : vector<1x128x8xbf16> to vector<128x8xbf16>
    %cst_15 = arith.constant dense<0.000000e+00> : vector<16x8xf32>
    %16 = tpu.matmul %2, %15, %cst_15 {dimension_numbers = #tpu.dot_dimension_numbers<[1], [0], [0], [1], [0, 0, 1, 1], [], []>} : vector<16x128xbf16>, vector<128x8xbf16>, vector<16x8xf32> -> vector<16x8xf32>
    %c0_16 = arith.constant 0 : index
    %c0_17 = arith.constant 0 : index
    %c0_18 = arith.constant 0 : index
    %17 = vector.load %arg6[%c0_16, %c0_17, %c0_18] : memref<4x1x8xf32, #tpu.memory_space<vmem>>, vector<1x1x8xf32>
    %18 = vector.shape_cast %17 : vector<1x1x8xf32> to vector<1x8xf32>
    %19 = vector.broadcast %18 : vector<1x8xf32> to vector<16x8xf32>
    %20 = arith.addf %16, %19 : vector<16x8xf32>
    %21 = vector.shape_cast %20 : vector<16x8xf32> to vector<2x8x8xf32>
    %c0_19 = arith.constant 0 : index
    %c0_20 = arith.constant 0 : index
    %c0_21 = arith.constant 0 : index
    %22 = vector.load %arg7[%c0_19, %c0_20, %c0_21] : memref<4x128x8xbf16, #tpu.memory_space<vmem>>, vector<1x128x8xbf16>
    %23 = vector.shape_cast %22 : vector<1x128x8xbf16> to vector<128x8xbf16>
    %cst_22 = arith.constant dense<0.000000e+00> : vector<16x8xf32>
    %24 = tpu.matmul %2, %23, %cst_22 {dimension_numbers = #tpu.dot_dimension_numbers<[1], [0], [0], [1], [0, 0, 1, 1], [], []>} : vector<16x128xbf16>, vector<128x8xbf16>, vector<16x8xf32> -> vector<16x8xf32>
    %c0_23 = arith.constant 0 : index
    %c0_24 = arith.constant 0 : index
    %c0_25 = arith.constant 0 : index
    %25 = vector.load %arg8[%c0_23, %c0_24, %c0_25] : memref<4x1x8xf32, #tpu.memory_space<vmem>>, vector<1x1x8xf32>
    %26 = vector.shape_cast %25 : vector<1x1x8xf32> to vector<1x8xf32>
    %27 = vector.broadcast %26 : vector<1x8xf32> to vector<16x8xf32>
    %28 = arith.addf %24, %27 : vector<16x8xf32>
    %29 = vector.shape_cast %28 : vector<16x8xf32> to vector<2x8x8xf32>
    %30 = arith.truncf %13 : vector<2x8x8xf32> to vector<2x8x8xbf16>
    %31 = arith.truncf %21 : vector<2x8x8xf32> to vector<2x8x8xbf16>
    "tpu.trace_start"() <{level = 10 : i32, message = "bqd,bkd->bqk"}> : () -> ()
    %cst_26 = arith.constant dense<0.000000e+00> : vector<2x8x8xf32>
    %32 = tpu.matmul %30, %31, %cst_26 {dimension_numbers = #tpu.dot_dimension_numbers<[2], [2], [1], [1], [0, 0, 0, 1, 1, 1], [0], [0]>} : vector<2x8x8xbf16>, vector<2x8x8xbf16>, vector<2x8x8xf32> -> vector<2x8x8xf32>
    "tpu.trace_stop"() : () -> ()
    %cst_27 = arith.constant 0.353553385 : f32
    %33 = vector.broadcast %cst_27 : f32 to vector<2x8x8xf32>
    %34 = arith.mulf %32, %33 : vector<2x8x8xf32>
    %cst_28 = arith.constant -1.000000e+09 : f32
    %35 = vector.broadcast %cst_28 : f32 to vector<2x8x8xf32>
    %36 = arith.select %5, %35, %34 : vector<2x8x8xi1>, vector<2x8x8xf32>
    %c1 = arith.constant 1 : index
    %c0_29 = arith.constant 0 : index
    %c0_30 = arith.constant 0 : index
    %37 = vector.load %arg3[%c1, %c0_29, %c0_30] : memref<4x128x8xbf16, #tpu.memory_space<vmem>>, vector<1x128x8xbf16>
    %38 = vector.shape_cast %37 : vector<1x128x8xbf16> to vector<128x8xbf16>
    %cst_31 = arith.constant dense<0.000000e+00> : vector<16x8xf32>
    %39 = tpu.matmul %2, %38, %cst_31 {dimension_numbers = #tpu.dot_dimension_numbers<[1], [0], [0], [1], [0, 0, 1, 1], [], []>} : vector<16x128xbf16>, vector<128x8xbf16>, vector<16x8xf32> -> vector<16x8xf32>
    %c1_32 = arith.constant 1 : index
    %c0_33 = arith.constant 0 : index
    %c0_34 = arith.constant 0 : index
    %40 = vector.load %arg4[%c1_32, %c0_33, %c0_34] : memref<4x1x8xf32, #tpu.memory_space<vmem>>, vector<1x1x8xf32>
    %41 = vector.shape_cast %40 : vector<1x1x8xf32> to vector<1x8xf32>
    %42 = vector.broadcast %41 : vector<1x8xf32> to vector<16x8xf32>
    %43 = arith.addf %39, %42 : vector<16x8xf32>
    %44 = vector.shape_cast %43 : vector<16x8xf32> to vector<2x8x8xf32>
    %c1_35 = arith.constant 1 : index
    %c0_36 = arith.constant 0 : index
    %c0_37 = arith.constant 0 : index
    %45 = vector.load %arg5[%c1_35, %c0_36, %c0_37] : memref<4x128x8xbf16, #tpu.memory_space<vmem>>, vector<1x128x8xbf16>
    %46 = vector.shape_cast %45 : vector<1x128x8xbf16> to vector<128x8xbf16>
    %cst_38 = arith.constant dense<0.000000e+00> : vector<16x8xf32>
    %47 = tpu.matmul %2, %46, %cst_38 {dimension_numbers = #tpu.dot_dimension_numbers<[1], [0], [0], [1], [0, 0, 1, 1], [], []>} : vector<16x128xbf16>, vector<128x8xbf16>, vector<16x8xf32> -> vector<16x8xf32>
    %c1_39 = arith.constant 1 : index
    %c0_40 = arith.constant 0 : index
    %c0_41 = arith.constant 0 : index
    %48 = vector.load %arg6[%c1_39, %c0_40, %c0_41] : memref<4x1x8xf32, #tpu.memory_space<vmem>>, vector<1x1x8xf32>
    %49 = vector.shape_cast %48 : vector<1x1x8xf32> to vector<1x8xf32>
    %50 = vector.broadcast %49 : vector<1x8xf32> to vector<16x8xf32>
    %51 = arith.addf %47, %50 : vector<16x8xf32>
    %52 = vector.shape_cast %51 : vector<16x8xf32> to vector<2x8x8xf32>
    %c1_42 = arith.constant 1 : index
    %c0_43 = arith.constant 0 : index
    %c0_44 = arith.constant 0 : index
    %53 = vector.load %arg7[%c1_42, %c0_43, %c0_44] : memref<4x128x8xbf16, #tpu.memory_space<vmem>>, vector<1x128x8xbf16>
    %54 = vector.shape_cast %53 : vector<1x128x8xbf16> to vector<128x8xbf16>
    %cst_45 = arith.constant dense<0.000000e+00> : vector<16x8xf32>
    %55 = tpu.matmul %2, %54, %cst_45 {dimension_numbers = #tpu.dot_dimension_numbers<[1], [0], [0], [1], [0, 0, 1, 1], [], []>} : vector<16x128xbf16>, vector<128x8xbf16>, vector<16x8xf32> -> vector<16x8xf32>
    %c1_46 = arith.constant 1 : index
    %c0_47 = arith.constant 0 : index
    %c0_48 = arith.constant 0 : index
    %56 = vector.load %arg8[%c1_46, %c0_47, %c0_48] : memref<4x1x8xf32, #tpu.memory_space<vmem>>, vector<1x1x8xf32>
    %57 = vector.shape_cast %56 : vector<1x1x8xf32> to vector<1x8xf32>
    %58 = vector.broadcast %57 : vector<1x8xf32> to vector<16x8xf32>
    %59 = arith.addf %55, %58 : vector<16x8xf32>
    %60 = vector.shape_cast %59 : vector<16x8xf32> to vector<2x8x8xf32>
    %61 = arith.truncf %44 : vector<2x8x8xf32> to vector<2x8x8xbf16>
    %62 = arith.truncf %52 : vector<2x8x8xf32> to vector<2x8x8xbf16>
    "tpu.trace_start"() <{level = 10 : i32, message = "bqd,bkd->bqk"}> : () -> ()
    %cst_49 = arith.constant dense<0.000000e+00> : vector<2x8x8xf32>
    %63 = tpu.matmul %61, %62, %cst_49 {dimension_numbers = #tpu.dot_dimension_numbers<[2], [2], [1], [1], [0, 0, 0, 1, 1, 1], [0], [0]>} : vector<2x8x8xbf16>, vector<2x8x8xbf16>, vector<2x8x8xf32> -> vector<2x8x8xf32>
    "tpu.trace_stop"() : () -> ()
    %cst_50 = arith.constant 0.353553385 : f32
    %64 = vector.broadcast %cst_50 : f32 to vector<2x8x8xf32>
    %65 = arith.mulf %63, %64 : vector<2x8x8xf32>
    %cst_51 = arith.constant -1.000000e+09 : f32
    %66 = vector.broadcast %cst_51 : f32 to vector<2x8x8xf32>
    %67 = arith.select %5, %66, %65 : vector<2x8x8xi1>, vector<2x8x8xf32>
    %c2 = arith.constant 2 : index
    %c0_52 = arith.constant 0 : index
    %c0_53 = arith.constant 0 : index
    %68 = vector.load %arg3[%c2, %c0_52, %c0_53] : memref<4x128x8xbf16, #tpu.memory_space<vmem>>, vector<1x128x8xbf16>
    %69 = vector.shape_cast %68 : vector<1x128x8xbf16> to vector<128x8xbf16>
    %cst_54 = arith.constant dense<0.000000e+00> : vector<16x8xf32>
    %70 = tpu.matmul %2, %69, %cst_54 {dimension_numbers = #tpu.dot_dimension_numbers<[1], [0], [0], [1], [0, 0, 1, 1], [], []>} : vector<16x128xbf16>, vector<128x8xbf16>, vector<16x8xf32> -> vector<16x8xf32>
    %c2_55 = arith.constant 2 : index
    %c0_56 = arith.constant 0 : index
    %c0_57 = arith.constant 0 : index
    %71 = vector.load %arg4[%c2_55, %c0_56, %c0_57] : memref<4x1x8xf32, #tpu.memory_space<vmem>>, vector<1x1x8xf32>
    %72 = vector.shape_cast %71 : vector<1x1x8xf32> to vector<1x8xf32>
    %73 = vector.broadcast %72 : vector<1x8xf32> to vector<16x8xf32>
    %74 = arith.addf %70, %73 : vector<16x8xf32>
    %75 = vector.shape_cast %74 : vector<16x8xf32> to vector<2x8x8xf32>
    %c2_58 = arith.constant 2 : index
    %c0_59 = arith.constant 0 : index
    %c0_60 = arith.constant 0 : index
    %76 = vector.load %arg5[%c2_58, %c0_59, %c0_60] : memref<4x128x8xbf16, #tpu.memory_space<vmem>>, vector<1x128x8xbf16>
    %77 = vector.shape_cast %76 : vector<1x128x8xbf16> to vector<128x8xbf16>
    %cst_61 = arith.constant dense<0.000000e+00> : vector<16x8xf32>
    %78 = tpu.matmul %2, %77, %cst_61 {dimension_numbers = #tpu.dot_dimension_numbers<[1], [0], [0], [1], [0, 0, 1, 1], [], []>} : vector<16x128xbf16>, vector<128x8xbf16>, vector<16x8xf32> -> vector<16x8xf32>
    %c2_62 = arith.constant 2 : index
    %c0_63 = arith.constant 0 : index
    %c0_64 = arith.constant 0 : index
    %79 = vector.load %arg6[%c2_62, %c0_63, %c0_64] : memref<4x1x8xf32, #tpu.memory_space<vmem>>, vector<1x1x8xf32>
    %80 = vector.shape_cast %79 : vector<1x1x8xf32> to vector<1x8xf32>
    %81 = vector.broadcast %80 : vector<1x8xf32> to vector<16x8xf32>
    %82 = arith.addf %78, %81 : vector<16x8xf32>
    %83 = vector.shape_cast %82 : vector<16x8xf32> to vector<2x8x8xf32>
    %c2_65 = arith.constant 2 : index
    %c0_66 = arith.constant 0 : index
    %c0_67 = arith.constant 0 : index
    %84 = vector.load %arg7[%c2_65, %c0_66, %c0_67] : memref<4x128x8xbf16, #tpu.memory_space<vmem>>, vector<1x128x8xbf16>
    %85 = vector.shape_cast %84 : vector<1x128x8xbf16> to vector<128x8xbf16>
    %cst_68 = arith.constant dense<0.000000e+00> : vector<16x8xf32>
    %86 = tpu.matmul %2, %85, %cst_68 {dimension_numbers = #tpu.dot_dimension_numbers<[1], [0], [0], [1], [0, 0, 1, 1], [], []>} : vector<16x128xbf16>, vector<128x8xbf16>, vector<16x8xf32> -> vector<16x8xf32>
    %c2_69 = arith.constant 2 : index
    %c0_70 = arith.constant 0 : index
    %c0_71 = arith.constant 0 : index
    %87 = vector.load %arg8[%c2_69, %c0_70, %c0_71] : memref<4x1x8xf32, #tpu.memory_space<vmem>>, vector<1x1x8xf32>
    %88 = vector.shape_cast %87 : vector<1x1x8xf32> to vector<1x8xf32>
    %89 = vector.broadcast %88 : vector<1x8xf32> to vector<16x8xf32>
    %90 = arith.addf %86, %89 : vector<16x8xf32>
    %91 = vector.shape_cast %90 : vector<16x8xf32> to vector<2x8x8xf32>
    %92 = arith.truncf %75 : vector<2x8x8xf32> to vector<2x8x8xbf16>
    %93 = arith.truncf %83 : vector<2x8x8xf32> to vector<2x8x8xbf16>
    "tpu.trace_start"() <{level = 10 : i32, message = "bqd,bkd->bqk"}> : () -> ()
    %cst_72 = arith.constant dense<0.000000e+00> : vector<2x8x8xf32>
    %94 = tpu.matmul %92, %93, %cst_72 {dimension_numbers = #tpu.dot_dimension_numbers<[2], [2], [1], [1], [0, 0, 0, 1, 1, 1], [0], [0]>} : vector<2x8x8xbf16>, vector<2x8x8xbf16>, vector<2x8x8xf32> -> vector<2x8x8xf32>
    "tpu.trace_stop"() : () -> ()
    %cst_73 = arith.constant 0.353553385 : f32
    %95 = vector.broadcast %cst_73 : f32 to vector<2x8x8xf32>
    %96 = arith.mulf %94, %95 : vector<2x8x8xf32>
    %cst_74 = arith.constant -1.000000e+09 : f32
    %97 = vector.broadcast %cst_74 : f32 to vector<2x8x8xf32>
    %98 = arith.select %5, %97, %96 : vector<2x8x8xi1>, vector<2x8x8xf32>
    %c3 = arith.constant 3 : index
    %c0_75 = arith.constant 0 : index
    %c0_76 = arith.constant 0 : index
    %99 = vector.load %arg3[%c3, %c0_75, %c0_76] : memref<4x128x8xbf16, #tpu.memory_space<vmem>>, vector<1x128x8xbf16>
    %100 = vector.shape_cast %99 : vector<1x128x8xbf16> to vector<128x8xbf16>
    %cst_77 = arith.constant dense<0.000000e+00> : vector<16x8xf32>
    %101 = tpu.matmul %2, %100, %cst_77 {dimension_numbers = #tpu.dot_dimension_numbers<[1], [0], [0], [1], [0, 0, 1, 1], [], []>} : vector<16x128xbf16>, vector<128x8xbf16>, vector<16x8xf32> -> vector<16x8xf32>
    %c3_78 = arith.constant 3 : index
    %c0_79 = arith.constant 0 : index
    %c0_80 = arith.constant 0 : index
    %102 = vector.load %arg4[%c3_78, %c0_79, %c0_80] : memref<4x1x8xf32, #tpu.memory_space<vmem>>, vector<1x1x8xf32>
    %103 = vector.shape_cast %102 : vector<1x1x8xf32> to vector<1x8xf32>
    %104 = vector.broadcast %103 : vector<1x8xf32> to vector<16x8xf32>
    %105 = arith.addf %101, %104 : vector<16x8xf32>
    %106 = vector.shape_cast %105 : vector<16x8xf32> to vector<2x8x8xf32>
    %c3_81 = arith.constant 3 : index
    %c0_82 = arith.constant 0 : index
    %c0_83 = arith.constant 0 : index
    %107 = vector.load %arg5[%c3_81, %c0_82, %c0_83] : memref<4x128x8xbf16, #tpu.memory_space<vmem>>, vector<1x128x8xbf16>
    %108 = vector.shape_cast %107 : vector<1x128x8xbf16> to vector<128x8xbf16>
    %cst_84 = arith.constant dense<0.000000e+00> : vector<16x8xf32>
    %109 = tpu.matmul %2, %108, %cst_84 {dimension_numbers = #tpu.dot_dimension_numbers<[1], [0], [0], [1], [0, 0, 1, 1], [], []>} : vector<16x128xbf16>, vector<128x8xbf16>, vector<16x8xf32> -> vector<16x8xf32>
    %c3_85 = arith.constant 3 : index
    %c0_86 = arith.constant 0 : index
    %c0_87 = arith.constant 0 : index
    %110 = vector.load %arg6[%c3_85, %c0_86, %c0_87] : memref<4x1x8xf32, #tpu.memory_space<vmem>>, vector<1x1x8xf32>
    %111 = vector.shape_cast %110 : vector<1x1x8xf32> to vector<1x8xf32>
    %112 = vector.broadcast %111 : vector<1x8xf32> to vector<16x8xf32>
    %113 = arith.addf %109, %112 : vector<16x8xf32>
    %114 = vector.shape_cast %113 : vector<16x8xf32> to vector<2x8x8xf32>
    %c3_88 = arith.constant 3 : index
    %c0_89 = arith.constant 0 : index
    %c0_90 = arith.constant 0 : index
    %115 = vector.load %arg7[%c3_88, %c0_89, %c0_90] : memref<4x128x8xbf16, #tpu.memory_space<vmem>>, vector<1x128x8xbf16>
    %116 = vector.shape_cast %115 : vector<1x128x8xbf16> to vector<128x8xbf16>
    %cst_91 = arith.constant dense<0.000000e+00> : vector<16x8xf32>
    %117 = tpu.matmul %2, %116, %cst_91 {dimension_numbers = #tpu.dot_dimension_numbers<[1], [0], [0], [1], [0, 0, 1, 1], [], []>} : vector<16x128xbf16>, vector<128x8xbf16>, vector<16x8xf32> -> vector<16x8xf32>
    %c3_92 = arith.constant 3 : index
    %c0_93 = arith.constant 0 : index
    %c0_94 = arith.constant 0 : index
    %118 = vector.load %arg8[%c3_92, %c0_93, %c0_94] : memref<4x1x8xf32, #tpu.memory_space<vmem>>, vector<1x1x8xf32>
    %119 = vector.shape_cast %118 : vector<1x1x8xf32> to vector<1x8xf32>
    %120 = vector.broadcast %119 : vector<1x8xf32> to vector<16x8xf32>
    %121 = arith.addf %117, %120 : vector<16x8xf32>
    %122 = vector.shape_cast %121 : vector<16x8xf32> to vector<2x8x8xf32>
    %123 = arith.truncf %106 : vector<2x8x8xf32> to vector<2x8x8xbf16>
    %124 = arith.truncf %114 : vector<2x8x8xf32> to vector<2x8x8xbf16>
    "tpu.trace_start"() <{level = 10 : i32, message = "bqd,bkd->bqk"}> : () -> ()
    %cst_95 = arith.constant dense<0.000000e+00> : vector<2x8x8xf32>
    %125 = tpu.matmul %123, %124, %cst_95 {dimension_numbers = #tpu.dot_dimension_numbers<[2], [2], [1], [1], [0, 0, 0, 1, 1, 1], [0], [0]>} : vector<2x8x8xbf16>, vector<2x8x8xbf16>, vector<2x8x8xf32> -> vector<2x8x8xf32>
    "tpu.trace_stop"() : () -> ()
    %cst_96 = arith.constant 0.353553385 : f32
    %126 = vector.broadcast %cst_96 : f32 to vector<2x8x8xf32>
    %127 = arith.mulf %125, %126 : vector<2x8x8xf32>
    %cst_97 = arith.constant -1.000000e+09 : f32
    %128 = vector.broadcast %cst_97 : f32 to vector<2x8x8xf32>
    %129 = arith.select %5, %128, %127 : vector<2x8x8xi1>, vector<2x8x8xf32>
    %130 = arith.maximumf %36, %67 : vector<2x8x8xf32>
    %131 = arith.maximumf %130, %98 : vector<2x8x8xf32>
    %132 = arith.maximumf %131, %129 : vector<2x8x8xf32>
    %133 = arith.subf %36, %132 : vector<2x8x8xf32>
    %134 = math.exp %133 : vector<2x8x8xf32>
    %135 = arith.subf %67, %132 : vector<2x8x8xf32>
    %136 = math.exp %135 : vector<2x8x8xf32>
    %137 = arith.subf %98, %132 : vector<2x8x8xf32>
    %138 = math.exp %137 : vector<2x8x8xf32>
    %139 = arith.subf %129, %132 : vector<2x8x8xf32>
    %140 = math.exp %139 : vector<2x8x8xf32>
    %141 = arith.addf %134, %136 : vector<2x8x8xf32>
    %142 = arith.addf %141, %138 : vector<2x8x8xf32>
    %143 = arith.addf %142, %140 : vector<2x8x8xf32>
    %cst_98 = arith.constant 1.000000e+00 : f32
    %144 = vector.broadcast %cst_98 : f32 to vector<2x8x8xf32>
    %145 = arith.divf %144, %143 : vector<2x8x8xf32>
    %146 = arith.mulf %134, %145 : vector<2x8x8xf32>
    %147 = arith.truncf %146 : vector<2x8x8xf32> to vector<2x8x8xbf16>
    %148 = arith.truncf %29 : vector<2x8x8xf32> to vector<2x8x8xbf16>
    "tpu.trace_start"() <{level = 10 : i32, message = "bqk,bkd->bqd"}> : () -> ()
    %cst_99 = arith.constant dense<0.000000e+00> : vector<2x8x8xf32>
    %149 = tpu.matmul %147, %148, %cst_99 {dimension_numbers = #tpu.dot_dimension_numbers<[2], [1], [1], [2], [0, 0, 0, 1, 1, 2], [0], [0]>} : vector<2x8x8xbf16>, vector<2x8x8xbf16>, vector<2x8x8xf32> -> vector<2x8x8xf32>
    "tpu.trace_stop"() : () -> ()
    %150 = vector.shape_cast %149 : vector<2x8x8xf32> to vector<16x8xf32>
    %151 = arith.truncf %150 : vector<16x8xf32> to vector<16x8xbf16>
    %c0_100 = arith.constant 0 : index
    %c0_101 = arith.constant 0 : index
    %c0_102 = arith.constant 0 : index
    %152 = vector.load %arg9[%c0_100, %c0_101, %c0_102] : memref<4x8x128xbf16, #tpu.memory_space<vmem>>, vector<1x8x128xbf16>
    %153 = vector.shape_cast %152 : vector<1x8x128xbf16> to vector<8x128xbf16>
    %cst_103 = arith.constant dense<0.000000e+00> : vector<16x128xf32>
    %154 = tpu.matmul %151, %153, %cst_103 {dimension_numbers = #tpu.dot_dimension_numbers<[1], [0], [0], [1], [0, 0, 1, 1], [], []>} : vector<16x8xbf16>, vector<8x128xbf16>, vector<16x128xf32> -> vector<16x128xf32>
    %155 = arith.mulf %136, %145 : vector<2x8x8xf32>
    %156 = arith.truncf %155 : vector<2x8x8xf32> to vector<2x8x8xbf16>
    %157 = arith.truncf %60 : vector<2x8x8xf32> to vector<2x8x8xbf16>
    "tpu.trace_start"() <{level = 10 : i32, message = "bqk,bkd->bqd"}> : () -> ()
    %cst_104 = arith.constant dense<0.000000e+00> : vector<2x8x8xf32>
    %158 = tpu.matmul %156, %157, %cst_104 {dimension_numbers = #tpu.dot_dimension_numbers<[2], [1], [1], [2], [0, 0, 0, 1, 1, 2], [0], [0]>} : vector<2x8x8xbf16>, vector<2x8x8xbf16>, vector<2x8x8xf32> -> vector<2x8x8xf32>
    "tpu.trace_stop"() : () -> ()
    %159 = vector.shape_cast %158 : vector<2x8x8xf32> to vector<16x8xf32>
    %160 = arith.truncf %159 : vector<16x8xf32> to vector<16x8xbf16>
    %c1_105 = arith.constant 1 : index
    %c0_106 = arith.constant 0 : index
    %c0_107 = arith.constant 0 : index
    %161 = vector.load %arg9[%c1_105, %c0_106, %c0_107] : memref<4x8x128xbf16, #tpu.memory_space<vmem>>, vector<1x8x128xbf16>
    %162 = vector.shape_cast %161 : vector<1x8x128xbf16> to vector<8x128xbf16>
    %cst_108 = arith.constant dense<0.000000e+00> : vector<16x128xf32>
    %163 = tpu.matmul %160, %162, %cst_108 {dimension_numbers = #tpu.dot_dimension_numbers<[1], [0], [0], [1], [0, 0, 1, 1], [], []>} : vector<16x8xbf16>, vector<8x128xbf16>, vector<16x128xf32> -> vector<16x128xf32>
    %164 = arith.addf %154, %163 : vector<16x128xf32>
    %165 = arith.mulf %138, %145 : vector<2x8x8xf32>
    %166 = arith.truncf %165 : vector<2x8x8xf32> to vector<2x8x8xbf16>
    %167 = arith.truncf %91 : vector<2x8x8xf32> to vector<2x8x8xbf16>
    "tpu.trace_start"() <{level = 10 : i32, message = "bqk,bkd->bqd"}> : () -> ()
    %cst_109 = arith.constant dense<0.000000e+00> : vector<2x8x8xf32>
    %168 = tpu.matmul %166, %167, %cst_109 {dimension_numbers = #tpu.dot_dimension_numbers<[2], [1], [1], [2], [0, 0, 0, 1, 1, 2], [0], [0]>} : vector<2x8x8xbf16>, vector<2x8x8xbf16>, vector<2x8x8xf32> -> vector<2x8x8xf32>
    "tpu.trace_stop"() : () -> ()
    %169 = vector.shape_cast %168 : vector<2x8x8xf32> to vector<16x8xf32>
    %170 = arith.truncf %169 : vector<16x8xf32> to vector<16x8xbf16>
    %c2_110 = arith.constant 2 : index
    %c0_111 = arith.constant 0 : index
    %c0_112 = arith.constant 0 : index
    %171 = vector.load %arg9[%c2_110, %c0_111, %c0_112] : memref<4x8x128xbf16, #tpu.memory_space<vmem>>, vector<1x8x128xbf16>
    %172 = vector.shape_cast %171 : vector<1x8x128xbf16> to vector<8x128xbf16>
    %cst_113 = arith.constant dense<0.000000e+00> : vector<16x128xf32>
    %173 = tpu.matmul %170, %172, %cst_113 {dimension_numbers = #tpu.dot_dimension_numbers<[1], [0], [0], [1], [0, 0, 1, 1], [], []>} : vector<16x8xbf16>, vector<8x128xbf16>, vector<16x128xf32> -> vector<16x128xf32>
    %174 = arith.addf %164, %173 : vector<16x128xf32>
    %175 = arith.mulf %140, %145 : vector<2x8x8xf32>
    %176 = arith.truncf %175 : vector<2x8x8xf32> to vector<2x8x8xbf16>
    %177 = arith.truncf %122 : vector<2x8x8xf32> to vector<2x8x8xbf16>
    "tpu.trace_start"() <{level = 10 : i32, message = "bqk,bkd->bqd"}> : () -> ()
    %cst_114 = arith.constant dense<0.000000e+00> : vector<2x8x8xf32>
    %178 = tpu.matmul %176, %177, %cst_114 {dimension_numbers = #tpu.dot_dimension_numbers<[2], [1], [1], [2], [0, 0, 0, 1, 1, 2], [0], [0]>} : vector<2x8x8xbf16>, vector<2x8x8xbf16>, vector<2x8x8xf32> -> vector<2x8x8xf32>
    "tpu.trace_stop"() : () -> ()
    %179 = vector.shape_cast %178 : vector<2x8x8xf32> to vector<16x8xf32>
    %180 = arith.truncf %179 : vector<16x8xf32> to vector<16x8xbf16>
    %c3_115 = arith.constant 3 : index
    %c0_116 = arith.constant 0 : index
    %c0_117 = arith.constant 0 : index
    %181 = vector.load %arg9[%c3_115, %c0_116, %c0_117] : memref<4x8x128xbf16, #tpu.memory_space<vmem>>, vector<1x8x128xbf16>
    %182 = vector.shape_cast %181 : vector<1x8x128xbf16> to vector<8x128xbf16>
    %cst_118 = arith.constant dense<0.000000e+00> : vector<16x128xf32>
    %183 = tpu.matmul %180, %182, %cst_118 {dimension_numbers = #tpu.dot_dimension_numbers<[1], [0], [0], [1], [0, 0, 1, 1], [], []>} : vector<16x8xbf16>, vector<8x128xbf16>, vector<16x128xf32> -> vector<16x128xf32>
    %184 = arith.addf %174, %183 : vector<16x128xf32>
    %c0_119 = arith.constant 0 : index
    %c0_120 = arith.constant 0 : index
    %185 = vector.load %arg10[%c0_119, %c0_120] : memref<1x128xf32, #tpu.memory_space<vmem>>, vector<1x128xf32>
    %186 = vector.broadcast %185 : vector<1x128xf32> to vector<16x128xf32>
    %187 = arith.addf %184, %186 : vector<16x128xf32>
    %188 = vector.shape_cast %187 : vector<16x128xf32> to vector<2x8x128xf32>
    %c0_121 = arith.constant 0 : index
    %c0_122 = arith.constant 0 : index
    %189 = vector.load %arg11[%c0_121, %c0_122] : memref<1x128xf32, #tpu.memory_space<vmem>>, vector<1x128xf32>
    %c0_123 = arith.constant 0 : index
    %c0_124 = arith.constant 0 : index
    %190 = vector.load %arg12[%c0_123, %c0_124] : memref<1x128xf32, #tpu.memory_space<vmem>>, vector<1x128xf32>
    %cst_125 = arith.constant dense<0.000000e+00> : vector<2x128xf32>
    %191 = vector.multi_reduction <add>, %188, %cst_125 [1] : vector<2x8x128xf32> to vector<2x128xf32>
    %192 = vector.shape_cast %191 : vector<2x128xf32> to vector<2x1x128xf32>
    %193 = arith.mulf %188, %188 : vector<2x8x128xf32>
    %cst_126 = arith.constant dense<0.000000e+00> : vector<2x128xf32>
    %194 = vector.multi_reduction <add>, %193, %cst_126 [1] : vector<2x8x128xf32> to vector<2x128xf32>
    %195 = vector.shape_cast %194 : vector<2x128xf32> to vector<2x1x128xf32>
    %cst_127 = arith.constant 1.250000e-01 : f32
    %196 = vector.broadcast %cst_127 : f32 to vector<2x1x128xf32>
    %197 = arith.mulf %192, %196 : vector<2x1x128xf32>
    %cst_128 = arith.constant 8.000000e+00 : f32
    %198 = vector.broadcast %cst_128 : f32 to vector<2x1x128xf32>
    %199 = arith.mulf %198, %197 : vector<2x1x128xf32>
    %200 = arith.mulf %199, %197 : vector<2x1x128xf32>
    %201 = arith.subf %195, %200 : vector<2x1x128xf32>
    %cst_129 = arith.constant 0.000000e+00 : f32
    %202 = vector.broadcast %cst_129 : f32 to vector<2x1x128xf32>
    %203 = arith.maximumf %201, %202 : vector<2x1x128xf32>
    %cst_130 = arith.constant 0.142857149 : f32
    %204 = vector.broadcast %cst_130 : f32 to vector<2x1x128xf32>
    %205 = arith.mulf %203, %204 : vector<2x1x128xf32>
    %206 = math.sqrt %205 : vector<2x1x128xf32>
    %cst_131 = arith.constant 1.000000e-10 : f32
    %207 = vector.broadcast %cst_131 : f32 to vector<2x1x128xf32>
    %208 = arith.addf %206, %207 : vector<2x1x128xf32>
    %209 = tpu.reciprocal %208 {approx = true} : vector<2x1x128xf32> -> vector<2x1x128xf32>
    %210 = vector.shape_cast %189 : vector<1x128xf32> to vector<1x1x128xf32>
    %211 = vector.broadcast %210 : vector<1x1x128xf32> to vector<2x1x128xf32>
    %212 = arith.mulf %211, %209 : vector<2x1x128xf32>
    %213 = vector.broadcast %197 : vector<2x1x128xf32> to vector<2x8x128xf32>
    %214 = arith.subf %188, %213 : vector<2x8x128xf32>
    %215 = vector.broadcast %212 : vector<2x1x128xf32> to vector<2x8x128xf32>
    %216 = arith.mulf %214, %215 : vector<2x8x128xf32>
    %217 = arith.addf %0, %216 : vector<2x8x128xf32>
    %218 = vector.shape_cast %190 : vector<1x128xf32> to vector<1x1x128xf32>
    %219 = vector.broadcast %218 : vector<1x1x128xf32> to vector<2x8x128xf32>
    %220 = arith.addf %217, %219 : vector<2x8x128xf32>
    %c0_132 = arith.constant 0 : index
    %c0_133 = arith.constant 0 : index
    %c0_134 = arith.constant 0 : index
    %221 = vector.load %arg13[%c0_132, %c0_133, %c0_134] : memref<2x8x128xf32, #tpu.memory_space<vmem>>, vector<2x8x128xf32>
    tpu.vector_store %arg13[%c0_132, %c0_133, %c0_134], %220 {strides = array<i32>} : memref<2x8x128xf32, #tpu.memory_space<vmem>>, vector<2x8x128xf32>,
    return
  }
  func.func @transform_0(%arg0: i32) -> (i32, i32, i32) {
    %c0_i32 = arith.constant 0 : i32
    %c0_i32_0 = arith.constant 0 : i32
    %c0_i32_1 = arith.constant 0 : i32
    return %arg0, %c0_i32, %c0_i32_0 : i32, i32, i32
  }
  func.func @transform_1(%arg0: i32) -> (i32, i32, i32) {
    %c0_i32 = arith.constant 0 : i32
    %c0_i32_0 = arith.constant 0 : i32
    %c0_i32_1 = arith.constant 0 : i32
    return %arg0, %c0_i32, %c0_i32_0 : i32, i32, i32
  }
  func.func @transform_2(%arg0: i32) -> (i32, i32, i32) {
    %c0_i32 = arith.constant 0 : i32
    %c0_i32_0 = arith.constant 0 : i32
    %c0_i32_1 = arith.constant 0 : i32
    %c0_i32_2 = arith.constant 0 : i32
    return %c0_i32, %c0_i32_0, %c0_i32_1 : i32, i32, i32
  }
  func.func @transform_3(%arg0: i32) -> (i32, i32, i32) {
    %c0_i32 = arith.constant 0 : i32
    %c0_i32_0 = arith.constant 0 : i32
    %c0_i32_1 = arith.constant 0 : i32
    %c0_i32_2 = arith.constant 0 : i32
    return %c0_i32, %c0_i32_0, %c0_i32_1 : i32, i32, i32
  }
  func.func @transform_4(%arg0: i32) -> (i32, i32, i32) {
    %c0_i32 = arith.constant 0 : i32
    %c0_i32_0 = arith.constant 0 : i32
    %c0_i32_1 = arith.constant 0 : i32
    %c0_i32_2 = arith.constant 0 : i32
    return %c0_i32, %c0_i32_0, %c0_i32_1 : i32, i32, i32
  }
  func.func @transform_5(%arg0: i32) -> (i32, i32, i32) {
    %c0_i32 = arith.constant 0 : i32
    %c0_i32_0 = arith.constant 0 : i32
    %c0_i32_1 = arith.constant 0 : i32
    %c0_i32_2 = arith.constant 0 : i32
    return %c0_i32, %c0_i32_0, %c0_i32_1 : i32, i32, i32
  }
  func.func @transform_6(%arg0: i32) -> (i32, i32, i32) {
    %c0_i32 = arith.constant 0 : i32
    %c0_i32_0 = arith.constant 0 : i32
    %c0_i32_1 = arith.constant 0 : i32
    %c0_i32_2 = arith.constant 0 : i32
    return %c0_i32, %c0_i32_0, %c0_i32_1 : i32, i32, i32
  }
  func.func @transform_7(%arg0: i32) -> (i32, i32, i32) {
    %c0_i32 = arith.constant 0 : i32
    %c0_i32_0 = arith.constant 0 : i32
    %c0_i32_1 = arith.constant 0 : i32
    %c0_i32_2 = arith.constant 0 : i32
    return %c0_i32, %c0_i32_0, %c0_i32_1 : i32, i32, i32
  }
  func.func @transform_8(%arg0: i32) -> (i32, i32, i32) {
    %c0_i32 = arith.constant 0 : i32
    %c0_i32_0 = arith.constant 0 : i32
    %c0_i32_1 = arith.constant 0 : i32
    %c0_i32_2 = arith.constant 0 : i32
    return %c0_i32, %c0_i32_0, %c0_i32_1 : i32, i32, i32
  }
  func.func @transform_9(%arg0: i32) -> (i32, i32) {
    %c0_i32 = arith.constant 0 : i32
    %c0_i32_0 = arith.constant 0 : i32
    %c0_i32_1 = arith.constant 0 : i32
    return %c0_i32, %c0_i32_0 : i32, i32
  }
  func.func @transform_10(%arg0: i32) -> (i32, i32) {
    %c0_i32 = arith.constant 0 : i32
    %c0_i32_0 = arith.constant 0 : i32
    %c0_i32_1 = arith.constant 0 : i32
    return %c0_i32, %c0_i32_0 : i32, i32
  }
  func.func @transform_11(%arg0: i32) -> (i32, i32) {
    %c0_i32 = arith.constant 0 : i32
    %c0_i32_0 = arith.constant 0 : i32
    %c0_i32_1 = arith.constant 0 : i32
    return %c0_i32, %c0_i32_0 : i32, i32
  }
  func.func @transform_12(%arg0: i32) -> (i32, i32, i32) {
    %c0_i32 = arith.constant 0 : i32
    %c0_i32_0 = arith.constant 0 : i32
    %c0_i32_1 = arith.constant 0 : i32
    return %arg0, %c0_i32, %c0_i32_0 : i32, i32, i32
  }
}

module attributes {stable_mosaic.version = 11 : i64} {
  func.func @_attn_residual_kernel(%arg0: i32, %arg1: memref<2x8x128xf32, #tpu.memory_space<vmem>>, %arg2: memref<2x8x8xf32, #tpu.memory_space<vmem>>, %arg3: memref<4x128x8xbf16, #tpu.memory_space<vmem>>, %arg4: memref<4x1x8xf32, #tpu.memory_space<vmem>>, %arg5: memref<4x128x8xbf16, #tpu.memory_space<vmem>>, %arg6: memref<4x1x8xf32, #tpu.memory_space<vmem>>, %arg7: memref<4x128x8xbf16, #tpu.memory_space<vmem>>, %arg8: memref<4x1x8xf32, #tpu.memory_space<vmem>>, %arg9: memref<4x8x128xbf16, #tpu.memory_space<vmem>>, %arg10: memref<1x128xf32, #tpu.memory_space<vmem>>, %arg11: memref<1x128xf32, #tpu.memory_space<vmem>>, %arg12: memref<1x128xf32, #tpu.memory_space<vmem>>, %arg13: memref<2x8x128xf32, #tpu.memory_space<vmem>>) attributes {dimension_semantics = [#tpu.dimension_semantics<parallel>], iteration_bounds = array<i64: 1>, scalar_prefetch = 0 : i64, scratch_operands = 0 : i64, tpu.core_type = #tpu.core_type<tc>, window_params = [{transform_indices = @transform_0, window_bounds = array<i64: 2, 8, 128>}, {transform_indices = @transform_1, window_bounds = array<i64: 2, 8, 8>}, {pipeline_mode = #tpu.pipeline_mode<synchronous>, transform_indices = @transform_2, window_bounds = array<i64: 4, 128, 8>}, {pipeline_mode = #tpu.pipeline_mode<synchronous>, transform_indices = @transform_3, window_bounds = array<i64: 4, 1, 8>}, {pipeline_mode = #tpu.pipeline_mode<synchronous>, transform_indices = @transform_4, window_bounds = array<i64: 4, 128, 8>}, {pipeline_mode = #tpu.pipeline_mode<synchronous>, transform_indices = @transform_5, window_bounds = array<i64: 4, 1, 8>}, {pipeline_mode = #tpu.pipeline_mode<synchronous>, transform_indices = @transform_6, window_bounds = array<i64: 4, 128, 8>}, {pipeline_mode = #tpu.pipeline_mode<synchronous>, transform_indices = @transform_7, window_bounds = array<i64: 4, 1, 8>}, {pipeline_mode = #tpu.pipeline_mode<synchronous>, transform_indices = @transform_8, window_bounds = array<i64: 4, 8, 128>}, {pipeline_mode = #tpu.pipeline_mode<synchronous>, transform_indices = @transform_9, window_bounds = array<i64: 1, 128>}, {pipeline_mode = #tpu.pipeline_mode<synchronous>, transform_indices = @transform_10, window_bounds = array<i64: 1, 128>}, {pipeline_mode = #tpu.pipeline_mode<synchronous>, transform_indices = @transform_11, window_bounds = array<i64: 1, 128>}, {transform_indices = @transform_12, window_bounds = array<i64: 2, 8, 128>}]} {
    %c0 = arith.constant 0 : index
    %c0_0 = arith.constant 0 : index
    %c0_1 = arith.constant 0 : index
    %0 = vector.load %arg1[%c0, %c0_0, %c0_1] : memref<2x8x128xf32, #tpu.memory_space<vmem>>, vector<2x8x128xf32>
    %1 = vector.shape_cast %0 : vector<2x8x128xf32> to vector<16x128xf32>
    %2 = arith.truncf %1 : vector<16x128xf32> to vector<16x128xbf16>
    %c0_2 = arith.constant 0 : index
    %c0_3 = arith.constant 0 : index
    %c0_4 = arith.constant 0 : index
    %3 = vector.load %arg2[%c0_2, %c0_3, %c0_4] : memref<2x8x8xf32, #tpu.memory_space<vmem>>, vector<2x8x8xf32>
    %cst = arith.constant 0.000000e+00 : f32
    %4 = vector.broadcast %cst : f32 to vector<2x8x8xf32>
    %5 = arith.cmpf oeq, %3, %4 : vector<2x8x8xf32>
    %c0_5 = arith.constant 0 : index
    %c0_6 = arith.constant 0 : index
    %c0_7 = arith.constant 0 : index
    %6 = vector.load %arg3[%c0_5, %c0_6, %c0_7] : memref<4x128x8xbf16, #tpu.memory_space<vmem>>, vector<1x128x8xbf16>
    %7 = vector.shape_cast %6 : vector<1x128x8xbf16> to vector<128x8xbf16>
    %cst_8 = arith.constant dense<0.000000e+00> : vector<16x8xf32>
    %8 = tpu.matmul %2, %7, %cst_8 {dimension_numbers = #tpu.dot_dimension_numbers<[1], [0], [0], [1], [0, 0, 1, 1], [], []>} : vector<16x128xbf16>, vector<128x8xbf16>, vector<16x8xf32> -> vector<16x8xf32>
    %c0_9 = arith.constant 0 : index
    %c0_10 = arith.constant 0 : index
    %c0_11 = arith.constant 0 : index
    %9 = vector.load %arg4[%c0_9, %c0_10, %c0_11] : memref<4x1x8xf32, #tpu.memory_space<vmem>>, vector<1x1x8xf32>
    %10 = vector.shape_cast %9 : vector<1x1x8xf32> to vector<1x8xf32>
    %11 = vector.broadcast %10 : vector<1x8xf32> to vector<16x8xf32>
    %12 = arith.addf %8, %11 : vector<16x8xf32>
    %13 = vector.shape_cast %12 : vector<16x8xf32> to vector<2x8x8xf32>
    %c0_12 = arith.constant 0 : index
    %c0_13 = arith.constant 0 : index
    %c0_14 = arith.constant 0 : index
    %14 = vector.load %arg5[%c0_12, %c0_13, %c0_14] : memref<4x128x8xbf16, #tpu.memory_space<vmem>>, vector<1x128x8xbf16>
    %15 = vector.shape_cast %14 : vector<1x128x8xbf16> to vector<128x8xbf16>
    %cst_15 = arith.constant dense<0.000000e+00> : vector<16x8xf32>
    %16 = tpu.matmul %2, %15, %cst_15 {dimension_numbers = #tpu.dot_dimension_numbers<[1], [0], [0], [1], [0, 0, 1, 1], [], []>} : vector<16x128xbf16>, vector<128x8xbf16>, vector<16x8xf32> -> vector<16x8xf32>
    %c0_16 = arith.constant 0 : index
    %c0_17 = arith.constant 0 : index
    %c0_18 = arith.constant 0 : index
    %17 = vector.load %arg6[%c0_16, %c0_17, %c0_18] : memref<4x1x8xf32, #tpu.memory_space<vmem>>, vector<1x1x8xf32>
    %18 = vector.shape_cast %17 : vector<1x1x8xf32> to vector<1x8xf32>
    %19 = vector.broadcast %18 : vector<1x8xf32> to vector<16x8xf32>
    %20 = arith.addf %16, %19 : vector<16x8xf32>
    %21 = vector.shape_cast %20 : vector<16x8xf32> to vector<2x8x8xf32>
    %c0_19 = arith.constant 0 : index
    %c0_20 = arith.constant 0 : index
    %c0_21 = arith.constant 0 : index
    %22 = vector.load %arg7[%c0_19, %c0_20, %c0_21] : memref<4x128x8xbf16, #tpu.memory_space<vmem>>, vector<1x128x8xbf16>
    %23 = vector.shape_cast %22 : vector<1x128x8xbf16> to vector<128x8xbf16>
    %cst_22 = arith.constant dense<0.000000e+00> : vector<16x8xf32>
    %24 = tpu.matmul %2, %23, %cst_22 {dimension_numbers = #tpu.dot_dimension_numbers<[1], [0], [0], [1], [0, 0, 1, 1], [], []>} : vector<16x128xbf16>, vector<128x8xbf16>, vector<16x8xf32> -> vector<16x8xf32>
    %c0_23 = arith.constant 0 : index
    %c0_24 = arith.constant 0 : index
    %c0_25 = arith.constant 0 : index
    %25 = vector.load %arg8[%c0_23, %c0_24, %c0_25] : memref<4x1x8xf32, #tpu.memory_space<vmem>>, vector<1x1x8xf32>
    %26 = vector.shape_cast %25 : vector<1x1x8xf32> to vector<1x8xf32>
    %27 = vector.broadcast %26 : vector<1x8xf32> to vector<16x8xf32>
    %28 = arith.addf %24, %27 : vector<16x8xf32>
    %29 = vector.shape_cast %28 : vector<16x8xf32> to vector<2x8x8xf32>
    %30 = arith.truncf %13 : vector<2x8x8xf32> to vector<2x8x8xbf16>
    %31 = arith.truncf %21 : vector<2x8x8xf32> to vector<2x8x8xbf16>
    "tpu.trace_start"() <{level = 10 : i32, message = "bqd,bkd->bqk"}> : () -> ()
    %cst_26 = arith.constant dense<0.000000e+00> : vector<2x8x8xf32>
    %32 = tpu.matmul %30, %31, %cst_26 {dimension_numbers = #tpu.dot_dimension_numbers<[2], [2], [1], [1], [0, 0, 0, 1, 1, 1], [0], [0]>} : vector<2x8x8xbf16>, vector<2x8x8xbf16>, vector<2x8x8xf32> -> vector<2x8x8xf32>
    "tpu.trace_stop"() : () -> ()
    %cst_27 = arith.constant 0.353553385 : f32
    %33 = vector.broadcast %cst_27 : f32 to vector<2x8x8xf32>
    %34 = arith.mulf %32, %33 : vector<2x8x8xf32>
    %cst_28 = arith.constant -1.000000e+09 : f32
    %35 = vector.broadcast %cst_28 : f32 to vector<2x8x8xf32>
    %36 = arith.select %5, %35, %34 : vector<2x8x8xi1>, vector<2x8x8xf32>
    %c1 = arith.constant 1 : index
    %c0_29 = arith.constant 0 : index
    %c0_30 = arith.constant 0 : index
    %37 = vector.load %arg3[%c1, %c0_29, %c0_30] : memref<4x128x8xbf16, #tpu.memory_space<vmem>>, vector<1x128x8xbf16>
    %38 = vector.shape_cast %37 : vector<1x128x8xbf16> to vector<128x8xbf16>
    %cst_31 = arith.constant dense<0.000000e+00> : vector<16x8xf32>
    %39 = tpu.matmul %2, %38, %cst_31 {dimension_numbers = #tpu.dot_dimension_numbers<[1], [0], [0], [1], [0, 0, 1, 1], [], []>} : vector<16x128xbf16>, vector<128x8xbf16>, vector<16x8xf32> -> vector<16x8xf32>
    %c1_32 = arith.constant 1 : index
    %c0_33 = arith.constant 0 : index
    %c0_34 = arith.constant 0 : index
    %40 = vector.load %arg4[%c1_32, %c0_33, %c0_34] : memref<4x1x8xf32, #tpu.memory_space<vmem>>, vector<1x1x8xf32>
    %41 = vector.shape_cast %40 : vector<1x1x8xf32> to vector<1x8xf32>
    %42 = vector.broadcast %41 : vector<1x8xf32> to vector<16x8xf32>
    %43 = arith.addf %39, %42 : vector<16x8xf32>
    %44 = vector.shape_cast %43 : vector<16x8xf32> to vector<2x8x8xf32>
    %c1_35 = arith.constant 1 : index
    %c0_36 = arith.constant 0 : index
    %c0_37 = arith.constant 0 : index
    %45 = vector.load %arg5[%c1_35, %c0_36, %c0_37] : memref<4x128x8xbf16, #tpu.memory_space<vmem>>, vector<1x128x8xbf16>
    %46 = vector.shape_cast %45 : vector<1x128x8xbf16> to vector<128x8xbf16>
    %cst_38 = arith.constant dense<0.000000e+00> : vector<16x8xf32>
    %47 = tpu.matmul %2, %46, %cst_38 {dimension_numbers = #tpu.dot_dimension_numbers<[1], [0], [0], [1], [0, 0, 1, 1], [], []>} : vector<16x128xbf16>, vector<128x8xbf16>, vector<16x8xf32> -> vector<16x8xf32>
    %c1_39 = arith.constant 1 : index
    %c0_40 = arith.constant 0 : index
    %c0_41 = arith.constant 0 : index
    %48 = vector.load %arg6[%c1_39, %c0_40, %c0_41] : memref<4x1x8xf32, #tpu.memory_space<vmem>>, vector<1x1x8xf32>
    %49 = vector.shape_cast %48 : vector<1x1x8xf32> to vector<1x8xf32>
    %50 = vector.broadcast %49 : vector<1x8xf32> to vector<16x8xf32>
    %51 = arith.addf %47, %50 : vector<16x8xf32>
    %52 = vector.shape_cast %51 : vector<16x8xf32> to vector<2x8x8xf32>
    %c1_42 = arith.constant 1 : index
    %c0_43 = arith.constant 0 : index
    %c0_44 = arith.constant 0 : index
    %53 = vector.load %arg7[%c1_42, %c0_43, %c0_44] : memref<4x128x8xbf16, #tpu.memory_space<vmem>>, vector<1x128x8xbf16>
    %54 = vector.shape_cast %53 : vector<1x128x8xbf16> to vector<128x8xbf16>
    %cst_45 = arith.constant dense<0.000000e+00> : vector<16x8xf32>
    %55 = tpu.matmul %2, %54, %cst_45 {dimension_numbers = #tpu.dot_dimension_numbers<[1], [0], [0], [1], [0, 0, 1, 1], [], []>} : vector<16x128xbf16>, vector<128x8xbf16>, vector<16x8xf32> -> vector<16x8xf32>
    %c1_46 = arith.constant 1 : index
    %c0_47 = arith.constant 0 : index
    %c0_48 = arith.constant 0 : index
    %56 = vector.load %arg8[%c1_46, %c0_47, %c0_48] : memref<4x1x8xf32, #tpu.memory_space<vmem>>, vector<1x1x8xf32>
    %57 = vector.shape_cast %56 : vector<1x1x8xf32> to vector<1x8xf32>
    %58 = vector.broadcast %57 : vector<1x8xf32> to vector<16x8xf32>
    %59 = arith.addf %55, %58 : vector<16x8xf32>
    %60 = vector.shape_cast %59 : vector<16x8xf32> to vector<2x8x8xf32>
    %61 = arith.truncf %44 : vector<2x8x8xf32> to vector<2x8x8xbf16>
    %62 = arith.truncf %52 : vector<2x8x8xf32> to vector<2x8x8xbf16>
    "tpu.trace_start"() <{level = 10 : i32, message = "bqd,bkd->bqk"}> : () -> ()
    %cst_49 = arith.constant dense<0.000000e+00> : vector<2x8x8xf32>
    %63 = tpu.matmul %61, %62, %cst_49 {dimension_numbers = #tpu.dot_dimension_numbers<[2], [2], [1], [1], [0, 0, 0, 1, 1, 1], [0], [0]>} : vector<2x8x8xbf16>, vector<2x8x8xbf16>, vector<2x8x8xf32> -> vector<2x8x8xf32>
    "tpu.trace_stop"() : () -> ()
    %cst_50 = arith.constant 0.353553385 : f32
    %64 = vector.broadcast %cst_50 : f32 to vector<2x8x8xf32>
    %65 = arith.mulf %63, %64 : vector<2x8x8xf32>
    %cst_51 = arith.constant -1.000000e+09 : f32
    %66 = vector.broadcast %cst_51 : f32 to vector<2x8x8xf32>
    %67 = arith.select %5, %66, %65 : vector<2x8x8xi1>, vector<2x8x8xf32>
    %c2 = arith.constant 2 : index
    %c0_52 = arith.constant 0 : index
    %c0_53 = arith.constant 0 : index
    %68 = vector.load %arg3[%c2, %c0_52, %c0_53] : memref<4x128x8xbf16, #tpu.memory_space<vmem>>, vector<1x128x8xbf16>
    %69 = vector.shape_cast %68 : vector<1x128x8xbf16> to vector<128x8xbf16>
    %cst_54 = arith.constant dense<0.000000e+00> : vector<16x8xf32>
    %70 = tpu.matmul %2, %69, %cst_54 {dimension_numbers = #tpu.dot_dimension_numbers<[1], [0], [0], [1], [0, 0, 1, 1], [], []>} : vector<16x128xbf16>, vector<128x8xbf16>, vector<16x8xf32> -> vector<16x8xf32>
    %c2_55 = arith.constant 2 : index
    %c0_56 = arith.constant 0 : index
    %c0_57 = arith.constant 0 : index
    %71 = vector.load %arg4[%c2_55, %c0_56, %c0_57] : memref<4x1x8xf32, #tpu.memory_space<vmem>>, vector<1x1x8xf32>
    %72 = vector.shape_cast %71 : vector<1x1x8xf32> to vector<1x8xf32>
    %73 = vector.broadcast %72 : vector<1x8xf32> to vector<16x8xf32>
    %74 = arith.addf %70, %73 : vector<16x8xf32>
    %75 = vector.shape_cast %74 : vector<16x8xf32> to vector<2x8x8xf32>
    %c2_58 = arith.constant 2 : index
    %c0_59 = arith.constant 0 : index
    %c0_60 = arith.constant 0 : index
    %76 = vector.load %arg5[%c2_58, %c0_59, %c0_60] : memref<4x128x8xbf16, #tpu.memory_space<vmem>>, vector<1x128x8xbf16>
    %77 = vector.shape_cast %76 : vector<1x128x8xbf16> to vector<128x8xbf16>
    %cst_61 = arith.constant dense<0.000000e+00> : vector<16x8xf32>
    %78 = tpu.matmul %2, %77, %cst_61 {dimension_numbers = #tpu.dot_dimension_numbers<[1], [0], [0], [1], [0, 0, 1, 1], [], []>} : vector<16x128xbf16>, vector<128x8xbf16>, vector<16x8xf32> -> vector<16x8xf32>
    %c2_62 = arith.constant 2 : index
    %c0_63 = arith.constant 0 : index
    %c0_64 = arith.constant 0 : index
    %79 = vector.load %arg6[%c2_62, %c0_63, %c0_64] : memref<4x1x8xf32, #tpu.memory_space<vmem>>, vector<1x1x8xf32>
    %80 = vector.shape_cast %79 : vector<1x1x8xf32> to vector<1x8xf32>
    %81 = vector.broadcast %80 : vector<1x8xf32> to vector<16x8xf32>
    %82 = arith.addf %78, %81 : vector<16x8xf32>
    %83 = vector.shape_cast %82 : vector<16x8xf32> to vector<2x8x8xf32>
    %c2_65 = arith.constant 2 : index
    %c0_66 = arith.constant 0 : index
    %c0_67 = arith.constant 0 : index
    %84 = vector.load %arg7[%c2_65, %c0_66, %c0_67] : memref<4x128x8xbf16, #tpu.memory_space<vmem>>, vector<1x128x8xbf16>
    %85 = vector.shape_cast %84 : vector<1x128x8xbf16> to vector<128x8xbf16>
    %cst_68 = arith.constant dense<0.000000e+00> : vector<16x8xf32>
    %86 = tpu.matmul %2, %85, %cst_68 {dimension_numbers = #tpu.dot_dimension_numbers<[1], [0], [0], [1], [0, 0, 1, 1], [], []>} : vector<16x128xbf16>, vector<128x8xbf16>, vector<16x8xf32> -> vector<16x8xf32>
    %c2_69 = arith.constant 2 : index
    %c0_70 = arith.constant 0 : index
    %c0_71 = arith.constant 0 : index
    %87 = vector.load %arg8[%c2_69, %c0_70, %c0_71] : memref<4x1x8xf32, #tpu.memory_space<vmem>>, vector<1x1x8xf32>
    %88 = vector.shape_cast %87 : vector<1x1x8xf32> to vector<1x8xf32>
    %89 = vector.broadcast %88 : vector<1x8xf32> to vector<16x8xf32>
    %90 = arith.addf %86, %89 : vector<16x8xf32>
    %91 = vector.shape_cast %90 : vector<16x8xf32> to vector<2x8x8xf32>
    %92 = arith.truncf %75 : vector<2x8x8xf32> to vector<2x8x8xbf16>
    %93 = arith.truncf %83 : vector<2x8x8xf32> to vector<2x8x8xbf16>
    "tpu.trace_start"() <{level = 10 : i32, message = "bqd,bkd->bqk"}> : () -> ()
    %cst_72 = arith.constant dense<0.000000e+00> : vector<2x8x8xf32>
    %94 = tpu.matmul %92, %93, %cst_72 {dimension_numbers = #tpu.dot_dimension_numbers<[2], [2], [1], [1], [0, 0, 0, 1, 1, 1], [0], [0]>} : vector<2x8x8xbf16>, vector<2x8x8xbf16>, vector<2x8x8xf32> -> vector<2x8x8xf32>
    "tpu.trace_stop"() : () -> ()
    %cst_73 = arith.constant 0.353553385 : f32
    %95 = vector.broadcast %cst_73 : f32 to vector<2x8x8xf32>
    %96 = arith.mulf %94, %95 : vector<2x8x8xf32>
    %cst_74 = arith.constant -1.000000e+09 : f32
    %97 = vector.broadcast %cst_74 : f32 to vector<2x8x8xf32>
    %98 = arith.select %5, %97, %96 : vector<2x8x8xi1>, vector<2x8x8xf32>
    %c3 = arith.constant 3 : index
    %c0_75 = arith.constant 0 : index
    %c0_76 = arith.constant 0 : index
    %99 = vector.load %arg3[%c3, %c0_75, %c0_76] : memref<4x128x8xbf16, #tpu.memory_space<vmem>>, vector<1x128x8xbf16>
    %100 = vector.shape_cast %99 : vector<1x128x8xbf16> to vector<128x8xbf16>
    %cst_77 = arith.constant dense<0.000000e+00> : vector<16x8xf32>
    %101 = tpu.matmul %2, %100, %cst_77 {dimension_numbers = #tpu.dot_dimension_numbers<[1], [0], [0], [1], [0, 0, 1, 1], [], []>} : vector<16x128xbf16>, vector<128x8xbf16>, vector<16x8xf32> -> vector<16x8xf32>
    %c3_78 = arith.constant 3 : index
    %c0_79 = arith.constant 0 : index
    %c0_80 = arith.constant 0 : index
    %102 = vector.load %arg4[%c3_78, %c0_79, %c0_80] : memref<4x1x8xf32, #tpu.memory_space<vmem>>, vector<1x1x8xf32>
    %103 = vector.shape_cast %102 : vector<1x1x8xf32> to vector<1x8xf32>
    %104 = vector.broadcast %103 : vector<1x8xf32> to vector<16x8xf32>
    %105 = arith.addf %101, %104 : vector<16x8xf32>
    %106 = vector.shape_cast %105 : vector<16x8xf32> to vector<2x8x8xf32>
    %c3_81 = arith.constant 3 : index
    %c0_82 = arith.constant 0 : index
    %c0_83 = arith.constant 0 : index
    %107 = vector.load %arg5[%c3_81, %c0_82, %c0_83] : memref<4x128x8xbf16, #tpu.memory_space<vmem>>, vector<1x128x8xbf16>
    %108 = vector.shape_cast %107 : vector<1x128x8xbf16> to vector<128x8xbf16>
    %cst_84 = arith.constant dense<0.000000e+00> : vector<16x8xf32>
    %109 = tpu.matmul %2, %108, %cst_84 {dimension_numbers = #tpu.dot_dimension_numbers<[1], [0], [0], [1], [0, 0, 1, 1], [], []>} : vector<16x128xbf16>, vector<128x8xbf16>, vector<16x8xf32> -> vector<16x8xf32>
    %c3_85 = arith.constant 3 : index
    %c0_86 = arith.constant 0 : index
    %c0_87 = arith.constant 0 : index
    %110 = vector.load %arg6[%c3_85, %c0_86, %c0_87] : memref<4x1x8xf32, #tpu.memory_space<vmem>>, vector<1x1x8xf32>
    %111 = vector.shape_cast %110 : vector<1x1x8xf32> to vector<1x8xf32>
    %112 = vector.broadcast %111 : vector<1x8xf32> to vector<16x8xf32>
    %113 = arith.addf %109, %112 : vector<16x8xf32>
    %114 = vector.shape_cast %113 : vector<16x8xf32> to vector<2x8x8xf32>
    %c3_88 = arith.constant 3 : index
    %c0_89 = arith.constant 0 : index
    %c0_90 = arith.constant 0 : index
    %115 = vector.load %arg7[%c3_88, %c0_89, %c0_90] : memref<4x128x8xbf16, #tpu.memory_space<vmem>>, vector<1x128x8xbf16>
    %116 = vector.shape_cast %115 : vector<1x128x8xbf16> to vector<128x8xbf16>
    %cst_91 = arith.constant dense<0.000000e+00> : vector<16x8xf32>
    %117 = tpu.matmul %2, %116, %cst_91 {dimension_numbers = #tpu.dot_dimension_numbers<[1], [0], [0], [1], [0, 0, 1, 1], [], []>} : vector<16x128xbf16>, vector<128x8xbf16>, vector<16x8xf32> -> vector<16x8xf32>
    %c3_92 = arith.constant 3 : index
    %c0_93 = arith.constant 0 : index
    %c0_94 = arith.constant 0 : index
    %118 = vector.load %arg8[%c3_92, %c0_93, %c0_94] : memref<4x1x8xf32, #tpu.memory_space<vmem>>, vector<1x1x8xf32>
    %119 = vector.shape_cast %118 : vector<1x1x8xf32> to vector<1x8xf32>
    %120 = vector.broadcast %119 : vector<1x8xf32> to vector<16x8xf32>
    %121 = arith.addf %117, %120 : vector<16x8xf32>
    %122 = vector.shape_cast %121 : vector<16x8xf32> to vector<2x8x8xf32>
    %123 = arith.truncf %106 : vector<2x8x8xf32> to vector<2x8x8xbf16>
    %124 = arith.truncf %114 : vector<2x8x8xf32> to vector<2x8x8xbf16>
    "tpu.trace_start"() <{level = 10 : i32, message = "bqd,bkd->bqk"}> : () -> ()
    %cst_95 = arith.constant dense<0.000000e+00> : vector<2x8x8xf32>
    %125 = tpu.matmul %123, %124, %cst_95 {dimension_numbers = #tpu.dot_dimension_numbers<[2], [2], [1], [1], [0, 0, 0, 1, 1, 1], [0], [0]>} : vector<2x8x8xbf16>, vector<2x8x8xbf16>, vector<2x8x8xf32> -> vector<2x8x8xf32>
    "tpu.trace_stop"() : () -> ()
    %cst_96 = arith.constant 0.353553385 : f32
    %126 = vector.broadcast %cst_96 : f32 to vector<2x8x8xf32>
    %127 = arith.mulf %125, %126 : vector<2x8x8xf32>
    %cst_97 = arith.constant -1.000000e+09 : f32
    %128 = vector.broadcast %cst_97 : f32 to vector<2x8x8xf32>
    %129 = arith.select %5, %128, %127 : vector<2x8x8xi1>, vector<2x8x8xf32>
    %130 = arith.maximumf %36, %67 : vector<2x8x8xf32>
    %131 = arith.maximumf %130, %98 : vector<2x8x8xf32>
    %132 = arith.maximumf %131, %129 : vector<2x8x8xf32>
    %133 = arith.subf %36, %132 : vector<2x8x8xf32>
    %134 = math.exp %133 : vector<2x8x8xf32>
    %135 = arith.subf %67, %132 : vector<2x8x8xf32>
    %136 = math.exp %135 : vector<2x8x8xf32>
    %137 = arith.subf %98, %132 : vector<2x8x8xf32>
    %138 = math.exp %137 : vector<2x8x8xf32>
    %139 = arith.subf %129, %132 : vector<2x8x8xf32>
    %140 = math.exp %139 : vector<2x8x8xf32>
    %141 = arith.addf %134, %136 : vector<2x8x8xf32>
    %142 = arith.addf %141, %138 : vector<2x8x8xf32>
    %143 = arith.addf %142, %140 : vector<2x8x8xf32>
    %cst_98 = arith.constant 1.000000e+00 : f32
    %144 = vector.broadcast %cst_98 : f32 to vector<2x8x8xf32>
    %145 = arith.divf %144, %143 : vector<2x8x8xf32>
    %146 = arith.mulf %134, %145 : vector<2x8x8xf32>
    %147 = arith.truncf %146 : vector<2x8x8xf32> to vector<2x8x8xbf16>
    %148 = arith.truncf %29 : vector<2x8x8xf32> to vector<2x8x8xbf16>
    "tpu.trace_start"() <{level = 10 : i32, message = "bqk,bkd->bqd"}> : () -> ()
    %cst_99 = arith.constant dense<0.000000e+00> : vector<2x8x8xf32>
    %149 = tpu.matmul %147, %148, %cst_99 {dimension_numbers = #tpu.dot_dimension_numbers<[2], [1], [1], [2], [0, 0, 0, 1, 1, 2], [0], [0]>} : vector<2x8x8xbf16>, vector<2x8x8xbf16>, vector<2x8x8xf32> -> vector<2x8x8xf32>
    "tpu.trace_stop"() : () -> ()
    %150 = vector.shape_cast %149 : vector<2x8x8xf32> to vector<16x8xf32>
    %151 = arith.truncf %150 : vector<16x8xf32> to vector<16x8xbf16>
    %c0_100 = arith.constant 0 : index
    %c0_101 = arith.constant 0 : index
    %c0_102 = arith.constant 0 : index
    %152 = vector.load %arg9[%c0_100, %c0_101, %c0_102] : memref<4x8x128xbf16, #tpu.memory_space<vmem>>, vector<1x8x128xbf16>
    %153 = vector.shape_cast %152 : vector<1x8x128xbf16> to vector<8x128xbf16>
    %cst_103 = arith.constant dense<0.000000e+00> : vector<16x128xf32>
    %154 = tpu.matmul %151, %153, %cst_103 {dimension_numbers = #tpu.dot_dimension_numbers<[1], [0], [0], [1], [0, 0, 1, 1], [], []>} : vector<16x8xbf16>, vector<8x128xbf16>, vector<16x128xf32> -> vector<16x128xf32>
    %155 = arith.mulf %136, %145 : vector<2x8x8xf32>
    %156 = arith.truncf %155 : vector<2x8x8xf32> to vector<2x8x8xbf16>
    %157 = arith.truncf %60 : vector<2x8x8xf32> to vector<2x8x8xbf16>
    "tpu.trace_start"() <{level = 10 : i32, message = "bqk,bkd->bqd"}> : () -> ()
    %cst_104 = arith.constant dense<0.000000e+00> : vector<2x8x8xf32>
    %158 = tpu.matmul %156, %157, %cst_104 {dimension_numbers = #tpu.dot_dimension_numbers<[2], [1], [1], [2], [0, 0, 0, 1, 1, 2], [0], [0]>} : vector<2x8x8xbf16>, vector<2x8x8xbf16>, vector<2x8x8xf32> -> vector<2x8x8xf32>
    "tpu.trace_stop"() : () -> ()
    %159 = vector.shape_cast %158 : vector<2x8x8xf32> to vector<16x8xf32>
    %160 = arith.truncf %159 : vector<16x8xf32> to vector<16x8xbf16>
    %c1_105 = arith.constant 1 : index
    %c0_106 = arith.constant 0 : index
    %c0_107 = arith.constant 0 : index
    %161 = vector.load %arg9[%c1_105, %c0_106, %c0_107] : memref<4x8x128xbf16, #tpu.memory_space<vmem>>, vector<1x8x128xbf16>
    %162 = vector.shape_cast %161 : vector<1x8x128xbf16> to vector<8x128xbf16>
    %cst_108 = arith.constant dense<0.000000e+00> : vector<16x128xf32>
    %163 = tpu.matmul %160, %162, %cst_108 {dimension_numbers = #tpu.dot_dimension_numbers<[1], [0], [0], [1], [0, 0, 1, 1], [], []>} : vector<16x8xbf16>, vector<8x128xbf16>, vector<16x128xf32> -> vector<16x128xf32>
    %164 = arith.addf %154, %163 : vector<16x128xf32>
    %165 = arith.mulf %138, %145 : vector<2x8x8xf32>
    %166 = arith.truncf %165 : vector<2x8x8xf32> to vector<2x8x8xbf16>
    %167 = arith.truncf %91 : vector<2x8x8xf32> to vector<2x8x8xbf16>
    "tpu.trace_start"() <{level = 10 : i32, message = "bqk,bkd->bqd"}> : () -> ()
    %cst_109 = arith.constant dense<0.000000e+00> : vector<2x8x8xf32>
    %168 = tpu.matmul %166, %167, %cst_109 {dimension_numbers = #tpu.dot_dimension_numbers<[2], [1], [1], [2], [0, 0, 0, 1, 1, 2], [0], [0]>} : vector<2x8x8xbf16>, vector<2x8x8xbf16>, vector<2x8x8xf32> -> vector<2x8x8xf32>
    "tpu.trace_stop"() : () -> ()
    %169 = vector.shape_cast %168 : vector<2x8x8xf32> to vector<16x8xf32>
    %170 = arith.truncf %169 : vector<16x8xf32> to vector<16x8xbf16>
    %c2_110 = arith.constant 2 : index
    %c0_111 = arith.constant 0 : index
    %c0_112 = arith.constant 0 : index
    %171 = vector.load %arg9[%c2_110, %c0_111, %c0_112] : memref<4x8x128xbf16, #tpu.memory_space<vmem>>, vector<1x8x128xbf16>
    %172 = vector.shape_cast %171 : vector<1x8x128xbf16> to vector<8x128xbf16>
    %cst_113 = arith.constant dense<0.000000e+00> : vector<16x128xf32>
    %173 = tpu.matmul %170, %172, %cst_113 {dimension_numbers = #tpu.dot_dimension_numbers<[1], [0], [0], [1], [0, 0, 1, 1], [], []>} : vector<16x8xbf16>, vector<8x128xbf16>, vector<16x128xf32> -> vector<16x128xf32>
    %174 = arith.addf %164, %173 : vector<16x128xf32>
    %175 = arith.mulf %140, %145 : vector<2x8x8xf32>
    %176 = arith.truncf %175 : vector<2x8x8xf32> to vector<2x8x8xbf16>
    %177 = arith.truncf %122 : vector<2x8x8xf32> to vector<2x8x8xbf16>
    "tpu.trace_start"() <{level = 10 : i32, message = "bqk,bkd->bqd"}> : () -> ()
    %cst_114 = arith.constant dense<0.000000e+00> : vector<2x8x8xf32>
    %178 = tpu.matmul %176, %177, %cst_114 {dimension_numbers = #tpu.dot_dimension_numbers<[2], [1], [1], [2], [0, 0, 0, 1, 1, 2], [0], [0]>} : vector<2x8x8xbf16>, vector<2x8x8xbf16>, vector<2x8x8xf32> -> vector<2x8x8xf32>
    "tpu.trace_stop"() : () -> ()
    %179 = vector.shape_cast %178 : vector<2x8x8xf32> to vector<16x8xf32>
    %180 = arith.truncf %179 : vector<16x8xf32> to vector<16x8xbf16>
    %c3_115 = arith.constant 3 : index
    %c0_116 = arith.constant 0 : index
    %c0_117 = arith.constant 0 : index
    %181 = vector.load %arg9[%c3_115, %c0_116, %c0_117] : memref<4x8x128xbf16, #tpu.memory_space<vmem>>, vector<1x8x128xbf16>
    %182 = vector.shape_cast %181 : vector<1x8x128xbf16> to vector<8x128xbf16>
    %cst_118 = arith.constant dense<0.000000e+00> : vector<16x128xf32>
    %183 = tpu.matmul %180, %182, %cst_118 {dimension_numbers = #tpu.dot_dimension_numbers<[1], [0], [0], [1], [0, 0, 1, 1], [], []>} : vector<16x8xbf16>, vector<8x128xbf16>, vector<16x128xf32> -> vector<16x128xf32>
    %184 = arith.addf %174, %183 : vector<16x128xf32>
    %c0_119 = arith.constant 0 : index
    %c0_120 = arith.constant 0 : index
    %185 = vector.load %arg10[%c0_119, %c0_120] : memref<1x128xf32, #tpu.memory_space<vmem>>, vector<1x128xf32>
    %186 = vector.broadcast %185 : vector<1x128xf32> to vector<16x128xf32>
    %187 = arith.addf %184, %186 : vector<16x128xf32>
    %188 = vector.shape_cast %187 : vector<16x128xf32> to vector<2x8x128xf32>
    %c0_121 = arith.constant 0 : index
    %c0_122 = arith.constant 0 : index
    %189 = vector.load %arg11[%c0_121, %c0_122] : memref<1x128xf32, #tpu.memory_space<vmem>>, vector<1x128xf32>
    %c0_123 = arith.constant 0 : index
    %c0_124 = arith.constant 0 : index
    %190 = vector.load %arg12[%c0_123, %c0_124] : memref<1x128xf32, #tpu.memory_space<vmem>>, vector<1x128xf32>
    %cst_125 = arith.constant dense<0.000000e+00> : vector<2x128xf32>
    %191 = vector.multi_reduction <add>, %188, %cst_125 [1] : vector<2x8x128xf32> to vector<2x128xf32>
    %192 = vector.shape_cast %191 : vector<2x128xf32> to vector<2x1x128xf32>
    %193 = arith.mulf %188, %188 : vector<2x8x128xf32>
    %cst_126 = arith.constant dense<0.000000e+00> : vector<2x128xf32>
    %194 = vector.multi_reduction <add>, %193, %cst_126 [1] : vector<2x8x128xf32> to vector<2x128xf32>
    %195 = vector.shape_cast %194 : vector<2x128xf32> to vector<2x1x128xf32>
    %cst_127 = arith.constant 1.250000e-01 : f32
    %196 = vector.broadcast %cst_127 : f32 to vector<2x1x128xf32>
    %197 = arith.mulf %192, %196 : vector<2x1x128xf32>
    %cst_128 = arith.constant 8.000000e+00 : f32
    %198 = vector.broadcast %cst_128 : f32 to vector<2x1x128xf32>
    %199 = arith.mulf %198, %197 : vector<2x1x128xf32>
    %200 = arith.mulf %199, %197 : vector<2x1x128xf32>
    %201 = arith.subf %195, %200 : vector<2x1x128xf32>
    %cst_129 = arith.constant 0.000000e+00 : f32
    %202 = vector.broadcast %cst_129 : f32 to vector<2x1x128xf32>
    %203 = arith.maximumf %201, %202 : vector<2x1x128xf32>
    %cst_130 = arith.constant 0.142857149 : f32
    %204 = vector.broadcast %cst_130 : f32 to vector<2x1x128xf32>
    %205 = arith.mulf %203, %204 : vector<2x1x128xf32>
    %206 = math.sqrt %205 : vector<2x1x128xf32>
    %cst_131 = arith.constant 1.000000e-10 : f32
    %207 = vector.broadcast %cst_131 : f32 to vector<2x1x128xf32>
    %208 = arith.addf %206, %207 : vector<2x1x128xf32>
    %209 = tpu.reciprocal %208 {approx = true} : vector<2x1x128xf32> -> vector<2x1x128xf32>
    %210 = vector.shape_cast %189 : vector<1x128xf32> to vector<1x1x128xf32>
    %211 = vector.broadcast %210 : vector<1x1x128xf32> to vector<2x1x128xf32>
    %212 = arith.mulf %211, %209 : vector<2x1x128xf32>
    %213 = vector.broadcast %197 : vector<2x1x128xf32> to vector<2x8x128xf32>
    %214 = arith.subf %188, %213 : vector<2x8x128xf32>
    %215 = vector.broadcast %212 : vector<2x1x128xf32> to vector<2x8x128xf32>
    %216 = arith.mulf %214, %215 : vector<2x8x128xf32>
    %217 = arith.addf %0, %216 : vector<2x8x128xf32>
    %218 = vector.shape_cast %190 : vector<1x128xf32> to vector<1x1x128xf32>
    %219 = vector.broadcast %218 : vector<1x1x128xf32> to vector<2x8x128xf32>
    %220 = arith.addf %217, %219 : vector<2x8x128xf32>
    %c0_132 = arith.constant 0 : index
    %c0_133 = arith.constant 0 : index
    %c0_134 = arith.constant 0 : index
    %221 = vector.load %arg13[%c0_132, %c0_133, %c0_134] : memref<2x8x128xf32, #tpu.memory_space<vmem>>, vector<2x8x128xf32>
    tpu.vector_store %arg13[%c0_132, %c0_133, %c0_134], %220 {strides = array<i32>} : memref<2x8x128xf32, #tpu.memory_space<vmem>>, vector<2x8x128xf32>,
    return
  }
  func.func @transform_0(%arg0: i32) -> (i32, i32, i32) {
    %c0_i32 = arith.constant 0 : i32
    %c0_i32_0 = arith.constant 0 : i32
    %c0_i32_1 = arith.constant 0 : i32
    return %arg0, %c0_i32, %c0_i32_0 : i32, i32, i32
  }
  func.func @transform_1(%arg0: i32) -> (i32, i32, i32) {
    %c0_i32 = arith.constant 0 : i32
    %c0_i32_0 = arith.constant 0 : i32
    %c0_i32_1 = arith.constant 0 : i32
    return %arg0, %c0_i32, %c0_i32_0 : i32, i32, i32
  }
  func.func @transform_2(%arg0: i32) -> (i32, i32, i32) {
    %c0_i32 = arith.constant 0 : i32
    %c0_i32_0 = arith.constant 0 : i32
    %c0_i32_1 = arith.constant 0 : i32
    %c0_i32_2 = arith.constant 0 : i32
    return %c0_i32, %c0_i32_0, %c0_i32_1 : i32, i32, i32
  }
  func.func @transform_3(%arg0: i32) -> (i32, i32, i32) {
    %c0_i32 = arith.constant 0 : i32
    %c0_i32_0 = arith.constant 0 : i32
    %c0_i32_1 = arith.constant 0 : i32
    %c0_i32_2 = arith.constant 0 : i32
    return %c0_i32, %c0_i32_0, %c0_i32_1 : i32, i32, i32
  }
  func.func @transform_4(%arg0: i32) -> (i32, i32, i32) {
    %c0_i32 = arith.constant 0 : i32
    %c0_i32_0 = arith.constant 0 : i32
    %c0_i32_1 = arith.constant 0 : i32
    %c0_i32_2 = arith.constant 0 : i32
    return %c0_i32, %c0_i32_0, %c0_i32_1 : i32, i32, i32
  }
  func.func @transform_5(%arg0: i32) -> (i32, i32, i32) {
    %c0_i32 = arith.constant 0 : i32
    %c0_i32_0 = arith.constant 0 : i32
    %c0_i32_1 = arith.constant 0 : i32
    %c0_i32_2 = arith.constant 0 : i32
    return %c0_i32, %c0_i32_0, %c0_i32_1 : i32, i32, i32
  }
  func.func @transform_6(%arg0: i32) -> (i32, i32, i32) {
    %c0_i32 = arith.constant 0 : i32
    %c0_i32_0 = arith.constant 0 : i32
    %c0_i32_1 = arith.constant 0 : i32
    %c0_i32_2 = arith.constant 0 : i32
    return %c0_i32, %c0_i32_0, %c0_i32_1 : i32, i32, i32
  }
  func.func @transform_7(%arg0: i32) -> (i32, i32, i32) {
    %c0_i32 = arith.constant 0 : i32
    %c0_i32_0 = arith.constant 0 : i32
    %c0_i32_1 = arith.constant 0 : i32
    %c0_i32_2 = arith.constant 0 : i32
    return %c0_i32, %c0_i32_0, %c0_i32_1 : i32, i32, i32
  }
  func.func @transform_8(%arg0: i32) -> (i32, i32, i32) {
    %c0_i32 = arith.constant 0 : i32
    %c0_i32_0 = arith.constant 0 : i32
    %c0_i32_1 = arith.constant 0 : i32
    %c0_i32_2 = arith.constant 0 : i32
    return %c0_i32, %c0_i32_0, %c0_i32_1 : i32, i32, i32
  }
  func.func @transform_9(%arg0: i32) -> (i32, i32) {
    %c0_i32 = arith.constant 0 : i32
    %c0_i32_0 = arith.constant 0 : i32
    %c0_i32_1 = arith.constant 0 : i32
    return %c0_i32, %c0_i32_0 : i32, i32
  }
  func.func @transform_10(%arg0: i32) -> (i32, i32) {
    %c0_i32 = arith.constant 0 : i32
    %c0_i32_0 = arith.constant 0 : i32
    %c0_i32_1 = arith.constant 0 : i32
    return %c0_i32, %c0_i32_0 : i32, i32
  }
  func.func @transform_11(%arg0: i32) -> (i32, i32) {
    %c0_i32 = arith.constant 0 : i32
    %c0_i32_0 = arith.constant 0 : i32
    %c0_i32_1 = arith.constant 0 : i32
    return %c0_i32, %c0_i32_0 : i32, i32
  }
  func.func @transform_12(%arg0: i32) -> (i32, i32, i32) {
    %c0_i32 = arith.constant 0 : i32
    %c0_i32_0 = arith.constant 0 : i32
    %c0_i32_1 = arith.constant 0 : i32
    return %arg0, %c0_i32, %c0_i32_0 : i32, i32, i32
  }
}

</mosaic_0001>

<bundles_post_ra>
// kernel: tpu_custom_call.1
= control target key start
LH: loop header
LB: loop body
LE: loop exit
PB: predicated region body
PF: predicated region fallthrough
CT: control target
= control target key end

     0   :  { %v3511_v1 = vmov 0.0   ;;  %vm3512_vm0 = vmmov 0   ;;  %s4304_s0 = inlined_call_operand.vmem [shape: f32[2,8,128], index: 0, kind: input, shape index: {}]   ;;  %s4305_s1 = inlined_call_operand.vmem [shape: f32[2,8,8], index: 1, kind: input, shape index: {}]   ;;  %s4306_s2 = inlined_call_operand.vmem [shape: bf16[4,128,8], index: 2, kind: input, shape index: {}]   ;;  %s4307_s3 = inlined_call_operand.vmem [shape: f32[4,1,8], index: 3, kind: input, shape index: {}]   ;;  %s4308_s4 = inlined_call_operand.vmem [shape: bf16[4,128,8], index: 4, kind: input, shape index: {}]   ;;  %s4309_s5 = inlined_call_operand.vmem [shape: f32[4,1,8], index: 5, kind: input, shape index: {}]   ;;  %s4310_s6 = inlined_call_operand.vmem [shape: bf16[4,128,8], index: 6, kind: input, shape index: {}]   ;;  %s4311_s7 = inlined_call_operand.vmem [shape: f32[4,1,8], index: 7, kind: input, shape index: {}]   ;;  %s4312_s8 = inlined_call_operand.vmem [shape: bf16[4,8,128], index: 8, kind: input, shape index: {}]   ;;  %s4313_s9 = inlined_call_operand.vmem [shape: f32[1,128], index: 9, kind: input, shape index: {}]   ;;  %s4314_s10 = inlined_call_operand.vmem [shape: f32[1,128], index: 10, kind: input, shape index: {}]   ;;  %s4315_s11 = inlined_call_operand.vmem [shape: f32[1,128], index: 11, kind: input, shape index: {}]   ;;  %s4316_s12 = inlined_call_operand.hbm [shape: f32[2,8,128], index: 12, kind: output, shape index: {}]  }
   0x1   :  { %v3361_v0 = vld [vmem:[%s4308_s4] sm:$0xff]   ;;  %3016 = vmatprep.subr.bf16.mxu1 %v3511_v1  ;;  %v3362_v2 = vld [vmem:[%s4308_s4 + $0x8] sm:$0xff]   ;;  %2996 = vmatprep.subr.bf16.mxu0 %v3511_v1  ;;  %v3364_v5 = vld [vmem:[%s4308_s4 + $0x10] sm:$0xff]  }
   0x2   :  { %3017 = vmatpush3.bf16.msra.mxu1 %v3361_v0  ;;  %v3363_v3 = vld [vmem:[%s4306_s2] sm:$0xff]   ;;  %3032 = vmatprep.mubr.msk.bf16.mxu1 %vm3512_vm0, %v3511_v1  ;;  %v3365_v4 = vld [vmem:[%s4306_s2 + $0x8] sm:$0xff]   ;;  %v3367_v6 = vld [vmem:[%s4306_s2 + $0x10] sm:$0xff]  }
   0x3   :  { %3018 = vmatprep.subr.bf16.mxu1 %v3511_v1  ;;  %3012 = vmatprep.mubr.msk.bf16.mxu0 %vm3512_vm0, %v3511_v1  ;;  %v3366_v7 = vld [vmem:[%s4308_s4 + $0x18] sm:$0xff]   ;;  %v3368_v9 = vld [vmem:[%s4308_s4 + $0x20] sm:$0xff]   ;;  %v3370_v11 = vld [vmem:[%s4308_s4 + $0x28] sm:$0xff]  }
   0x4   :  { %2997 = vmatpush3.bf16.msra.mxu0 %v3363_v3  ;;  %v3369_v8 = vld [vmem:[%s4306_s2 + $0x18] sm:$0xff]   ;;  %v3371_v10 = vld [vmem:[%s4306_s2 + $0x20] sm:$0xff]   ;;  %v3373_v12 = vld [vmem:[%s4306_s2 + $0x28] sm:$0xff]  }
   0x5   :  { %2998 = vmatprep.subr.bf16.mxu0 %v3511_v1  ;;  %v3372_v13 = vld [vmem:[%s4308_s4 + $0x30] sm:$0xff]   ;;  %v3374_v15 = vld [vmem:[%s4308_s4 + $0x38] sm:$0xff]   ;;  %v43_v16 = vld [vmem:[%s4304_s0] sm:$0xff] }
   0x6   :  { %3019 = vmatpush3.bf16.msra.mxu1 %v3362_v2  ;;  %v3375_v14 = vld [vmem:[%s4306_s2 + $0x30] sm:$0xff]   ;;  %v44_v17 = vld [vmem:[%s4304_s0 + $0x8] sm:$0xff]  ;;  %v3376_v18 = vld [vmem:[%s4306_s2 + $0x38] sm:$0xff]  }
   0x7   :  { %3020 = vmatprep.subr.bf16.mxu1 %v3511_v1  ;;  %v3654_v19 = vpack.c.bf16 %v44_v17, %v43_v16  ;;  %v3377_v20 = vld [vmem:[%s4310_s6] sm:$0xff]   ;;  %v3378_v21 = vld [vmem:[%s4310_s6 + $0x8] sm:$0xff]   ;;  %v3379_v22 = vld [vmem:[%s4310_s6 + $0x10] sm:$0xff]  }
   0x8   :  { %2999 = vmatpush3.bf16.msra.mxu0 %v3365_v4  ;;  %v3380_v23 = vld [vmem:[%s4310_s6 + $0x18] sm:$0xff]   ;;  %v3381_v24 = vld [vmem:[%s4310_s6 + $0x20] sm:$0xff]   ;;  %v3382_v25 = vld [vmem:[%s4310_s6 + $0x28] sm:$0xff]  }
   0x9   :  { %3000 = vmatprep.subr.bf16.mxu0 %v3511_v1 }
   0xa   :  { %3021 = vmatpush3.bf16.msra.mxu1 %v3364_v5 }
   0xb   :  { %3022 = vmatprep.subr.bf16.mxu1 %v3511_v1 }
   0xc   :  { %3001 = vmatpush3.bf16.msra.mxu0 %v3367_v6 }
   0xd   :  { %3002 = vmatprep.subr.bf16.mxu0 %v3511_v1 }
   0xe   :  { %3023 = vmatpush3.bf16.msra.mxu1 %v3366_v7 }
   0xf   :  { %3024 = vmatprep.subr.bf16.mxu1 %v3511_v1 }
  0x10   :  { %3003 = vmatpush3.bf16.msra.mxu0 %v3369_v8 }
  0x11   :  { %3004 = vmatprep.subr.bf16.mxu0 %v3511_v1 }
  0x12   :  { %3025 = vmatpush3.bf16.msra.mxu1 %v3368_v9 }
  0x13   :  { %3026 = vmatprep.subr.bf16.mxu1 %v3511_v1 }
  0x14   :  { %3005 = vmatpush3.bf16.msra.mxu0 %v3371_v10 }
  0x15   :  { %3006 = vmatprep.subr.bf16.mxu0 %v3511_v1 }
  0x16   :  { %3027 = vmatpush3.bf16.msra.mxu1 %v3370_v11 }
  0x17   :  { %3028 = vmatprep.subr.bf16.mxu1 %v3511_v1 }
  0x18   :  { %3007 = vmatpush3.bf16.msra.mxu0 %v3373_v12 }
  0x19   :  { %3008 = vmatprep.subr.bf16.mxu0 %v3511_v1 }
  0x1a   :  { %3029 = vmatpush3.bf16.msra.mxu1 %v3372_v13 }
  0x1b   :  { %3030 = vmatprep.subr.bf16.mxu1 %v3511_v1 }
  0x1c   :  { %3009 = vmatpush3.bf16.msra.mxu0 %v3375_v14 }
  0x1d   :  { %3010 = vmatprep.subr.bf16.mxu0 %v3511_v1 }
  0x1e   :  { %3031 = vmatpush3.bf16.msra.mxu1 %v3374_v15 }
  0x1f   :  { %3056 = vmatprep.subr.bf16.mxu1 %v3511_v1 }
  0x20   :  { %3011 = vmatpush3.bf16.msra.mxu0 %v3376_v18 }
  0x21   :  { %3033 = vmatmul.mubr.bf16.vlgmr.msra.gmra.mrb[0].mxu1 %v3654_v19  ;;  %3036 = vmatprep.subr.bf16.mxu0 %v3511_v1 }
  0x22   :  { %3058 = vmatprep.mubr.msk.bf16.mxu1 %vm3512_vm0, %v3511_v1 }
  0x23   :  { %3013 = vmatmul.mubr.bf16.vlgmr.msra.gmra.mrb[0].mxu0 %v3654_v19 }
  0x24   :  { %3037 = vmatpush3.bf16.msra.mxu0 %v3377_v20  ;;  %3052 = vmatprep.mubr.msk.bf16.mxu0 %vm3512_vm0, %v3511_v1 }
  0x25   :  { %3038 = vmatprep.subr.bf16.mxu0 %v3511_v1 }
  0x28   :  { %3039 = vmatpush3.bf16.msra.mxu0 %v3378_v21 }
  0x29   :  { %3040 = vmatprep.subr.bf16.mxu0 %v3511_v1 }
  0x2c   :  { %3041 = vmatpush3.bf16.msra.mxu0 %v3379_v22 }
  0x2d   :  { %3042 = vmatprep.subr.bf16.mxu0 %v3511_v1 }
  0x30   :  { %3043 = vmatpush3.bf16.msra.mxu0 %v3380_v23 }
  0x31   :  { %3044 = vmatprep.subr.bf16.mxu0 %v3511_v1 }
  0x34   :  { %3045 = vmatpush3.bf16.msra.mxu0 %v3381_v24 }
  0x35   :  { %3046 = vmatprep.subr.bf16.mxu0 %v3511_v1 }
  0x38   :  { %3047 = vmatpush3.bf16.msra.mxu0 %v3382_v25 }
  0x39   :  { %3048 = vmatprep.subr.bf16.mxu0 %v3511_v1 }
  0x3a   :  { %17 = vsyncpa [#allocation3], 0  ;;  %v3383_v26 = vld [vmem:[%s4310_s6 + $0x30] sm:$0xff]   ;;  %v3384_v27 = vld [vmem:[%s4310_s6 + $0x38] sm:$0xff]   ;;  %vm390_vm1 = vcmask 64512   ;;  %vm1862_vm4 = vcmask 1043456  }
  0x3b   :  { %v3385_v28 = vld [vmem:[%s4308_s4 + $0x40] sm:$0xff]   ;;  %v3386_v29 = vld [vmem:[%s4308_s4 + $0x48] sm:$0xff]   ;;  %v3387_v30 = vld [vmem:[%s4308_s4 + $0x50] sm:$0xff]  }
  0x3c   :  { %3049 = vmatpush3.bf16.msra.mxu0 %v3383_v26  ;;  %v3389_v31 = vld [vmem:[%s4308_s4 + $0x58] sm:$0xff]   ;;  %v3391_v32 = vld [vmem:[%s4308_s4 + $0x60] sm:$0xff]   ;;  %v3393_v33 = vld [vmem:[%s4308_s4 + $0x68] sm:$0xff]  }
  0x3d   :  { %3050 = vmatprep.subr.bf16.mxu0 %v3511_v1  ;;  %v3395_v34 = vld [vmem:[%s4308_s4 + $0x70] sm:$0xff]   ;;  %v3397_v35 = vld [vmem:[%s4308_s4 + $0x78] sm:$0xff]   ;;  %v2571_v36 = vld [vmem:[%s4309_s5] ss:$0 sm:$0xff] }
  0x3e   :  { %v2562_v41 = vld [vmem:[%s4307_s3] ss:$0 sm:$0xff]  ;;  %v3390_v57 = vld [vmem:[%s4306_s2 + $0x48] sm:$0xff]   ;;  %v3392_v58 = vld [vmem:[%s4306_s2 + $0x50] sm:$0xff]  }
  0x3f   :  { %v3388_v55 = vld [vmem:[%s4306_s2 + $0x40] sm:$0xff]   ;;  %v3394_v59 = vld [vmem:[%s4306_s2 + $0x58] sm:$0xff]   ;;  %v3398_v61 = vld [vmem:[%s4306_s2 + $0x68] sm:$0xff]  }
  0x40   :  { %3051 = vmatpush3.bf16.msra.mxu0 %v3384_v27  ;;  %v3396_v60 = vld [vmem:[%s4306_s2 + $0x60] sm:$0xff]   ;;  %v3399_v62 = vld [vmem:[%s4306_s2 + $0x70] sm:$0xff]   ;;  %v3400_v63 = vld [vmem:[%s4306_s2 + $0x78] sm:$0xff]  }
  0x41   :  { %3088 = vmatprep.subr.bf16.mxu0 %v3511_v1  ;;  %v3789_v0 = vld [vmem:[%s4311_s7] ss:$0 sm:$0xff]  ;;  %v3402_v8 = vld [vmem:[%s4310_s6 + $0x48] sm:$0xff]   ;;  %v3403_v9 = vld [vmem:[%s4310_s6 + $0x50] sm:$0xff]  }
  0x42   :  { %v3401_v7 = vld [vmem:[%s4310_s6 + $0x40] sm:$0xff]   ;;  %v3404_v10 = vld [vmem:[%s4310_s6 + $0x58] sm:$0xff]   ;;  %v3406_v12 = vld [vmem:[%s4310_s6 + $0x68] sm:$0xff]  }
  0x43   :  { %3053 = vmatmul.mubr.bf16.vlgmr.msra.gmra.mrb[4].mxu0 %v3654_v19  ;;  %v3405_v11 = vld [vmem:[%s4310_s6 + $0x60] sm:$0xff]   ;;  %v3407_v17 = vld [vmem:[%s4310_s6 + $0x70] sm:$0xff]   ;;  %v3408_v24 = vld [vmem:[%s4310_s6 + $0x78] sm:$0xff]  }
  0x44   :  { %3089 = vmatpush3.bf16.msra.mxu0 %v3385_v28  ;;  %3104 = vmatprep.mubr.msk.bf16.mxu0 %vm3512_vm0, %v3511_v1  ;;  %v2634_v13 = vld [vmem:[%s4309_s5 + $0x1] ss:$0 sm:$0xff]  ;;  %v3410_v26 = vld [vmem:[%s4308_s4 + $0x88] sm:$0xff]   ;;  %v3411_v27 = vld [vmem:[%s4308_s4 + $0x90] sm:$0xff]  }
  0x45   :  { %3090 = vmatprep.subr.bf16.mxu0 %v3511_v1  ;;  %v3409_v25 = vld [vmem:[%s4308_s4 + $0x80] sm:$0xff]   ;;  %v3413_v28 = vld [vmem:[%s4308_s4 + $0x98] sm:$0xff]  }
  0x48   :  { %3091 = vmatpush3.bf16.msra.mxu0 %v3386_v29  ;;  %v3415_v29 = vld [vmem:[%s4308_s4 + $0xa0] sm:$0xff]  }
  0x49   :  { %3092 = vmatprep.subr.bf16.mxu0 %v3511_v1 }
  0x4c   :  { %3093 = vmatpush3.bf16.msra.mxu0 %v3387_v30  ;;  %v3417_v30 = vld [vmem:[%s4308_s4 + $0xa8] sm:$0xff]  }
  0x4d   :  { %3094 = vmatprep.subr.bf16.mxu0 %v3511_v1 }
  0x50   :  { %3095 = vmatpush3.bf16.msra.mxu0 %v3389_v31  ;;  %v3419_v31 = vld [vmem:[%s4308_s4 + $0xb0] sm:$0xff]  }
  0x51   :  { %3096 = vmatprep.subr.bf16.mxu0 %v3511_v1 }
  0x54   :  { %3097 = vmatpush3.bf16.msra.mxu0 %v3391_v32  ;;  %v3421_v32 = vld [vmem:[%s4308_s4 + $0xb8] sm:$0xff]  }
  0x55   :  { %3098 = vmatprep.subr.bf16.mxu0 %v3511_v1 }
  0x58   :  { %3099 = vmatpush3.bf16.msra.mxu0 %v3393_v33 }
  0x59   :  { %3100 = vmatprep.subr.bf16.mxu0 %v3511_v1 }
  0x5c   :  { %3101 = vmatpush3.bf16.msra.mxu0 %v3395_v34 }
  0x5d   :  { %3102 = vmatprep.subr.bf16.mxu0 %v3511_v1 }
  0x60   :  { %3103 = vmatpush3.bf16.msra.mxu0 %v3397_v35 }
  0x61   :  { %3128 = vmatprep.subr.bf16.mxu0 %v3511_v1 }
  0x63   :  { %3105 = vmatmul.mubr.bf16.vlgmr.msra.gmra.mrb[8].mxu0 %v3654_v19 }
  0x64   :  { %3130 = vmatprep.mubr.msk.bf16.mxu0 %vm3512_vm0, %v3511_v1 }
  0xf4   :  { %v267_v37 = vpop.f32.mrb[0].mxu1 }
  0xf5   :  { %v268_v38 = vadd.f32 %v2571_v36, %v267_v37  ;;  %v3034_v39 = vpop.f32.mrb[1].mxu1 }
  0xf6   :  { %v270_v40 = vpop.f32.mrb[2].mxu1  ;;  %v155_v42 = vpop.f32.mrb[0].mxu0 }
  0xf7   :  { %v388_v43 = vpack.c.bf16 %v268_v38, %v268_v38  ;;  %v3035_v44 = vpop.f32.mrb[3].mxu1  ;;  %v3014_v45 = vpop.f32.mrb[1].mxu0  ;;  %v271_v48 = vadd.f32 %v2571_v36, %v270_v40  ;;  %v156_v49 = vadd.f32 %v2562_v41, %v155_v42 }
  0xf8   :  { %v158_v46 = vpop.f32.mrb[2].mxu0 }
  0xf9   :  { %v395_v47 = vsel %vm390_vm1, %v388_v43, 0  ;;  %v3015_v50 = vpop.f32.mrb[3].mxu0  ;;  %v389_v51 = vpack.c.bf16 %v271_v48, %v271_v48  ;;  %v386_v52 = vpack.c.bf16 %v156_v49, %v156_v49  ;;  %v159_v54 = vadd.f32 %v2562_v41, %v158_v46  ;;  %v2608_v41 = vld [vmem:[%s4307_s3 + $0x1] ss:$0 sm:$0xff] }
  0xfa   :  { %3057 = vmatpush3.bf16.xpose.msra.mxu1 %v395_v47 }
  0xfb   :  { %3062 = vmatprep.subr.bf16.mxu1 %v3511_v1  ;;  %v441_v53 = vsel %vm390_vm1, %v389_v51, 0  ;;  %v387_v56 = vpack.c.bf16 %v159_v54, %v159_v54  ;;  %v3412_v51 = vld [vmem:[%s4306_s2 + $0x80] sm:$0xff]   ;;  %v3416_v54 = vld [vmem:[%s4306_s2 + $0x90] sm:$0xff]  }
 0x101   :  { %3059 = vmatmul.mubr.msk.bf16.vlgmr.msra.gmra.mrb[4].mxu1 %vm390_vm1, %v386_v52 }
 0x102   :  { %3063 = vmatpush3.bf16.xpose.msra.mxu1 %v441_v53  ;;  %3064 = vmatprep.mubr.msk.bf16.mxu1 %vm3512_vm0, %v3511_v1  ;;  %v3414_v53 = vld [vmem:[%s4306_s2 + $0x88] sm:$0xff]  }
 0x103   :  { %3068 = vmatprep.subr.bf16.mxu1 %v3511_v1 }
 0x109   :  { %3065 = vmatmul.mubr.msk.bf16.vlgmr.msra.gmra.mrb[8].mxu1 %vm390_vm1, %v387_v56  ;;  %v3420_v56 = vld [vmem:[%s4306_s2 + $0xa0] sm:$0xff]  }
 0x10a   :  { %3069 = vmatpush3.bf16.msra.mxu1 %v3388_v55  ;;  %3084 = vmatprep.mubr.msk.bf16.mxu1 %vm3512_vm0, %v3511_v1  ;;  %v3418_v55 = vld [vmem:[%s4306_s2 + $0x98] sm:$0xff]  }
 0x10b   :  { %3070 = vmatprep.subr.bf16.mxu1 %v3511_v1 }
 0x10e   :  { %3071 = vmatpush3.bf16.msra.mxu1 %v3390_v57  ;;  %v3422_v57 = vld [vmem:[%s4306_s2 + $0xa8] sm:$0xff]  }
 0x10f   :  { %3072 = vmatprep.subr.bf16.mxu1 %v3511_v1 }
 0x112   :  { %3073 = vmatpush3.bf16.msra.mxu1 %v3392_v58  ;;  %v3423_v58 = vld [vmem:[%s4306_s2 + $0xb0] sm:$0xff]  }
 0x113   :  { %3074 = vmatprep.subr.bf16.mxu1 %v3511_v1 }
 0x116   :  { %3075 = vmatpush3.bf16.msra.mxu1 %v3394_v59  ;;  %v379_v2 = vpop.f32.mrb[4].mxu0  ;;  %v3424_v59 = vld [vmem:[%s4306_s2 + $0xb8] sm:$0xff]  }
 0x117   :  { %3076 = vmatprep.subr.bf16.mxu1 %v3511_v1  ;;  %v3792_v3 = vadd.f32 %v3789_v0, %v379_v2  ;;  %v3054_v4 = vpop.f32.mrb[5].mxu0  ;;  %v3425_v2 = vld [vmem:[%s4310_s6 + $0x80] sm:$0xff]  }
 0x118   :  { %v3794_v5 = vpop.f32.mrb[6].mxu0  ;;  %v3426_v4 = vld [vmem:[%s4310_s6 + $0x88] sm:$0xff]  }
 0x119   :  { %v3055_v6 = vpop.f32.mrb[7].mxu0 }
 0x11a   :  { %3077 = vmatpush3.bf16.msra.mxu1 %v3396_v60  ;;  %v3427_v6 = vld [vmem:[%s4310_s6 + $0x90] sm:$0xff]  }
 0x11b   :  { %3078 = vmatprep.subr.bf16.mxu1 %v3511_v1 }
 0x11e   :  { %3079 = vmatpush3.bf16.msra.mxu1 %v3398_v61 }
 0x11f   :  { %3080 = vmatprep.subr.bf16.mxu1 %v3511_v1 }
 0x122   :  { %3081 = vmatpush3.bf16.msra.mxu1 %v3399_v62 }
 0x123   :  { %3082 = vmatprep.subr.bf16.mxu1 %v3511_v1 }
 0x126   :  { %3083 = vmatpush3.bf16.msra.mxu1 %v3400_v63 }
 0x127   :  { %3108 = vmatprep.subr.bf16.mxu1 %v3511_v1 }
 0x129   :  { %3085 = vmatmul.mubr.bf16.vlgmr.msra.gmra.mrb[12].mxu1 %v3654_v19 }
 0x12a   :  { %3124 = vmatprep.mubr.msk.bf16.mxu1 %vm3512_vm0, %v3511_v1  ;;  %3109 = vmatpush3.bf16.msra.mxu1 %v3401_v7  ;;  %v3428_v7 = vld [vmem:[%s4310_s6 + $0x98] sm:$0xff]  }
 0x12b   :  { %3110 = vmatprep.subr.bf16.mxu1 %v3511_v1 }
 0x12e   :  { %3111 = vmatpush3.bf16.msra.mxu1 %v3402_v8  ;;  %v3429_v8 = vld [vmem:[%s4310_s6 + $0xa0] sm:$0xff]  }
 0x12f   :  { %3112 = vmatprep.subr.bf16.mxu1 %v3511_v1 }
 0x132   :  { %3113 = vmatpush3.bf16.msra.mxu1 %v3403_v9  ;;  %v2714_v9 = vld [vmem:[%s4309_s5 + $0x2] ss:$0 sm:$0xff] }
 0x133   :  { %3114 = vmatprep.subr.bf16.mxu1 %v3511_v1 }
 0x136   :  { %3115 = vmatpush3.bf16.msra.mxu1 %v3404_v10  ;;  %v708_v14 = vpop.f32.mrb[8].mxu0  ;;  %v3430_v10 = vld [vmem:[%s4310_s6 + $0xa8] sm:$0xff]  }
 0x137   :  { %3116 = vmatprep.subr.bf16.mxu1 %v3511_v1  ;;  %v709_v15 = vadd.f32 %v2634_v13, %v708_v14  ;;  %v3106_v16 = vpop.f32.mrb[9].mxu0 }
 0x138   :  { %v711_v18 = vpop.f32.mrb[10].mxu0 }
 0x139   :  { %v831_v20 = vpack.c.bf16 %v709_v15, %v709_v15  ;;  %v712_v21 = vadd.f32 %v2634_v13, %v711_v18  ;;  %v3107_v22 = vpop.f32.mrb[11].mxu0  ;;  %v3431_v15 = vld [vmem:[%s4310_s6 + $0xb0] sm:$0xff]  }
 0x13a   :  { %3117 = vmatpush3.bf16.msra.mxu1 %v3405_v11  ;;  %v3433_v22 = vld [vmem:[%s4308_s4 + $0xc0] sm:$0xff]  }
 0x13b   :  { %3118 = vmatprep.subr.bf16.mxu1 %v3511_v1  ;;  %v837_v23 = vsel %vm390_vm1, %v831_v20, 0  ;;  %v832_v43 = vpack.c.bf16 %v712_v21, %v712_v21  ;;  %v3432_v21 = vld [vmem:[%s4310_s6 + $0xb8] sm:$0xff]  }
 0x13c   :  { %3129 = vmatpush3.bf16.xpose.msra.mxu0 %v837_v23  ;;  %v3434_v23 = vld [vmem:[%s4308_s4 + $0xc8] sm:$0xff]  }
 0x13d   :  { %3134 = vmatprep.subr.bf16.mxu0 %v3511_v1  ;;  %v883_v49 = vsel %vm390_vm1, %v832_v43, 0 }
 0x13e   :  { %3119 = vmatpush3.bf16.msra.mxu1 %v3406_v12 }
 0x13f   :  { %3120 = vmatprep.subr.bf16.mxu1 %v3511_v1 }
 0x142   :  { %3121 = vmatpush3.bf16.msra.mxu1 %v3407_v17 }
 0x143   :  { %3122 = vmatprep.subr.bf16.mxu1 %v3511_v1 }
 0x146   :  { %3123 = vmatpush3.bf16.msra.mxu1 %v3408_v24  ;;  %v3435_v24 = vld [vmem:[%s4308_s4 + $0xd0] sm:$0xff]  }
 0x147   :  { %3160 = vmatprep.subr.bf16.mxu1 %v3511_v1 }
 0x149   :  { %3125 = vmatmul.mubr.bf16.vlgmr.msra.gmra.mrb[16].mxu1 %v3654_v19 }
 0x14a   :  { %3161 = vmatpush3.bf16.msra.mxu1 %v3409_v25  ;;  %3176 = vmatprep.mubr.msk.bf16.mxu1 %vm3512_vm0, %v3511_v1  ;;  %v3437_v25 = vld [vmem:[%s4308_s4 + $0xd8] sm:$0xff]  }
 0x14b   :  { %3162 = vmatprep.subr.bf16.mxu1 %v3511_v1 }
 0x14e   :  { %3163 = vmatpush3.bf16.msra.mxu1 %v3410_v26  ;;  %v3439_v26 = vld [vmem:[%s4308_s4 + $0xe0] sm:$0xff]  }
 0x14f   :  { %3164 = vmatprep.subr.bf16.mxu1 %v3511_v1 }
 0x152   :  { %3165 = vmatpush3.bf16.msra.mxu1 %v3411_v27  ;;  %v3441_v27 = vld [vmem:[%s4308_s4 + $0xe8] sm:$0xff]  }
 0x153   :  { %3166 = vmatprep.subr.bf16.mxu1 %v3511_v1 }
 0x156   :  { %3167 = vmatpush3.bf16.msra.mxu1 %v3413_v28  ;;  %v3443_v28 = vld [vmem:[%s4308_s4 + $0xf0] sm:$0xff]  }
 0x157   :  { %3168 = vmatprep.subr.bf16.mxu1 %v3511_v1 }
 0x15a   :  { %3169 = vmatpush3.bf16.msra.mxu1 %v3415_v29  ;;  %v3445_v29 = vld [vmem:[%s4308_s4 + $0xf8] sm:$0xff]  }
 0x15b   :  { %3170 = vmatprep.subr.bf16.mxu1 %v3511_v1 }
 0x15e   :  { %3171 = vmatpush3.bf16.msra.mxu1 %v3417_v30  ;;  %v4005_v30 = vld [vmem:[%s4305_s1] sm:$0xff] }
 0x15f   :  { %3172 = vmatprep.subr.bf16.mxu1 %v3511_v1  ;;  %vm48_vm2 = vcmp.eq.f32.partialorder %v4005_v30, 0.0 }
 0x162   :  { %3173 = vmatpush3.bf16.msra.mxu1 %v3419_v31 }
 0x163   :  { %3174 = vmatprep.subr.bf16.mxu1 %v3511_v1 }
 0x166   :  { %3175 = vmatpush3.bf16.msra.mxu1 %v3421_v32 }
 0x167   :  { %3200 = vmatprep.subr.bf16.mxu1 %v3511_v1 }
 0x169   :  { %3177 = vmatmul.mubr.bf16.vlgmr.msra.gmra.mrb[20].mxu1 %v3654_v19 }
 0x16a   :  { %3202 = vmatprep.mubr.msk.bf16.mxu1 %vm3512_vm0, %v3511_v1 }
 0x1d4   :  { %v3871_v33 = vpop.f32.mrb[4].mxu1 }
 0x1d5   :  { %v3060_v34 = vpop.f32.mrb[5].mxu1  ;;  %v483_v31 = vmul.f32 0.35355338, %v3871_v33  ;;  %v4022_v33 = vld [vmem:[%s4305_s1 + $0x8] sm:$0xff] }
 0x1d6   :  { %v434_v35 = vpop.f32.mrb[6].mxu1  ;;  %vm49_vm3 = vcmp.eq.f32.partialorder %v4022_v33, 0.0 }
 0x1d7   :  { %v3061_v36 = vpop.f32.mrb[7].mxu1 }
 0x1dc   :  { %v3873_v37 = vpop.f32.mrb[8].mxu1 }
 0x1dd   :  { %v3066_v38 = vpop.f32.mrb[9].mxu1 }
 0x1de   :  { %v480_v39 = vpop.f32.mrb[10].mxu1  ;;  %v4011_v38 = vsel %vm48_vm2, -1e+09, %v483_v31 }
 0x1df   :  { %v3067_v40 = vpop.f32.mrb[11].mxu1 }
 0x1fc   :  { %v594_v42 = vpop.f32.mrb[12].mxu1 }
 0x1fd   :  { %v595_v44 = vadd.f32 %v2608_v41, %v594_v42  ;;  %v3086_v45 = vpop.f32.mrb[13].mxu1  ;;  %v484_v42 = vmul.f32 0.35355338, %v3873_v37  ;;  %v2688_v37 = vld [vmem:[%s4307_s3 + $0x2] ss:$0 sm:$0xff] }
 0x1fe   :  { %v597_v46 = vpop.f32.mrb[14].mxu1 }
 0x1ff   :  { %v829_v47 = vpack.c.bf16 %v595_v44, %v595_v44  ;;  %v3087_v48 = vpop.f32.mrb[15].mxu1  ;;  %v598_v50 = vadd.f32 %v2608_v41, %v597_v46 }
 0x201   :  { %3131 = vmatmul.mubr.msk.bf16.vlgmr.msra.gmra.mrb[12].mxu0 %vm390_vm1, %v829_v47  ;;  %v830_v52 = vpack.c.bf16 %v598_v50, %v598_v50  ;;  %v4028_v47 = vsel %vm49_vm3, -1e+09, %v484_v42 }
 0x202   :  { %3135 = vmatpush3.bf16.xpose.msra.mxu0 %v883_v49  ;;  %3136 = vmatprep.mubr.msk.bf16.mxu0 %vm3512_vm0, %v3511_v1 }
 0x203   :  { %3140 = vmatprep.subr.bf16.mxu0 %v3511_v1 }
 0x209   :  { %3137 = vmatmul.mubr.msk.bf16.vlgmr.msra.gmra.mrb[16].mxu0 %vm390_vm1, %v830_v52 }
 0x20a   :  { %3141 = vmatpush3.bf16.msra.mxu0 %v3412_v51  ;;  %3156 = vmatprep.mubr.msk.bf16.mxu0 %vm3512_vm0, %v3511_v1 }
 0x20b   :  { %3142 = vmatprep.subr.bf16.mxu0 %v3511_v1 }
 0x20e   :  { %3143 = vmatpush3.bf16.msra.mxu0 %v3414_v53 }
 0x20f   :  { %3144 = vmatprep.subr.bf16.mxu0 %v3511_v1 }
 0x212   :  { %3145 = vmatpush3.bf16.msra.mxu0 %v3416_v54 }
 0x213   :  { %3146 = vmatprep.subr.bf16.mxu0 %v3511_v1 }
 0x216   :  { %3147 = vmatpush3.bf16.msra.mxu0 %v3418_v55 }
 0x217   :  { %3148 = vmatprep.subr.bf16.mxu0 %v3511_v1 }
 0x21a   :  { %3149 = vmatpush3.bf16.msra.mxu0 %v3420_v56 }
 0x21b   :  { %3150 = vmatprep.subr.bf16.mxu0 %v3511_v1 }
 0x21c   :  { %v3921_v60 = vpop.f32.mrb[16].mxu1 }
 0x21d   :  { %v3126_v61 = vpop.f32.mrb[17].mxu1 }
 0x21e   :  { %3151 = vmatpush3.bf16.msra.mxu0 %v3422_v57  ;;  %v3923_v62 = vpop.f32.mrb[18].mxu1  ;;  %v3436_v61 = vld [vmem:[%s4306_s2 + $0xc0] sm:$0xff]  }
 0x21f   :  { %3152 = vmatprep.subr.bf16.mxu0 %v3511_v1  ;;  %v3127_v63 = vpop.f32.mrb[19].mxu1 }
 0x222   :  { %3153 = vmatpush3.bf16.msra.mxu0 %v3423_v58 }
 0x223   :  { %3154 = vmatprep.subr.bf16.mxu0 %v3511_v1 }
 0x226   :  { %3155 = vmatpush3.bf16.msra.mxu0 %v3424_v59 }
 0x227   :  { %3180 = vmatprep.subr.bf16.mxu0 %v3511_v1 }
 0x229   :  { %3157 = vmatmul.mubr.bf16.vlgmr.msra.gmra.mrb[20].mxu0 %v3654_v19 }
 0x22a   :  { %3196 = vmatprep.mubr.msk.bf16.mxu0 %vm3512_vm0, %v3511_v1  ;;  %3181 = vmatpush3.bf16.msra.mxu0 %v3425_v2  ;;  %v3438_v2 = vld [vmem:[%s4306_s2 + $0xc8] sm:$0xff]  }
 0x22b   :  { %3182 = vmatprep.subr.bf16.mxu0 %v3511_v1 }
 0x22e   :  { %3183 = vmatpush3.bf16.msra.mxu0 %v3426_v4  ;;  %v3440_v4 = vld [vmem:[%s4306_s2 + $0xd0] sm:$0xff]  }
 0x22f   :  { %3184 = vmatprep.subr.bf16.mxu0 %v3511_v1 }
 0x232   :  { %3185 = vmatpush3.bf16.msra.mxu0 %v3427_v6  ;;  %v3442_v6 = vld [vmem:[%s4306_s2 + $0xd8] sm:$0xff]  }
 0x233   :  { %3186 = vmatprep.subr.bf16.mxu0 %v3511_v1 }
 0x236   :  { %3187 = vmatpush3.bf16.msra.mxu0 %v3428_v7  ;;  %v3444_v7 = vld [vmem:[%s4306_s2 + $0xe0] sm:$0xff]  }
 0x237   :  { %3188 = vmatprep.subr.bf16.mxu0 %v3511_v1 }
 0x23a   :  { %3189 = vmatpush3.bf16.msra.mxu0 %v3429_v8  ;;  %v3446_v8 = vld [vmem:[%s4306_s2 + $0xe8] sm:$0xff]  }
 0x23b   :  { %3190 = vmatprep.subr.bf16.mxu0 %v3511_v1 }
 0x23c   :  { %v1150_v11 = vpop.f32.mrb[20].mxu1 }
 0x23d   :  { %v1151_v12 = vadd.f32 %v2714_v9, %v1150_v11  ;;  %v3178_v13 = vpop.f32.mrb[21].mxu1  ;;  %v3449_v11 = vld [vmem:[%s4310_s6 + $0xc0] sm:$0xff]  }
 0x23e   :  { %3191 = vmatpush3.bf16.msra.mxu0 %v3430_v10  ;;  %v1153_v14 = vpop.f32.mrb[22].mxu1  ;;  %v3448_v10 = vld [vmem:[%s4306_s2 + $0xf8] sm:$0xff]   ;;  %v3451_v13 = vld [vmem:[%s4310_s6 + $0xd0] sm:$0xff]  }
 0x23f   :  { %v1273_v16 = vpack.c.bf16 %v1151_v12, %v1151_v12  ;;  %v3954_v17 = vadd.f32 %v2714_v9, %v1153_v14  ;;  %v3179_v18 = vpop.f32.mrb[23].mxu1  ;;  %3192 = vmatprep.subr.bf16.mxu0 %v3511_v1  ;;  %v3447_v9 = vld [vmem:[%s4306_s2 + $0xf0] sm:$0xff]   ;;  %v3450_v12 = vld [vmem:[%s4310_s6 + $0xc8] sm:$0xff]   ;;  %v3452_v14 = vld [vmem:[%s4310_s6 + $0xd8] sm:$0xff]  }
 0x240   :  { %v383_v18 = vadd.f32 %v3789_v0, %v3794_v5 }
 0x241   :  { %v1279_v20 = vsel %vm390_vm1, %v1273_v16, 0  ;;  %v1274_v52 = vpack.c.bf16 %v3954_v17, %v3954_v17  ;;  %v3454_v16 = vld [vmem:[%s4310_s6 + $0xe8] sm:$0xff]   ;;  %v3455_v17 = vld [vmem:[%s4310_s6 + $0xf0] sm:$0xff]  }
 0x242   :  { %3193 = vmatpush3.bf16.msra.mxu0 %v3431_v15  ;;  %3201 = vmatpush3.bf16.xpose.msra.mxu1 %v1279_v20  ;;  %v3453_v15 = vld [vmem:[%s4310_s6 + $0xe0] sm:$0xff]   ;;  %v3456_v20 = vld [vmem:[%s4310_s6 + $0xf8] sm:$0xff]  }
 0x243   :  { %3194 = vmatprep.subr.bf16.mxu0 %v3511_v1  ;;  %3206 = vmatprep.subr.bf16.mxu1 %v3511_v1  ;;  %v1325_v58 = vsel %vm390_vm1, %v1274_v52, 0 }
 0x246   :  { %3195 = vmatpush3.bf16.msra.mxu0 %v3432_v21  ;;  %v1858_v21 = vpack.c.bf16 %v383_v18, %v383_v18 }
 0x247   :  { %3232 = vmatprep.subr.bf16.mxu0 %v3511_v1 }
 0x249   :  { %3197 = vmatmul.mubr.bf16.vlgmr.msra.gmra.mrb[24].mxu0 %v3654_v19 }
 0x24a   :  { %3233 = vmatpush3.bf16.msra.mxu0 %v3433_v22  ;;  %3248 = vmatprep.mubr.msk.bf16.mxu0 %vm3512_vm0, %v3511_v1  ;;  %v1910_v22 = vsel %vm1862_vm4, %v1858_v21, 0 }
 0x24b   :  { %3234 = vmatprep.subr.bf16.mxu0 %v3511_v1 }
 0x24e   :  { %3235 = vmatpush3.bf16.msra.mxu0 %v3434_v23 }
 0x24f   :  { %3236 = vmatprep.subr.bf16.mxu0 %v3511_v1 }
 0x252   :  { %3237 = vmatpush3.bf16.msra.mxu0 %v3435_v24 }
 0x253   :  { %3238 = vmatprep.subr.bf16.mxu0 %v3511_v1 }
 0x256   :  { %3239 = vmatpush3.bf16.msra.mxu0 %v3437_v25  ;;  %v2794_v25 = vld [vmem:[%s4309_s5 + $0x3] ss:$0 sm:$0xff] }
 0x257   :  { %3240 = vmatprep.subr.bf16.mxu0 %v3511_v1 }
 0x25a   :  { %3241 = vmatpush3.bf16.msra.mxu0 %v3439_v26 }
 0x25b   :  { %3242 = vmatprep.subr.bf16.mxu0 %v3511_v1 }
 0x25e   :  { %3243 = vmatpush3.bf16.msra.mxu0 %v3441_v27 }
 0x25f   :  { %3244 = vmatprep.subr.bf16.mxu0 %v3511_v1 }
 0x262   :  { %3245 = vmatpush3.bf16.msra.mxu0 %v3443_v28 }
 0x263   :  { %3246 = vmatprep.subr.bf16.mxu0 %v3511_v1 }
 0x266   :  { %3247 = vmatpush3.bf16.msra.mxu0 %v3445_v29 }
 0x267   :  { %3272 = vmatprep.subr.bf16.mxu0 %v3511_v1 }
 0x269   :  { %3249 = vmatmul.mubr.bf16.vlgmr.msra.gmra.mrb[28].mxu0 %v3654_v19 }
 0x26a   :  { %3274 = vmatprep.mubr.msk.bf16.mxu0 %vm3512_vm0, %v3511_v1 }
 0x2d4   :  { %v873_v32 = vpop.f32.mrb[12].mxu0 }
 0x2d5   :  { %v925_v34 = vmul.f32 0.35355338, %v873_v32  ;;  %v3132_v35 = vpop.f32.mrb[13].mxu0 }
 0x2d6   :  { %v876_v36 = vpop.f32.mrb[14].mxu0 }
 0x2d7   :  { %v4015_v39 = vsel %vm48_vm2, -1e+09, %v925_v34  ;;  %v3133_v40 = vpop.f32.mrb[15].mxu0 }
 0x2d8   :  { %v1813_v41 = vmax.f32 %v4011_v38, %v4015_v39 }
 0x2dc   :  { %v919_v43 = vpop.f32.mrb[16].mxu0 }
 0x2dd   :  { %v926_v44 = vmul.f32 0.35355338, %v919_v43  ;;  %v3138_v45 = vpop.f32.mrb[17].mxu0 }
 0x2de   :  { %v922_v46 = vpop.f32.mrb[18].mxu0 }
 0x2df   :  { %v4032_v48 = vsel %vm49_vm3, -1e+09, %v926_v44  ;;  %v3139_v49 = vpop.f32.mrb[19].mxu0 }
 0x2e0   :  { %v1814_v50 = vmax.f32 %v4028_v47, %v4032_v48 }
 0x2fc   :  { %v1036_v51 = vpop.f32.mrb[20].mxu0 }
 0x2fd   :  { %v1037_v53 = vadd.f32 %v2688_v37, %v1036_v51  ;;  %v3158_v54 = vpop.f32.mrb[21].mxu0 }
 0x2fe   :  { %v1039_v55 = vpop.f32.mrb[22].mxu0 }
 0x2ff   :  { %v1271_v56 = vpack.c.bf16 %v1037_v53, %v1037_v53  ;;  %v3159_v57 = vpop.f32.mrb[23].mxu0  ;;  %v1040_v59 = vadd.f32 %v2688_v37, %v1039_v55  ;;  %v2768_v55 = vld [vmem:[%s4307_s3 + $0x3] ss:$0 sm:$0xff] }
 0x301   :  { %3203 = vmatmul.mubr.msk.bf16.vlgmr.msra.gmra.mrb[24].mxu1 %vm390_vm1, %v1271_v56  ;;  %v1272_v63 = vpack.c.bf16 %v1040_v59, %v1040_v59 }
 0x302   :  { %3207 = vmatpush3.bf16.xpose.msra.mxu1 %v1325_v58  ;;  %3208 = vmatprep.mubr.msk.bf16.mxu1 %vm3512_vm0, %v3511_v1 }
 0x303   :  { %3212 = vmatprep.subr.bf16.mxu1 %v3511_v1 }
 0x309   :  { %3209 = vmatmul.mubr.msk.bf16.vlgmr.msra.gmra.mrb[28].mxu1 %vm390_vm1, %v1272_v63 }
 0x30a   :  { %3213 = vmatpush3.bf16.msra.mxu1 %v3436_v61  ;;  %3228 = vmatprep.mubr.msk.bf16.mxu1 %vm3512_vm0, %v3511_v1 }
 0x30b   :  { %3214 = vmatprep.subr.bf16.mxu1 %v3511_v1 }
 0x30e   :  { %3215 = vmatpush3.bf16.msra.mxu1 %v3438_v2 }
 0x30f   :  { %3216 = vmatprep.subr.bf16.mxu1 %v3511_v1 }
 0x312   :  { %3217 = vmatpush3.bf16.msra.mxu1 %v3440_v4  ;;  %v1857_v4 = vpack.c.bf16 %v3792_v3, %v3792_v3 }
 0x313   :  { %3218 = vmatprep.subr.bf16.mxu1 %v3511_v1 }
 0x316   :  { %3219 = vmatpush3.bf16.msra.mxu1 %v3442_v6 }
 0x317   :  { %3220 = vmatprep.subr.bf16.mxu1 %v3511_v1 }
 0x31a   :  { %3221 = vmatpush3.bf16.msra.mxu1 %v3444_v7  ;;  %v1864_v7 = vsel %vm1862_vm4, %v1857_v4, 0 }
 0x31b   :  { %3222 = vmatprep.subr.bf16.mxu1 %v3511_v1 }
 0x31c   :  { %v4123_v0 = vpop.f32.mrb[24].mxu0 }
 0x31d   :  { %v3198_v5 = vpop.f32.mrb[25].mxu0 }
 0x31e   :  { %3223 = vmatpush3.bf16.msra.mxu1 %v3446_v8  ;;  %v4125_v23 = vpop.f32.mrb[26].mxu0  ;;  %v4160_v8 = vld [vmem:[%s4311_s7 + $0x3] ss:$0 sm:$0xff] }
 0x31f   :  { %3224 = vmatprep.subr.bf16.mxu1 %v3511_v1  ;;  %v3199_v24 = vpop.f32.mrb[27].mxu0 }
 0x322   :  { %3225 = vmatpush3.bf16.msra.mxu1 %v3447_v9 }
 0x323   :  { %3226 = vmatprep.subr.bf16.mxu1 %v3511_v1 }
 0x326   :  { %3227 = vmatpush3.bf16.msra.mxu1 %v3448_v10 }
 0x327   :  { %3252 = vmatprep.subr.bf16.mxu1 %v3511_v1 }
 0x329   :  { %3229 = vmatmul.mubr.bf16.vlgmr.msra.gmra.mrb[32].mxu1 %v3654_v19 }
 0x32a   :  { %3253 = vmatpush3.bf16.msra.mxu1 %v3449_v11  ;;  %3268 = vmatprep.mubr.msk.bf16.mxu1 %vm3512_vm0, %v3511_v1 }
 0x32b   :  { %3254 = vmatprep.subr.bf16.mxu1 %v3511_v1 }
 0x32e   :  { %3255 = vmatpush3.bf16.msra.mxu1 %v3450_v12 }
 0x32f   :  { %3256 = vmatprep.subr.bf16.mxu1 %v3511_v1 }
 0x332   :  { %3257 = vmatpush3.bf16.msra.mxu1 %v3451_v13 }
 0x333   :  { %3258 = vmatprep.subr.bf16.mxu1 %v3511_v1 }
 0x336   :  { %3259 = vmatpush3.bf16.msra.mxu1 %v3452_v14 }
 0x337   :  { %3260 = vmatprep.subr.bf16.mxu1 %v3511_v1 }
 0x33a   :  { %3261 = vmatpush3.bf16.msra.mxu1 %v3453_v15 }
 0x33b   :  { %3262 = vmatprep.subr.bf16.mxu1 %v3511_v1 }
 0x33c   :  { %v1592_v26 = vpop.f32.mrb[28].mxu0 }
 0x33d   :  { %v1593_v27 = vadd.f32 %v2794_v25, %v1592_v26  ;;  %v3250_v28 = vpop.f32.mrb[29].mxu0 }
 0x33e   :  { %3263 = vmatpush3.bf16.msra.mxu1 %v3454_v16 }
 0x33f   :  { %3264 = vmatprep.subr.bf16.mxu1 %v3511_v1  ;;  %v1715_v29 = vpack.c.bf16 %v1593_v27, %v1593_v27 }
 0x341   :  { %v1721_v34 = vsel %vm390_vm1, %v1715_v29, 0 }
 0x342   :  { %3265 = vmatpush3.bf16.msra.mxu1 %v3455_v17  ;;  %3273 = vmatpush3.bf16.xpose.msra.mxu0 %v1721_v34 }
 0x343   :  { %3266 = vmatprep.subr.bf16.mxu1 %v3511_v1  ;;  %3278 = vmatprep.subr.bf16.mxu0 %v3511_v1 }
 0x346   :  { %3267 = vmatpush3.bf16.msra.mxu1 %v3456_v20 }
 0x347   :  { %3290 = vmatprep.subr.bf16.mxu1 %v3511_v1 }
 0x349   :  { %3269 = vmatmul.mubr.bf16.vlgmr.msra.gmra.mrb[36].mxu1 %v3654_v19  ;;  %v1595_v19 = vpop.f32.mrb[30].mxu0 }
 0x34a   :  { %3291 = vmatpush3.bf16.msra.mxu1 %v1910_v22  ;;  %3292 = vmatprep.mubr.msk.bf16.mxu1 %vm3512_vm0, %v3511_v1  ;;  %v1596_v31 = vadd.f32 %v2794_v25, %v1595_v19  ;;  %v3251_v32 = vpop.f32.mrb[31].mxu0 }
 0x34b   :  { %3302 = vmatprep.subr.bf16.mxu1 %v3511_v1 }
 0x34c   :  { %v1716_v57 = vpack.c.bf16 %v1596_v31, %v1596_v31 }
 0x34e   :  { %v1767_v2 = vsel %vm390_vm1, %v1716_v57, 0 }
 0x3d4   :  { %v1315_v35 = vpop.f32.mrb[24].mxu1 }
 0x3d5   :  { %v1367_v36 = vmul.f32 0.35355338, %v1315_v35  ;;  %v3204_v40 = vpop.f32.mrb[25].mxu1 }
 0x3d6   :  { %v1318_v42 = vpop.f32.mrb[26].mxu1 }
 0x3d7   :  { %v1369_v43 = vsel %vm48_vm2, -1e+09, %v1367_v36  ;;  %v3205_v44 = vpop.f32.mrb[27].mxu1 }
 0x3d8   :  { %v1815_v45 = vmax.f32 %v1813_v41, %v1369_v43 }
 0x3dc   :  { %v1361_v46 = vpop.f32.mrb[28].mxu1 }
 0x3dd   :  { %v1368_v49 = vmul.f32 0.35355338, %v1361_v46  ;;  %v3210_v37 = vpop.f32.mrb[29].mxu1 }
 0x3de   :  { %v1364_v51 = vpop.f32.mrb[30].mxu1 }
 0x3df   :  { %v1370_v52 = vsel %vm49_vm3, -1e+09, %v1368_v49  ;;  %v3211_v53 = vpop.f32.mrb[31].mxu1 }
 0x3e0   :  { %v1816_v54 = vmax.f32 %v1814_v50, %v1370_v52 }
 0x3fc   :  { %v1478_v56 = vpop.f32.mrb[32].mxu1 }
 0x3fd   :  { %v1479_v58 = vadd.f32 %v2768_v55, %v1478_v56  ;;  %v3230_v41 = vpop.f32.mrb[33].mxu1 }
 0x3fe   :  { %v1481_v59 = vpop.f32.mrb[34].mxu1 }
 0x3ff   :  { %v1713_v61 = vpack.c.bf16 %v1479_v58, %v1479_v58  ;;  %v3231_v63 = vpop.f32.mrb[35].mxu1  ;;  %v1482_v50 = vadd.f32 %v2768_v55, %v1481_v59 }
 0x401   :  { %3275 = vmatmul.mubr.msk.bf16.vlgmr.msra.gmra.mrb[32].mxu0 %vm390_vm1, %v1713_v61  ;;  %v1714_v6 = vpack.c.bf16 %v1482_v50, %v1482_v50 }
 0x402   :  { %3279 = vmatpush3.bf16.xpose.msra.mxu0 %v1767_v2  ;;  %3280 = vmatprep.mubr.msk.bf16.mxu0 %vm3512_vm0, %v3511_v1 }
 0x403   :  { %3284 = vmatprep.subr.bf16.mxu0 %v3511_v1 }
 0x409   :  { %3281 = vmatmul.mubr.msk.bf16.vlgmr.msra.gmra.mrb[36].mxu0 %vm390_vm1, %v1714_v6 }
 0x40a   :  { %3285 = vmatpush3.bf16.msra.mxu0 %v1864_v7  ;;  %3286 = vmatprep.mubr.msk.bf16.mxu0 %vm3512_vm0, %v3511_v1 }
 0x40b   :  { %3296 = vmatprep.subr.bf16.mxu0 %v3511_v1 }
 0x41c   :  { %v4162_v9 = vpop.f32.mrb[36].mxu1 }
 0x41d   :  { %v3270_v10 = vpop.f32.mrb[37].mxu1 }
 0x41e   :  { %v1709_v3 = vpop.f32.mrb[38].mxu1 }
 0x41f   :  { %v4165_v11 = vadd.f32 %v4160_v8, %v1709_v3  ;;  %v3271_v12 = vpop.f32.mrb[39].mxu1 }
 0x4d4   :  { %v1757_v13 = vpop.f32.mrb[32].mxu0 }
 0x4d5   :  { %v1809_v14 = vmul.f32 0.35355338, %v1757_v13  ;;  %v3276_v15 = vpop.f32.mrb[33].mxu0 }
 0x4d6   :  { %v1760_v16 = vpop.f32.mrb[34].mxu0 }
 0x4d7   :  { %v1811_v17 = vsel %vm48_vm2, -1e+09, %v1809_v14  ;;  %v3277_v18 = vpop.f32.mrb[35].mxu0 }
 0x4d8   :  { %v1817_v20 = vmax.f32 %v1815_v45, %v1811_v17 }
 0x4da   :  { %v1819_v21 = vsub.f32 %v4011_v38, %v1817_v20  ;;  %v1825_v22 = vsub.f32 %v4015_v39, %v1817_v20  ;;  %v1831_v5 = vsub.f32 %v1369_v43, %v1817_v20  ;;  %v1837_v24 = vsub.f32 %v1811_v17, %v1817_v20 }
 0x4dc   :  { %v1821_v25 = vmul.f32 1.442695, %v1819_v21  ;;  %v1827_v26 = vmul.f32 1.442695, %v1825_v22  ;;  %v1833_v27 = vmul.f32 1.442695, %v1831_v5 }
 0x4dd   :  { %v1803_v28 = vpop.f32.mrb[36].mxu0  ;;  %v1839_v19 = vmul.f32 1.442695, %v1837_v24  ;;  %v1953_v21 = vld [vmem:[%s4312_s8] sm:$0xf] }
 0x4de   :  { %3457 = vpow2.f32 %v1821_v25  ;;  %v1810_v29 = vmul.f32 0.35355338, %v1803_v28  ;;  %v3282_v31 = vpop.f32.mrb[37].mxu0  ;;  %v2106_v22 = vsel %vm1862_vm4, %v1953_v21, 0  ;;  %v2835_v5 = vld [vmem:[%s4312_s8 + $0x4] sm:$0xf] }
 0x4df   :  { %3459 = vpow2.f32 %v1827_v26  ;;  %v1806_v32 = vpop.f32.mrb[38].mxu0  ;;  %v2059_v24 = vsel %vm1862_vm4, %v2835_v5, 0  ;;  %v2740_v26 = vld [vmem:[%s4311_s7 + $0x2] ss:$0 sm:$0xff] }
 0x4e0   :  { %v1812_v30 = vsel %vm49_vm3, -1e+09, %v1810_v29  ;;  %v3283_v34 = vpop.f32.mrb[39].mxu0  ;;  %3461 = vpow2.f32 %v1833_v27  ;;  %v1268_v29 = vadd.f32 %v2740_v26, %v4125_v23 }
 0x4e1   :  { %v1818_v38 = vmax.f32 %v1816_v54, %v1812_v30  ;;  %3463 = vpow2.f32 %v1839_v19 }
 0x4e2   :  { %v2154_v31 = vpack.c.bf16 %v1268_v29, %v1268_v29 }
 0x4e3   :  { %v1820_v39 = vsub.f32 %v4028_v47, %v1818_v38  ;;  %v1826_v35 = vsub.f32 %v4032_v48, %v1818_v38  ;;  %v1832_v36 = vsub.f32 %v1370_v52, %v1818_v38  ;;  %v1838_v40 = vsub.f32 %v1812_v30, %v1818_v38  ;;  %v2660_v52 = vld [vmem:[%s4311_s7 + $0x1] ss:$0 sm:$0xff] }
 0x4e4   :  { %v823_v41 = vadd.f32 %v2660_v52, %v3921_v60  ;;  %v826_v3 = vadd.f32 %v2660_v52, %v3923_v62 }
 0x4e5   :  { %v1823_v42 = vmul.f32 1.442695, %v1820_v39  ;;  %v1829_v43 = vmul.f32 1.442695, %v1826_v35  ;;  %v1835_v44 = vmul.f32 1.442695, %v1832_v36 }
 0x4e6   :  { %v1841_v46 = vmul.f32 1.442695, %v1838_v40  ;;  %v1958_v63 = vpack.c.bf16 %v823_v41, %v823_v41  ;;  %v1959_v12 = vpack.c.bf16 %v826_v3, %v826_v3  ;;  %v2304_v3 = vpack.c.bf16 %v4165_v11, %v4165_v11 }
 0x4e7   :  { %3465 = vpow2.f32 %v1823_v42  ;;  %v1265_v42 = vadd.f32 %v2740_v26, %v4123_v0 }
 0x4e8   :  { %v3458_v45 = vpop.eup %3457  ;;  %3467 = vpow2.f32 %v1829_v43  ;;  %v1964_v10 = vsel %vm1862_vm4, %v1958_v63, 0  ;;  %v2010_v62 = vsel %vm1862_vm4, %v1959_v12, 0  ;;  %v2205_v43 = vsel %vm1862_vm4, %v2154_v31, 0 }
 0x4e9   :  { %v3460_v49 = vpop.eup %3459  ;;  %3469 = vpow2.f32 %v1835_v44  ;;  %v1707_v44 = vadd.f32 %v4160_v8, %v4162_v9  ;;  %v2153_v23 = vpack.c.bf16 %v1265_v42, %v1265_v42 }
 0x4ea   :  { %v1843_v33 = vadd.f32 %v3460_v49, %v3458_v45  ;;  %v3462_v37 = vpop.eup %3461  ;;  %3471 = vpow2.f32 %v1841_v46 }
 0x4eb   :  { %v3464_v51 = vpop.eup %3463  ;;  %v2303_v46 = vpack.c.bf16 %v1707_v44, %v1707_v44 }
 0x4ec   :  { %v1845_v53 = vadd.f32 %v3462_v37, %v1843_v33 }
 0x4ed   :  { %v2309_v8 = vsel %vm1862_vm4, %v2303_v46, 0 }
 0x4ee   :  { %v1847_v54 = vadd.f32 %v3464_v51, %v1845_v53  ;;  %v2159_v53 = vsel %vm1862_vm4, %v2153_v23, 0 }
 0x4f0   :  { %3473 = vrcp.f32 %v1847_v54 }
 0x4f1   :  { %v3466_v47 = vpop.eup %3465 }
 0x4f2   :  { %v3468_v48 = vpop.eup %3467 }
 0x4f3   :  { %v1844_v55 = vadd.f32 %v3468_v48, %v3466_v47  ;;  %v3470_v56 = vpop.eup %3469 }
 0x4f4   :  { %v3472_v58 = vpop.eup %3471 }
 0x4f5   :  { %v1846_v57 = vadd.f32 %v3470_v56, %v1844_v55 }
 0x4f7   :  { %v1848_v59 = vadd.f32 %v3472_v58, %v1846_v57 }
 0x4f9   :  { %3475 = vrcp.f32 %v1848_v59 }
 0x4fa   :  { %v3474_v61 = vpop.eup %3473 }
 0x4fb   :  { %v1853_v2 = vmul.f32 %v3474_v61, %v3458_v45  ;;  %v1954_v50 = vmul.f32 %v3474_v61, %v3460_v49  ;;  %v4179_v4 = vmul.f32 %v3474_v61, %v3462_v37  ;;  %v4181_v6 = vmul.f32 %v3474_v61, %v3464_v51 }
 0x4fd   :  { %v1855_v7 = vpack.c.bf16 %v1853_v2, %v1853_v2  ;;  %v1956_v17 = vpack.c.bf16 %v1954_v50, %v1954_v50  ;;  %v2151_v54 = vpack.c.bf16 %v4179_v4, %v4179_v4 }
 0x4ff   :  { %3287 = vmatmul.mubr.msk.bf16.vlgmr.msra.gmra.mrb[40].mxu0 %vm390_vm1, %v1855_v7 }
 0x500   :  { %3297 = vmatpush3.bf16.msra.mxu0 %v1964_v10  ;;  %3298 = vmatprep.mubr.msk.bf16.mxu0 %vm3512_vm0, %v3511_v1 }
 0x501   :  { %3308 = vmatprep.subr.bf16.mxu0 %v3511_v1 }
 0x503   :  { %v3476_v60 = vpop.eup %3475 }
 0x504   :  { %v1854_v13 = vmul.f32 %v3476_v60, %v3466_v47  ;;  %v1955_v14 = vmul.f32 %v3476_v60, %v3468_v48  ;;  %v2150_v15 = vmul.f32 %v3476_v60, %v3470_v56  ;;  %v4189_v16 = vmul.f32 %v3476_v60, %v3472_v58  ;;  %v2840_v48 = vld [vmem:[%s4312_s8 + $0x8] sm:$0xf] }
 0x505   :  { %v2301_v47 = vpack.c.bf16 %v4181_v6, %v4181_v6  ;;  %v2254_v52 = vsel %vm1862_vm4, %v2840_v48, 0 }
 0x506   :  { %v1856_v18 = vpack.c.bf16 %v1854_v13, %v1854_v13  ;;  %v1957_v20 = vpack.c.bf16 %v1955_v14, %v1955_v14  ;;  %v2152_v0 = vpack.c.bf16 %v2150_v15, %v2150_v15  ;;  %v2302_v11 = vpack.c.bf16 %v4189_v16, %v4189_v16 }
 0x507   :  { %3299 = vmatmul.mubr.msk.bf16.vlgmr.msra.gmra.mrb[44].mxu0 %vm390_vm1, %v1956_v17 }
 0x508   :  { %3293 = vmatmul.mubr.msk.bf16.vlgmr.msra.gmra.mrb[40].mxu1 %vm390_vm1, %v1856_v18  ;;  %3310 = vmatprep.mubr.msk.bf16.mxu0 %vm3512_vm0, %v3511_v1 }
 0x509   :  { %3303 = vmatpush3.bf16.msra.mxu1 %v2010_v62  ;;  %3304 = vmatprep.mubr.msk.bf16.mxu1 %vm3512_vm0, %v3511_v1  ;;  %v2355_v62 = vsel %vm1862_vm4, %v2304_v3, 0 }
 0x50a   :  { %3314 = vmatprep.subr.bf16.mxu1 %v3511_v1  ;;  %3309 = vmatpush3.bf16.msra.mxu0 %v2059_v24 }
 0x50b   :  { %3320 = vmatprep.subr.bf16.mxu0 %v3511_v1 }
 0x510   :  { %3305 = vmatmul.mubr.msk.bf16.vlgmr.msra.gmra.mrb[44].mxu1 %vm390_vm1, %v1957_v20 }
 0x511   :  { %3316 = vmatprep.mubr.msk.bf16.mxu1 %vm3512_vm0, %v3511_v1  ;;  %3315 = vmatpush3.bf16.msra.mxu1 %v2106_v22  ;;  %v2844_v22 = vld [vmem:[%s4312_s8 + $0xc] sm:$0xf] }
 0x512   :  { %3326 = vmatprep.subr.bf16.mxu1 %v3511_v1  ;;  %v2404_v5 = vsel %vm1862_vm4, %v2844_v22, 0 }
 0x5d2   :  { %v1900_v25 = vpop.f32.mrb[40].mxu0 }
 0x5d3   :  { %v3288_v27 = vpop.f32.mrb[41].mxu0 }
 0x5d4   :  { %v1903_v28 = vpop.f32.mrb[42].mxu0 }
 0x5d5   :  { %v3289_v19 = vpop.f32.mrb[43].mxu0 }
 0x5da   :  { %v2000_v32 = vpop.f32.mrb[44].mxu0 }
 0x5db   :  { %v1946_v30 = vpop.f32.mrb[40].mxu1  ;;  %v3300_v34 = vpop.f32.mrb[45].mxu0 }
 0x5dc   :  { %v1952_v38 = vpack.c.bf16 %v1946_v30, %v1900_v25  ;;  %v3294_v39 = vpop.f32.mrb[41].mxu1  ;;  %v2003_v35 = vpop.f32.mrb[46].mxu0  ;;  %v2846_v34 = vld [vmem:[%s4313_s9] ss:$0 sm:$0xff] }
 0x5dd   :  { %v1949_v36 = vpop.f32.mrb[42].mxu1  ;;  %v3301_v40 = vpop.f32.mrb[47].mxu0 }
 0x5de   :  { %v3295_v45 = vpop.f32.mrb[43].mxu1  ;;  %3317 = vmatmul.mubr.msk.bf16.vlgmr.msra.gmra.mrb[48].mxu1 %vm390_vm1, %v1952_v38 }
 0x5df   :  { %3327 = vmatpush3.bf16.msra.mxu1 %v2205_v43  ;;  %3328 = vmatprep.mubr.msk.bf16.mxu1 %vm3512_vm0, %v3511_v1 }
 0x5e0   :  { %3338 = vmatprep.subr.bf16.mxu1 %v3511_v1 }
 0x5e3   :  { %v2046_v49 = vpop.f32.mrb[44].mxu1 }
 0x5e4   :  { %v2052_v33 = vpack.c.bf16 %v2046_v49, %v2000_v32  ;;  %v3306_v37 = vpop.f32.mrb[45].mxu1 }
 0x5e5   :  { %v2049_v51 = vpop.f32.mrb[46].mxu1 }
 0x5e6   :  { %v3307_v9 = vpop.f32.mrb[47].mxu1  ;;  %3311 = vmatmul.mubr.msk.bf16.vlgmr.msra.gmra.mrb[48].mxu0 %vm390_vm1, %v2052_v33  ;;  %3329 = vmatmul.mubr.msk.bf16.vlgmr.msra.gmra.mrb[52].mxu1 %vm390_vm1, %v2152_v0 }
 0x5e7   :  { %3321 = vmatpush3.bf16.msra.mxu0 %v2159_v53  ;;  %3339 = vmatpush3.bf16.msra.mxu1 %v2309_v8 }
 0x5e8   :  { %3322 = vmatprep.mubr.msk.bf16.mxu0 %vm3512_vm0, %v3511_v1  ;;  %3340 = vmatprep.mubr.msk.bf16.mxu1 %vm3512_vm0, %v3511_v1 }
 0x5e9   :  { %3332 = vmatprep.subr.bf16.mxu0 %v3511_v1  ;;  %3350 = vmatprep.subr.bf16.mxu1 %v3511_v1 }
 0x5ee   :  { %3323 = vmatmul.mubr.msk.bf16.vlgmr.msra.gmra.mrb[52].mxu0 %vm390_vm1, %v2151_v54  ;;  %3341 = vmatmul.mubr.msk.bf16.vlgmr.msra.gmra.mrb[56].mxu1 %vm390_vm1, %v2301_v47 }
 0x5ef   :  { %3334 = vmatprep.mubr.msk.bf16.mxu0 %vm3512_vm0, %v3511_v1  ;;  %3352 = vmatprep.mubr.msk.bf16.mxu1 %vm3512_vm0, %v3511_v1 }
 0x5f0   :  { %3333 = vmatpush3.bf16.msra.mxu0 %v2254_v52  ;;  %3351 = vmatpush3.bf16.msra.mxu1 %v2404_v5 }
 0x5f1   :  { %3344 = vmatprep.subr.bf16.mxu0 %v3511_v1 }
 0x6b1   :  { %v2142_v55 = vpop.f32.mrb[48].mxu1 }
 0x6b2   :  { %v3318_v56 = vpop.f32.mrb[49].mxu1 }
 0x6b3   :  { %v2145_v57 = vpop.f32.mrb[50].mxu1 }
 0x6b4   :  { %v3319_v58 = vpop.f32.mrb[51].mxu1 }
 0x6b9   :  { %v2095_v41 = vpop.f32.mrb[48].mxu0  ;;  %v2241_v59 = vpop.f32.mrb[52].mxu1 }
 0x6ba   :  { %v2143_v61 = vadd.f32 %v2142_v55, %v2095_v41  ;;  %v3312_v63 = vpop.f32.mrb[49].mxu0  ;;  %v3330_v2 = vpop.f32.mrb[53].mxu1 }
 0x6bb   :  { %v2098_v50 = vpop.f32.mrb[50].mxu0  ;;  %v2244_v4 = vpop.f32.mrb[54].mxu1 }
 0x6bc   :  { %v2146_v6 = vadd.f32 %v2145_v57, %v2098_v50  ;;  %v3313_v7 = vpop.f32.mrb[51].mxu0  ;;  %v3331_v10 = vpop.f32.mrb[55].mxu1 }
 0x6c1   :  { %v2195_v60 = vpop.f32.mrb[52].mxu0  ;;  %v2345_v12 = vpop.f32.mrb[56].mxu1 }
 0x6c2   :  { %v2247_v13 = vpack.c.bf16 %v2241_v59, %v2195_v60  ;;  %v3324_v14 = vpop.f32.mrb[53].mxu0  ;;  %v3342_v15 = vpop.f32.mrb[57].mxu1 }
 0x6c3   :  { %v2198_v17 = vpop.f32.mrb[54].mxu0  ;;  %v2348_v18 = vpop.f32.mrb[58].mxu1 }
 0x6c4   :  { %v3325_v20 = vpop.f32.mrb[55].mxu0  ;;  %3335 = vmatmul.mubr.msk.bf16.vlgmr.msra.gmra.mrb[56].mxu0 %vm390_vm1, %v2247_v13  ;;  %v3343_v21 = vpop.f32.mrb[59].mxu1 }
 0x6c5   :  { %3345 = vmatpush3.bf16.msra.mxu0 %v2355_v62  ;;  %3346 = vmatprep.mubr.msk.bf16.mxu0 %vm3512_vm0, %v3511_v1 }
 0x6cc   :  { %3347 = vmatmul.mubr.msk.bf16.vlgmr.msra.gmra.mrb[60].mxu0 %vm390_vm1, %v2302_v11 }
 0x797   :  { %v2290_v24 = vpop.f32.mrb[56].mxu0 }
 0x798   :  { %v2297_v25 = vadd.f32 %v2290_v24, %v2143_v61  ;;  %v3336_v26 = vpop.f32.mrb[57].mxu0 }
 0x799   :  { %v2293_v27 = vpop.f32.mrb[58].mxu0 }
 0x79a   :  { %v2298_v28 = vadd.f32 %v2293_v27, %v2146_v6  ;;  %v3337_v19 = vpop.f32.mrb[59].mxu0 }
 0x79b   :  { %v2522_v19 = vlaneseq }
 0x79f   :  { %v2391_v29 = vpop.f32.mrb[60].mxu0 }
 0x7a0   :  { %v2397_v1 = vpack.c.bf16 %v2391_v29, %v2345_v12  ;;  %v3348_v31 = vpop.f32.mrb[61].mxu0 }
 0x7a1   :  { %v2394_v32 = vpop.f32.mrb[62].mxu0  ;;  %v2458_v31 = vld [vmem:[%s4314_s10] sm:$0x1]  ;;  %s3513_s10 = smov [#allocation2]  }
 0x7a2   :  { %v3349_v16 = vpop.f32.mrb[63].mxu0  ;;  %3353 = vmatmul.mubr.msk.bf16.vlgmr.msra.gmra.mrb[60].mxu1 %vm390_vm1, %v2397_v1  ;;  %v2523_v1 = vshrl.u32 %v2522_v19, 7  ;;  %s2551_s13 = sshll.u32 %s3513_s10, 4  ;;  %s2552_s13 = int_to_ptr.vmem [resolvable:$true] %s2551_s13 }
 0x7a3   :  { %s3487_s5 = scalar_lea.vmem %s2552_s13, 256  ;;  %p3492_p1 = scmp.lt.s32.totalorder %s2552_s13, %s2552_s13 }
 0x7a4   :  { %v2524_v32 = vsub.s32 0, %v2523_v1  ;;  %p3488_p0 = scmp.ne.s32.totalorder %s2552_s13, %s3487_s5  ;;  %p3493_p2 = scmp.lt.s32.totalorder %s3487_s5, %s3487_s5 }
 0x7a6   :  { %p3494_p3 = por %p3493_p2, %p3492_p1 }
 0x7a8   :  { %p3495_p4 = pnand %p3494_p3, %p3488_p0 }
 0x875   :  { %v2440_v30 = vpop.f32.mrb[60].mxu1 }
 0x876   :  { %v2447_v38 = vadd.f32 %v2440_v30, %v2297_v25  ;;  %v3354_v39 = vpop.f32.mrb[61].mxu1 }
 0x877   :  { %v2443_v35 = vpop.f32.mrb[62].mxu1 }
 0x878   :  { %v4266_v36 = vadd.f32 %v2846_v34, %v2447_v38  ;;  %v2448_v40 = vadd.f32 %v2443_v35, %v2298_v28  ;;  %v3355_v42 = vpop.f32.mrb[63].mxu1 }
 0x87a   :  { %v2460_v43 = vrot.slane %v4266_v36, 4  ;;  %v2472_v44 = vmul.f32 %v4266_v36, %v4266_v36  ;;  %v4271_v45 = vadd.f32 %v2846_v34, %v2448_v40 }
 0x87c   :  { %v2461_v23 = vadd.f32 %v2460_v43, %v4266_v36  ;;  %v2474_v46 = vrot.slane %v2472_v44, 4  ;;  %v2466_v49 = vrot.slane %v4271_v45, 4  ;;  %v2473_v33 = vmul.f32 %v4271_v45, %v4271_v45 }
 0x87e   :  { %v2462_v37 = vrot.slane %v2461_v23, 2  ;;  %v2475_v0 = vadd.f32 %v2474_v46, %v2472_v44  ;;  %v2467_v51 = vadd.f32 %v2466_v49, %v4271_v45  ;;  %v2480_v53 = vrot.slane %v2473_v33, 4  ;;  %v2847_v44 = vld [vmem:[%s4315_s11] ss:$0 sm:$0xff] }
 0x880   :  { %v2463_v8 = vadd.f32 %v2462_v37, %v2461_v23  ;;  %v2476_v9 = vrot.slane %v2475_v0, 2  ;;  %v2468_v54 = vrot.slane %v2467_v51, 2  ;;  %v2481_v47 = vadd.f32 %v2480_v53, %v2473_v33  ;;  %v3485_v23 = vld [vmem:[%s4304_s0] sm:$0xff] }
 0x882   :  { %v2464_v48 = vrot.slane %v2463_v8, 1  ;;  %v2477_v52 = vadd.f32 %v2476_v9, %v2475_v0  ;;  %v2469_v55 = vadd.f32 %v2468_v54, %v2467_v51  ;;  %v2482_v56 = vrot.slane %v2481_v47, 2 }
 0x884   :  { %v2465_v57 = vadd.f32 %v2464_v48, %v2463_v8  ;;  %v2470_v58 = vrot.slane %v2469_v55, 1  ;;  %v2483_v41 = vadd.f32 %v2482_v56, %v2481_v47  ;;  %v2478_v59 = vrot.slane %v2477_v52, 1 }
 0x886   :  { %v2486_v61 = vmul.f32 0.125, %v2465_v57  ;;  %v2471_v63 = vadd.f32 %v2470_v58, %v2469_v55  ;;  %v2484_v50 = vrot.slane %v2483_v41, 1  ;;  %v2479_v6 = vadd.f32 %v2478_v59, %v2477_v52 }
 0x888   :  { %v2488_v2 = vmul.f32 8.0, %v2486_v61  ;;  %v2487_v4 = vmul.f32 0.125, %v2471_v63  ;;  %v2485_v60 = vadd.f32 %v2484_v50, %v2483_v41  ;;  %v2518_v38 = vsub.f32 %v4266_v36, %v2486_v61  ;;  %v3486_v36 = vld [vmem:[%s4304_s0 + $0x8] sm:$0xff] }
 0x88a   :  { %v2490_v7 = vmul.f32 %v2488_v2, %v2486_v61  ;;  %v2489_v10 = vmul.f32 8.0, %v2487_v4  ;;  %v2519_v42 = vsub.f32 %v4271_v45, %v2487_v4 }
 0x88c   :  { %v2492_v3 = vsub.f32 %v2479_v6, %v2490_v7  ;;  %v2491_v12 = vmul.f32 %v2489_v10, %v2487_v4 }
 0x88e   :  { %v2494_v13 = vmax.f32 %v2492_v3, 0.0  ;;  %v2493_v14 = vsub.f32 %v2485_v60, %v2491_v12 }
 0x890   :  { %v2496_v15 = vmul.f32 0.14285715, %v2494_v13  ;;  %v2495_v17 = vmax.f32 %v2493_v14, 0.0 }
 0x892   :  { %3477 = vrsqrt.f32 %v2496_v15  ;;  %v2497_v18 = vmul.f32 0.14285715, %v2495_v17  ;;  %vm2500_vm5 = vcmp.eq.f32.partialorder %v2496_v15, inf  ;;  %v2503_v21 = vand.u32 2147483648, %v2496_v15 }
 0x893   :  { %vm2502_vm6 = vcmp.eq.f32.partialorder %v2496_v15, 0.0 }
 0x894   :  { %3479 = vrsqrt.f32 %v2497_v18  ;;  %vm2507_vm7 = vcmp.eq.f32.partialorder %v2497_v18, inf  ;;  %v2510_v26 = vand.u32 2147483648, %v2497_v18  ;;  %vm2509_vm8 = vcmp.eq.f32.partialorder %v2497_v18, 0.0 }
 0x89c   :  { %v3478_v62 = vpop.eup %3477 }
 0x89d   :  { %v2499_v20 = vmul.f32 %v3478_v62, %v2496_v15 }
 0x89e   :  { %v3480_v11 = vpop.eup %3479 }
 0x89f   :  { %v2501_v22 = vsel %vm2500_vm5, %v2496_v15, %v2499_v20  ;;  %v2506_v24 = vmul.f32 %v3480_v11, %v2497_v18 }
 0x8a0   :  { %v2504_v5 = vsel %vm2502_vm6, %v2503_v21, %v2501_v22 }
 0x8a1   :  { %v2512_v25 = vadd.f32 1e-10, %v2504_v5  ;;  %v2508_v27 = vsel %vm2507_vm7, %v2497_v18, %v2506_v24 }
 0x8a2   :  { %v2511_v28 = vsel %vm2509_vm8, %v2510_v26, %v2508_v27 }
 0x8a3   :  { %3481 = vrcp.f32 %v2512_v25  ;;  %v2513_v29 = vadd.f32 1e-10, %v2511_v28 }
 0x8a5   :  { %3483 = vrcp.f32 %v2513_v29 }
 0x8ad   :  { %v3482_v16 = vpop.eup %3481 }
 0x8ae   :  { %v2516_v30 = vmul.f32 %v3482_v16, %v2458_v31 }
 0x8af   :  { %v3484_v34 = vpop.eup %3483 }
 0x8b0   :  { %v2525_v39 = vrot.slane %v2516_v30, %v2524_v32  ;;  %v2517_v35 = vmul.f32 %v3484_v34, %v2458_v31 }
 0x8b2   :  { %v2532_v40 = vmul.f32 %v2525_v39, %v2518_v38  ;;  %v2529_v43 = vrot.slane %v2517_v35, %v2524_v32 }
 0x8b4   :  { %v2534_v46 = vadd.f32 %v3485_v23, %v2532_v40  ;;  %v2533_v49 = vmul.f32 %v2529_v43, %v2519_v42 }
 0x8b6   :  { %v2542_v33 = vadd.f32 %v2847_v44, %v2534_v46  ;;  %v2535_v37 = vadd.f32 %v3486_v36, %v2533_v49 }
 0x8b8   :  { %2544 = vst [vmem:[#allocation2] sm:$0xff] %v2542_v33  ;;  %v2543_v45 = vadd.f32 %v2847_v44, %v2535_v37 }
 0x8ba   :  { %2545 = vst [vmem:[#allocation2 + $0x8] sm:$0xff] %v2543_v45 }
 0x8bb   :  { %3498 = shalt.err (!%p3495_p4)
}
 0x8bc   :  { %s3499_s3 = scalar_lea.hbm %s4316_s12, 256 }
 0x8bd   :  { %p3500_p5 = scmp.ne.s32.totalorder %s4316_s12, %s3499_s3  ;;  %p3503_p6 = scmp.lt.u32.totalorder %s3499_s3, %s4316_s12 }
 0x8bf   :  { %p3505_p7 = pnand %p3503_p6, %p3500_p5 }
 0x8c1   :  { %3508 = shalt.err (!%p3505_p7)
}
 0x8c2   :  { %s3514_s4 = smov 128   ;;  %s3515_s19 = smov 8  }
 0x8c3   :  { %2557 = dma.vmem_to_hbm [thread:$0]  %s2552_s13, 256, %s4316_s12, [#allocation3], %s3514_s4, %s3514_s4, %s3515_s19  }
 0x8c4   :  { %3509 = dma.done.wait [#allocation3], 256  }
 0x8c5   :  { %3510 = vsyncadd [#allocation3], 4294967040 }
 0x8c6   :  { %2561 = vsyncpa [#allocation3], 1 }

// kernel: tpu_custom_call.1
= control target key start
LH: loop header
LB: loop body
LE: loop exit
PB: predicated region body
PF: predicated region fallthrough
CT: control target
= control target key end

     0   :  { %v3511_v1 = vmov 0.0   ;;  %vm3512_vm0 = vmmov 0   ;;  %s4304_s0 = inlined_call_operand.vmem [shape: f32[2,8,128], index: 0, kind: input, shape index: {}]   ;;  %s4305_s1 = inlined_call_operand.vmem [shape: f32[2,8,8], index: 1, kind: input, shape index: {}]   ;;  %s4306_s2 = inlined_call_operand.vmem [shape: bf16[4,128,8], index: 2, kind: input, shape index: {}]   ;;  %s4307_s3 = inlined_call_operand.vmem [shape: f32[4,1,8], index: 3, kind: input, shape index: {}]   ;;  %s4308_s4 = inlined_call_operand.vmem [shape: bf16[4,128,8], index: 4, kind: input, shape index: {}]   ;;  %s4309_s5 = inlined_call_operand.vmem [shape: f32[4,1,8], index: 5, kind: input, shape index: {}]   ;;  %s4310_s6 = inlined_call_operand.vmem [shape: bf16[4,128,8], index: 6, kind: input, shape index: {}]   ;;  %s4311_s7 = inlined_call_operand.vmem [shape: f32[4,1,8], index: 7, kind: input, shape index: {}]   ;;  %s4312_s8 = inlined_call_operand.vmem [shape: bf16[4,8,128], index: 8, kind: input, shape index: {}]   ;;  %s4313_s9 = inlined_call_operand.vmem [shape: f32[1,128], index: 9, kind: input, shape index: {}]   ;;  %s4314_s10 = inlined_call_operand.vmem [shape: f32[1,128], index: 10, kind: input, shape index: {}]   ;;  %s4315_s11 = inlined_call_operand.vmem [shape: f32[1,128], index: 11, kind: input, shape index: {}]   ;;  %s4316_s12 = inlined_call_operand.hbm [shape: f32[2,8,128], index: 12, kind: output, shape index: {}]  }
   0x1   :  { %v3361_v0 = vld [vmem:[%s4308_s4] sm:$0xff]   ;;  %3016 = vmatprep.subr.bf16.mxu1 %v3511_v1  ;;  %v3362_v2 = vld [vmem:[%s4308_s4 + $0x8] sm:$0xff]   ;;  %2996 = vmatprep.subr.bf16.mxu0 %v3511_v1  ;;  %v3364_v5 = vld [vmem:[%s4308_s4 + $0x10] sm:$0xff]  }
   0x2   :  { %3017 = vmatpush3.bf16.msra.mxu1 %v3361_v0  ;;  %v3363_v3 = vld [vmem:[%s4306_s2] sm:$0xff]   ;;  %3032 = vmatprep.mubr.msk.bf16.mxu1 %vm3512_vm0, %v3511_v1  ;;  %v3365_v4 = vld [vmem:[%s4306_s2 + $0x8] sm:$0xff]   ;;  %v3367_v6 = vld [vmem:[%s4306_s2 + $0x10] sm:$0xff]  }
   0x3   :  { %3018 = vmatprep.subr.bf16.mxu1 %v3511_v1  ;;  %3012 = vmatprep.mubr.msk.bf16.mxu0 %vm3512_vm0, %v3511_v1  ;;  %v3366_v7 = vld [vmem:[%s4308_s4 + $0x18] sm:$0xff]   ;;  %v3368_v9 = vld [vmem:[%s4308_s4 + $0x20] sm:$0xff]   ;;  %v3370_v11 = vld [vmem:[%s4308_s4 + $0x28] sm:$0xff]  }
   0x4   :  { %2997 = vmatpush3.bf16.msra.mxu0 %v3363_v3  ;;  %v3369_v8 = vld [vmem:[%s4306_s2 + $0x18] sm:$0xff]   ;;  %v3371_v10 = vld [vmem:[%s4306_s2 + $0x20] sm:$0xff]   ;;  %v3373_v12 = vld [vmem:[%s4306_s2 + $0x28] sm:$0xff]  }
   0x5   :  { %2998 = vmatprep.subr.bf16.mxu0 %v3511_v1  ;;  %v3372_v13 = vld [vmem:[%s4308_s4 + $0x30] sm:$0xff]   ;;  %v3374_v15 = vld [vmem:[%s4308_s4 + $0x38] sm:$0xff]   ;;  %v43_v16 = vld [vmem:[%s4304_s0] sm:$0xff] }
   0x6   :  { %3019 = vmatpush3.bf16.msra.mxu1 %v3362_v2  ;;  %v3375_v14 = vld [vmem:[%s4306_s2 + $0x30] sm:$0xff]   ;;  %v44_v17 = vld [vmem:[%s4304_s0 + $0x8] sm:$0xff]  ;;  %v3376_v18 = vld [vmem:[%s4306_s2 + $0x38] sm:$0xff]  }
   0x7   :  { %3020 = vmatprep.subr.bf16.mxu1 %v3511_v1  ;;  %v3654_v19 = vpack.c.bf16 %v44_v17, %v43_v16  ;;  %v3377_v20 = vld [vmem:[%s4310_s6] sm:$0xff]   ;;  %v3378_v21 = vld [vmem:[%s4310_s6 + $0x8] sm:$0xff]   ;;  %v3379_v22 = vld [vmem:[%s4310_s6 + $0x10] sm:$0xff]  }
   0x8   :  { %2999 = vmatpush3.bf16.msra.mxu0 %v3365_v4  ;;  %v3380_v23 = vld [vmem:[%s4310_s6 + $0x18] sm:$0xff]   ;;  %v3381_v24 = vld [vmem:[%s4310_s6 + $0x20] sm:$0xff]   ;;  %v3382_v25 = vld [vmem:[%s4310_s6 + $0x28] sm:$0xff]  }
   0x9   :  { %3000 = vmatprep.subr.bf16.mxu0 %v3511_v1 }
   0xa   :  { %3021 = vmatpush3.bf16.msra.mxu1 %v3364_v5 }
   0xb   :  { %3022 = vmatprep.subr.bf16.mxu1 %v3511_v1 }
   0xc   :  { %3001 = vmatpush3.bf16.msra.mxu0 %v3367_v6 }
   0xd   :  { %3002 = vmatprep.subr.bf16.mxu0 %v3511_v1 }
   0xe   :  { %3023 = vmatpush3.bf16.msra.mxu1 %v3366_v7 }
   0xf   :  { %3024 = vmatprep.subr.bf16.mxu1 %v3511_v1 }
  0x10   :  { %3003 = vmatpush3.bf16.msra.mxu0 %v3369_v8 }
  0x11   :  { %3004 = vmatprep.subr.bf16.mxu0 %v3511_v1 }
  0x12   :  { %3025 = vmatpush3.bf16.msra.mxu1 %v3368_v9 }
  0x13   :  { %3026 = vmatprep.subr.bf16.mxu1 %v3511_v1 }
  0x14   :  { %3005 = vmatpush3.bf16.msra.mxu0 %v3371_v10 }
  0x15   :  { %3006 = vmatprep.subr.bf16.mxu0 %v3511_v1 }
  0x16   :  { %3027 = vmatpush3.bf16.msra.mxu1 %v3370_v11 }
  0x17   :  { %3028 = vmatprep.subr.bf16.mxu1 %v3511_v1 }
  0x18   :  { %3007 = vmatpush3.bf16.msra.mxu0 %v3373_v12 }
  0x19   :  { %3008 = vmatprep.subr.bf16.mxu0 %v3511_v1 }
  0x1a   :  { %3029 = vmatpush3.bf16.msra.mxu1 %v3372_v13 }
  0x1b   :  { %3030 = vmatprep.subr.bf16.mxu1 %v3511_v1 }
  0x1c   :  { %3009 = vmatpush3.bf16.msra.mxu0 %v3375_v14 }
  0x1d   :  { %3010 = vmatprep.subr.bf16.mxu0 %v3511_v1 }
  0x1e   :  { %3031 = vmatpush3.bf16.msra.mxu1 %v3374_v15 }
  0x1f   :  { %3056 = vmatprep.subr.bf16.mxu1 %v3511_v1 }
  0x20   :  { %3011 = vmatpush3.bf16.msra.mxu0 %v3376_v18 }
  0x21   :  { %3033 = vmatmul.mubr.bf16.vlgmr.msra.gmra.mrb[0].mxu1 %v3654_v19  ;;  %3036 = vmatprep.subr.bf16.mxu0 %v3511_v1 }
  0x22   :  { %3058 = vmatprep.mubr.msk.bf16.mxu1 %vm3512_vm0, %v3511_v1 }
  0x23   :  { %3013 = vmatmul.mubr.bf16.vlgmr.msra.gmra.mrb[0].mxu0 %v3654_v19 }
  0x24   :  { %3037 = vmatpush3.bf16.msra.mxu0 %v3377_v20  ;;  %3052 = vmatprep.mubr.msk.bf16.mxu0 %vm3512_vm0, %v3511_v1 }
  0x25   :  { %3038 = vmatprep.subr.bf16.mxu0 %v3511_v1 }
  0x28   :  { %3039 = vmatpush3.bf16.msra.mxu0 %v3378_v21 }
  0x29   :  { %3040 = vmatprep.subr.bf16.mxu0 %v3511_v1 }
  0x2c   :  { %3041 = vmatpush3.bf16.msra.mxu0 %v3379_v22 }
  0x2d   :  { %3042 = vmatprep.subr.bf16.mxu0 %v3511_v1 }
  0x30   :  { %3043 = vmatpush3.bf16.msra.mxu0 %v3380_v23 }
  0x31   :  { %3044 = vmatprep.subr.bf16.mxu0 %v3511_v1 }
  0x34   :  { %3045 = vmatpush3.bf16.msra.mxu0 %v3381_v24 }
  0x35   :  { %3046 = vmatprep.subr.bf16.mxu0 %v3511_v1 }
  0x38   :  { %3047 = vmatpush3.bf16.msra.mxu0 %v3382_v25 }
  0x39   :  { %3048 = vmatprep.subr.bf16.mxu0 %v3511_v1 }
  0x3a   :  { %17 = vsyncpa [#allocation3], 0  ;;  %v3383_v26 = vld [vmem:[%s4310_s6 + $0x30] sm:$0xff]   ;;  %v3384_v27 = vld [vmem:[%s4310_s6 + $0x38] sm:$0xff]   ;;  %vm390_vm1 = vcmask 64512   ;;  %vm1862_vm4 = vcmask 1043456  }
  0x3b   :  { %v3385_v28 = vld [vmem:[%s4308_s4 + $0x40] sm:$0xff]   ;;  %v3386_v29 = vld [vmem:[%s4308_s4 + $0x48] sm:$0xff]   ;;  %v3387_v30 = vld [vmem:[%s4308_s4 + $0x50] sm:$0xff]  }
  0x3c   :  { %3049 = vmatpush3.bf16.msra.mxu0 %v3383_v26  ;;  %v3389_v31 = vld [vmem:[%s4308_s4 + $0x58] sm:$0xff]   ;;  %v3391_v32 = vld [vmem:[%s4308_s4 + $0x60] sm:$0xff]   ;;  %v3393_v33 = vld [vmem:[%s4308_s4 + $0x68] sm:$0xff]  }
  0x3d   :  { %3050 = vmatprep.subr.bf16.mxu0 %v3511_v1  ;;  %v3395_v34 = vld [vmem:[%s4308_s4 + $0x70] sm:$0xff]   ;;  %v3397_v35 = vld [vmem:[%s4308_s4 + $0x78] sm:$0xff]   ;;  %v2571_v36 = vld [vmem:[%s4309_s5] ss:$0 sm:$0xff] }
  0x3e   :  { %v2562_v41 = vld [vmem:[%s4307_s3] ss:$0 sm:$0xff]  ;;  %v3390_v57 = vld [vmem:[%s4306_s2 + $0x48] sm:$0xff]   ;;  %v3392_v58 = vld [vmem:[%s4306_s2 + $0x50] sm:$0xff]  }
  0x3f   :  { %v3388_v55 = vld [vmem:[%s4306_s2 + $0x40] sm:$0xff]   ;;  %v3394_v59 = vld [vmem:[%s4306_s2 + $0x58] sm:$0xff]   ;;  %v3398_v61 = vld [vmem:[%s4306_s2 + $0x68] sm:$0xff]  }
  0x40   :  { %3051 = vmatpush3.bf16.msra.mxu0 %v3384_v27  ;;  %v3396_v60 = vld [vmem:[%s4306_s2 + $0x60] sm:$0xff]   ;;  %v3399_v62 = vld [vmem:[%s4306_s2 + $0x70] sm:$0xff]   ;;  %v3400_v63 = vld [vmem:[%s4306_s2 + $0x78] sm:$0xff]  }
  0x41   :  { %3088 = vmatprep.subr.bf16.mxu0 %v3511_v1  ;;  %v3789_v0 = vld [vmem:[%s4311_s7] ss:$0 sm:$0xff]  ;;  %v3402_v8 = vld [vmem:[%s4310_s6 + $0x48] sm:$0xff]   ;;  %v3403_v9 = vld [vmem:[%s4310_s6 + $0x50] sm:$0xff]  }
  0x42   :  { %v3401_v7 = vld [vmem:[%s4310_s6 + $0x40] sm:$0xff]   ;;  %v3404_v10 = vld [vmem:[%s4310_s6 + $0x58] sm:$0xff]   ;;  %v3406_v12 = vld [vmem:[%s4310_s6 + $0x68] sm:$0xff]  }
  0x43   :  { %3053 = vmatmul.mubr.bf16.vlgmr.msra.gmra.mrb[4].mxu0 %v3654_v19  ;;  %v3405_v11 = vld [vmem:[%s4310_s6 + $0x60] sm:$0xff]   ;;  %v3407_v17 = vld [vmem:[%s4310_s6 + $0x70] sm:$0xff]   ;;  %v3408_v24 = vld [vmem:[%s4310_s6 + $0x78] sm:$0xff]  }
  0x44   :  { %3089 = vmatpush3.bf16.msra.mxu0 %v3385_v28  ;;  %3104 = vmatprep.mubr.msk.bf16.mxu0 %vm3512_vm0, %v3511_v1  ;;  %v2634_v13 = vld [vmem:[%s4309_s5 + $0x1] ss:$0 sm:$0xff]  ;;  %v3410_v26 = vld [vmem:[%s4308_s4 + $0x88] sm:$0xff]   ;;  %v3411_v27 = vld [vmem:[%s4308_s4 + $0x90] sm:$0xff]  }
  0x45   :  { %3090 = vmatprep.subr.bf16.mxu0 %v3511_v1  ;;  %v3409_v25 = vld [vmem:[%s4308_s4 + $0x80] sm:$0xff]   ;;  %v3413_v28 = vld [vmem:[%s4308_s4 + $0x98] sm:$0xff]  }
  0x48   :  { %3091 = vmatpush3.bf16.msra.mxu0 %v3386_v29  ;;  %v3415_v29 = vld [vmem:[%s4308_s4 + $0xa0] sm:$0xff]  }
  0x49   :  { %3092 = vmatprep.subr.bf16.mxu0 %v3511_v1 }
  0x4c   :  { %3093 = vmatpush3.bf16.msra.mxu0 %v3387_v30  ;;  %v3417_v30 = vld [vmem:[%s4308_s4 + $0xa8] sm:$0xff]  }
  0x4d   :  { %3094 = vmatprep.subr.bf16.mxu0 %v3511_v1 }
  0x50   :  { %3095 = vmatpush3.bf16.msra.mxu0 %v3389_v31  ;;  %v3419_v31 = vld [vmem:[%s4308_s4 + $0xb0] sm:$0xff]  }
  0x51   :  { %3096 = vmatprep.subr.bf16.mxu0 %v3511_v1 }
  0x54   :  { %3097 = vmatpush3.bf16.msra.mxu0 %v3391_v32  ;;  %v3421_v32 = vld [vmem:[%s4308_s4 + $0xb8] sm:$0xff]  }
  0x55   :  { %3098 = vmatprep.subr.bf16.mxu0 %v3511_v1 }
  0x58   :  { %3099 = vmatpush3.bf16.msra.mxu0 %v3393_v33 }
  0x59   :  { %3100 = vmatprep.subr.bf16.mxu0 %v3511_v1 }
  0x5c   :  { %3101 = vmatpush3.bf16.msra.mxu0 %v3395_v34 }
  0x5d   :  { %3102 = vmatprep.subr.bf16.mxu0 %v3511_v1 }
  0x60   :  { %3103 = vmatpush3.bf16.msra.mxu0 %v3397_v35 }
  0x61   :  { %3128 = vmatprep.subr.bf16.mxu0 %v3511_v1 }
  0x63   :  { %3105 = vmatmul.mubr.bf16.vlgmr.msra.gmra.mrb[8].mxu0 %v3654_v19 }
  0x64   :  { %3130 = vmatprep.mubr.msk.bf16.mxu0 %vm3512_vm0, %v3511_v1 }
  0xf4   :  { %v267_v37 = vpop.f32.mrb[0].mxu1 }
  0xf5   :  { %v268_v38 = vadd.f32 %v2571_v36, %v267_v37  ;;  %v3034_v39 = vpop.f32.mrb[1].mxu1 }
  0xf6   :  { %v270_v40 = vpop.f32.mrb[2].mxu1  ;;  %v155_v42 = vpop.f32.mrb[0].mxu0 }
  0xf7   :  { %v388_v43 = vpack.c.bf16 %v268_v38, %v268_v38  ;;  %v3035_v44 = vpop.f32.mrb[3].mxu1  ;;  %v3014_v45 = vpop.f32.mrb[1].mxu0  ;;  %v271_v48 = vadd.f32 %v2571_v36, %v270_v40  ;;  %v156_v49 = vadd.f32 %v2562_v41, %v155_v42 }
  0xf8   :  { %v158_v46 = vpop.f32.mrb[2].mxu0 }
  0xf9   :  { %v395_v47 = vsel %vm390_vm1, %v388_v43, 0  ;;  %v3015_v50 = vpop.f32.mrb[3].mxu0  ;;  %v389_v51 = vpack.c.bf16 %v271_v48, %v271_v48  ;;  %v386_v52 = vpack.c.bf16 %v156_v49, %v156_v49  ;;  %v159_v54 = vadd.f32 %v2562_v41, %v158_v46  ;;  %v2608_v41 = vld [vmem:[%s4307_s3 + $0x1] ss:$0 sm:$0xff] }
  0xfa   :  { %3057 = vmatpush3.bf16.xpose.msra.mxu1 %v395_v47 }
  0xfb   :  { %3062 = vmatprep.subr.bf16.mxu1 %v3511_v1  ;;  %v441_v53 = vsel %vm390_vm1, %v389_v51, 0  ;;  %v387_v56 = vpack.c.bf16 %v159_v54, %v159_v54  ;;  %v3412_v51 = vld [vmem:[%s4306_s2 + $0x80] sm:$0xff]   ;;  %v3416_v54 = vld [vmem:[%s4306_s2 + $0x90] sm:$0xff]  }
 0x101   :  { %3059 = vmatmul.mubr.msk.bf16.vlgmr.msra.gmra.mrb[4].mxu1 %vm390_vm1, %v386_v52 }
 0x102   :  { %3063 = vmatpush3.bf16.xpose.msra.mxu1 %v441_v53  ;;  %3064 = vmatprep.mubr.msk.bf16.mxu1 %vm3512_vm0, %v3511_v1  ;;  %v3414_v53 = vld [vmem:[%s4306_s2 + $0x88] sm:$0xff]  }
 0x103   :  { %3068 = vmatprep.subr.bf16.mxu1 %v3511_v1 }
 0x109   :  { %3065 = vmatmul.mubr.msk.bf16.vlgmr.msra.gmra.mrb[8].mxu1 %vm390_vm1, %v387_v56  ;;  %v3420_v56 = vld [vmem:[%s4306_s2 + $0xa0] sm:$0xff]  }
 0x10a   :  { %3069 = vmatpush3.bf16.msra.mxu1 %v3388_v55  ;;  %3084 = vmatprep.mubr.msk.bf16.mxu1 %vm3512_vm0, %v3511_v1  ;;  %v3418_v55 = vld [vmem:[%s4306_s2 + $0x98] sm:$0xff]  }
 0x10b   :  { %3070 = vmatprep.subr.bf16.mxu1 %v3511_v1 }
 0x10e   :  { %3071 = vmatpush3.bf16.msra.mxu1 %v3390_v57  ;;  %v3422_v57 = vld [vmem:[%s4306_s2 + $0xa8] sm:$0xff]  }
 0x10f   :  { %3072 = vmatprep.subr.bf16.mxu1 %v3511_v1 }
 0x112   :  { %3073 = vmatpush3.bf16.msra.mxu1 %v3392_v58  ;;  %v3423_v58 = vld [vmem:[%s4306_s2 + $0xb0] sm:$0xff]  }
 0x113   :  { %3074 = vmatprep.subr.bf16.mxu1 %v3511_v1 }
 0x116   :  { %3075 = vmatpush3.bf16.msra.mxu1 %v3394_v59  ;;  %v379_v2 = vpop.f32.mrb[4].mxu0  ;;  %v3424_v59 = vld [vmem:[%s4306_s2 + $0xb8] sm:$0xff]  }
 0x117   :  { %3076 = vmatprep.subr.bf16.mxu1 %v3511_v1  ;;  %v3792_v3 = vadd.f32 %v3789_v0, %v379_v2  ;;  %v3054_v4 = vpop.f32.mrb[5].mxu0  ;;  %v3425_v2 = vld [vmem:[%s4310_s6 + $0x80] sm:$0xff]  }
 0x118   :  { %v3794_v5 = vpop.f32.mrb[6].mxu0  ;;  %v3426_v4 = vld [vmem:[%s4310_s6 + $0x88] sm:$0xff]  }
 0x119   :  { %v3055_v6 = vpop.f32.mrb[7].mxu0 }
 0x11a   :  { %3077 = vmatpush3.bf16.msra.mxu1 %v3396_v60  ;;  %v3427_v6 = vld [vmem:[%s4310_s6 + $0x90] sm:$0xff]  }
 0x11b   :  { %3078 = vmatprep.subr.bf16.mxu1 %v3511_v1 }
 0x11e   :  { %3079 = vmatpush3.bf16.msra.mxu1 %v3398_v61 }
 0x11f   :  { %3080 = vmatprep.subr.bf16.mxu1 %v3511_v1 }
 0x122   :  { %3081 = vmatpush3.bf16.msra.mxu1 %v3399_v62 }
 0x123   :  { %3082 = vmatprep.subr.bf16.mxu1 %v3511_v1 }
 0x126   :  { %3083 = vmatpush3.bf16.msra.mxu1 %v3400_v63 }
 0x127   :  { %3108 = vmatprep.subr.bf16.mxu1 %v3511_v1 }
 0x129   :  { %3085 = vmatmul.mubr.bf16.vlgmr.msra.gmra.mrb[12].mxu1 %v3654_v19 }
 0x12a   :  { %3124 = vmatprep.mubr.msk.bf16.mxu1 %vm3512_vm0, %v3511_v1  ;;  %3109 = vmatpush3.bf16.msra.mxu1 %v3401_v7  ;;  %v3428_v7 = vld [vmem:[%s4310_s6 + $0x98] sm:$0xff]  }
 0x12b   :  { %3110 = vmatprep.subr.bf16.mxu1 %v3511_v1 }
 0x12e   :  { %3111 = vmatpush3.bf16.msra.mxu1 %v3402_v8  ;;  %v3429_v8 = vld [vmem:[%s4310_s6 + $0xa0] sm:$0xff]  }
 0x12f   :  { %3112 = vmatprep.subr.bf16.mxu1 %v3511_v1 }
 0x132   :  { %3113 = vmatpush3.bf16.msra.mxu1 %v3403_v9  ;;  %v2714_v9 = vld [vmem:[%s4309_s5 + $0x2] ss:$0 sm:$0xff] }
 0x133   :  { %3114 = vmatprep.subr.bf16.mxu1 %v3511_v1 }
 0x136   :  { %3115 = vmatpush3.bf16.msra.mxu1 %v3404_v10  ;;  %v708_v14 = vpop.f32.mrb[8].mxu0  ;;  %v3430_v10 = vld [vmem:[%s4310_s6 + $0xa8] sm:$0xff]  }
 0x137   :  { %3116 = vmatprep.subr.bf16.mxu1 %v3511_v1  ;;  %v709_v15 = vadd.f32 %v2634_v13, %v708_v14  ;;  %v3106_v16 = vpop.f32.mrb[9].mxu0 }
 0x138   :  { %v711_v18 = vpop.f32.mrb[10].mxu0 }
 0x139   :  { %v831_v20 = vpack.c.bf16 %v709_v15, %v709_v15  ;;  %v712_v21 = vadd.f32 %v2634_v13, %v711_v18  ;;  %v3107_v22 = vpop.f32.mrb[11].mxu0  ;;  %v3431_v15 = vld [vmem:[%s4310_s6 + $0xb0] sm:$0xff]  }
 0x13a   :  { %3117 = vmatpush3.bf16.msra.mxu1 %v3405_v11  ;;  %v3433_v22 = vld [vmem:[%s4308_s4 + $0xc0] sm:$0xff]  }
 0x13b   :  { %3118 = vmatprep.subr.bf16.mxu1 %v3511_v1  ;;  %v837_v23 = vsel %vm390_vm1, %v831_v20, 0  ;;  %v832_v43 = vpack.c.bf16 %v712_v21, %v712_v21  ;;  %v3432_v21 = vld [vmem:[%s4310_s6 + $0xb8] sm:$0xff]  }
 0x13c   :  { %3129 = vmatpush3.bf16.xpose.msra.mxu0 %v837_v23  ;;  %v3434_v23 = vld [vmem:[%s4308_s4 + $0xc8] sm:$0xff]  }
 0x13d   :  { %3134 = vmatprep.subr.bf16.mxu0 %v3511_v1  ;;  %v883_v49 = vsel %vm390_vm1, %v832_v43, 0 }
 0x13e   :  { %3119 = vmatpush3.bf16.msra.mxu1 %v3406_v12 }
 0x13f   :  { %3120 = vmatprep.subr.bf16.mxu1 %v3511_v1 }
 0x142   :  { %3121 = vmatpush3.bf16.msra.mxu1 %v3407_v17 }
 0x143   :  { %3122 = vmatprep.subr.bf16.mxu1 %v3511_v1 }
 0x146   :  { %3123 = vmatpush3.bf16.msra.mxu1 %v3408_v24  ;;  %v3435_v24 = vld [vmem:[%s4308_s4 + $0xd0] sm:$0xff]  }
 0x147   :  { %3160 = vmatprep.subr.bf16.mxu1 %v3511_v1 }
 0x149   :  { %3125 = vmatmul.mubr.bf16.vlgmr.msra.gmra.mrb[16].mxu1 %v3654_v19 }
 0x14a   :  { %3161 = vmatpush3.bf16.msra.mxu1 %v3409_v25  ;;  %3176 = vmatprep.mubr.msk.bf16.mxu1 %vm3512_vm0, %v3511_v1  ;;  %v3437_v25 = vld [vmem:[%s4308_s4 + $0xd8] sm:$0xff]  }
 0x14b   :  { %3162 = vmatprep.subr.bf16.mxu1 %v3511_v1 }
 0x14e   :  { %3163 = vmatpush3.bf16.msra.mxu1 %v3410_v26  ;;  %v3439_v26 = vld [vmem:[%s4308_s4 + $0xe0] sm:$0xff]  }
 0x14f   :  { %3164 = vmatprep.subr.bf16.mxu1 %v3511_v1 }
 0x152   :  { %3165 = vmatpush3.bf16.msra.mxu1 %v3411_v27  ;;  %v3441_v27 = vld [vmem:[%s4308_s4 + $0xe8] sm:$0xff]  }
 0x153   :  { %3166 = vmatprep.subr.bf16.mxu1 %v3511_v1 }
 0x156   :  { %3167 = vmatpush3.bf16.msra.mxu1 %v3413_v28  ;;  %v3443_v28 = vld [vmem:[%s4308_s4 + $0xf0] sm:$0xff]  }
 0x157   :  { %3168 = vmatprep.subr.bf16.mxu1 %v3511_v1 }
 0x15a   :  { %3169 = vmatpush3.bf16.msra.mxu1 %v3415_v29  ;;  %v3445_v29 = vld [vmem:[%s4308_s4 + $0xf8] sm:$0xff]  }
 0x15b   :  { %3170 = vmatprep.subr.bf16.mxu1 %v3511_v1 }
 0x15e   :  { %3171 = vmatpush3.bf16.msra.mxu1 %v3417_v30  ;;  %v4005_v30 = vld [vmem:[%s4305_s1] sm:$0xff] }
 0x15f   :  { %3172 = vmatprep.subr.bf16.mxu1 %v3511_v1  ;;  %vm48_vm2 = vcmp.eq.f32.partialorder %v4005_v30, 0.0 }
 0x162   :  { %3173 = vmatpush3.bf16.msra.mxu1 %v3419_v31 }
 0x163   :  { %3174 = vmatprep.subr.bf16.mxu1 %v3511_v1 }
 0x166   :  { %3175 = vmatpush3.bf16.msra.mxu1 %v3421_v32 }
 0x167   :  { %3200 = vmatprep.subr.bf16.mxu1 %v3511_v1 }
 0x169   :  { %3177 = vmatmul.mubr.bf16.vlgmr.msra.gmra.mrb[20].mxu1 %v3654_v19 }
 0x16a   :  { %3202 = vmatprep.mubr.msk.bf16.mxu1 %vm3512_vm0, %v3511_v1 }
 0x1d4   :  { %v3871_v33 = vpop.f32.mrb[4].mxu1 }
 0x1d5   :  { %v3060_v34 = vpop.f32.mrb[5].mxu1  ;;  %v483_v31 = vmul.f32 0.35355338, %v3871_v33  ;;  %v4022_v33 = vld [vmem:[%s4305_s1 + $0x8] sm:$0xff] }
 0x1d6   :  { %v434_v35 = vpop.f32.mrb[6].mxu1  ;;  %vm49_vm3 = vcmp.eq.f32.partialorder %v4022_v33, 0.0 }
 0x1d7   :  { %v3061_v36 = vpop.f32.mrb[7].mxu1 }
 0x1dc   :  { %v3873_v37 = vpop.f32.mrb[8].mxu1 }
 0x1dd   :  { %v3066_v38 = vpop.f32.mrb[9].mxu1 }
 0x1de   :  { %v480_v39 = vpop.f32.mrb[10].mxu1  ;;  %v4011_v38 = vsel %vm48_vm2, -1e+09, %v483_v31 }
 0x1df   :  { %v3067_v40 = vpop.f32.mrb[11].mxu1 }
 0x1fc   :  { %v594_v42 = vpop.f32.mrb[12].mxu1 }
 0x1fd   :  { %v595_v44 = vadd.f32 %v2608_v41, %v594_v42  ;;  %v3086_v45 = vpop.f32.mrb[13].mxu1  ;;  %v484_v42 = vmul.f32 0.35355338, %v3873_v37  ;;  %v2688_v37 = vld [vmem:[%s4307_s3 + $0x2] ss:$0 sm:$0xff] }
 0x1fe   :  { %v597_v46 = vpop.f32.mrb[14].mxu1 }
 0x1ff   :  { %v829_v47 = vpack.c.bf16 %v595_v44, %v595_v44  ;;  %v3087_v48 = vpop.f32.mrb[15].mxu1  ;;  %v598_v50 = vadd.f32 %v2608_v41, %v597_v46 }
 0x201   :  { %3131 = vmatmul.mubr.msk.bf16.vlgmr.msra.gmra.mrb[12].mxu0 %vm390_vm1, %v829_v47  ;;  %v830_v52 = vpack.c.bf16 %v598_v50, %v598_v50  ;;  %v4028_v47 = vsel %vm49_vm3, -1e+09, %v484_v42 }
 0x202   :  { %3135 = vmatpush3.bf16.xpose.msra.mxu0 %v883_v49  ;;  %3136 = vmatprep.mubr.msk.bf16.mxu0 %vm3512_vm0, %v3511_v1 }
 0x203   :  { %3140 = vmatprep.subr.bf16.mxu0 %v3511_v1 }
 0x209   :  { %3137 = vmatmul.mubr.msk.bf16.vlgmr.msra.gmra.mrb[16].mxu0 %vm390_vm1, %v830_v52 }
 0x20a   :  { %3141 = vmatpush3.bf16.msra.mxu0 %v3412_v51  ;;  %3156 = vmatprep.mubr.msk.bf16.mxu0 %vm3512_vm0, %v3511_v1 }
 0x20b   :  { %3142 = vmatprep.subr.bf16.mxu0 %v3511_v1 }
 0x20e   :  { %3143 = vmatpush3.bf16.msra.mxu0 %v3414_v53 }
 0x20f   :  { %3144 = vmatprep.subr.bf16.mxu0 %v3511_v1 }
 0x212   :  { %3145 = vmatpush3.bf16.msra.mxu0 %v3416_v54 }
 0x213   :  { %3146 = vmatprep.subr.bf16.mxu0 %v3511_v1 }
 0x216   :  { %3147 = vmatpush3.bf16.msra.mxu0 %v3418_v55 }
 0x217   :  { %3148 = vmatprep.subr.bf16.mxu0 %v3511_v1 }
 0x21a   :  { %3149 = vmatpush3.bf16.msra.mxu0 %v3420_v56 }
 0x21b   :  { %3150 = vmatprep.subr.bf16.mxu0 %v3511_v1 }
 0x21c   :  { %v3921_v60 = vpop.f32.mrb[16].mxu1 }
 0x21d   :  { %v3126_v61 = vpop.f32.mrb[17].mxu1 }
 0x21e   :  { %3151 = vmatpush3.bf16.msra.mxu0 %v3422_v57  ;;  %v3923_v62 = vpop.f32.mrb[18].mxu1  ;;  %v3436_v61 = vld [vmem:[%s4306_s2 + $0xc0] sm:$0xff]  }
 0x21f   :  { %3152 = vmatprep.subr.bf16.mxu0 %v3511_v1  ;;  %v3127_v63 = vpop.f32.mrb[19].mxu1 }
 0x222   :  { %3153 = vmatpush3.bf16.msra.mxu0 %v3423_v58 }
 0x223   :  { %3154 = vmatprep.subr.bf16.mxu0 %v3511_v1 }
 0x226   :  { %3155 = vmatpush3.bf16.msra.mxu0 %v3424_v59 }
 0x227   :  { %3180 = vmatprep.subr.bf16.mxu0 %v3511_v1 }
 0x229   :  { %3157 = vmatmul.mubr.bf16.vlgmr.msra.gmra.mrb[20].mxu0 %v3654_v19 }
 0x22a   :  { %3196 = vmatprep.mubr.msk.bf16.mxu0 %vm3512_vm0, %v3511_v1  ;;  %3181 = vmatpush3.bf16.msra.mxu0 %v3425_v2  ;;  %v3438_v2 = vld [vmem:[%s4306_s2 + $0xc8] sm:$0xff]  }
 0x22b   :  { %3182 = vmatprep.subr.bf16.mxu0 %v3511_v1 }
 0x22e   :  { %3183 = vmatpush3.bf16.msra.mxu0 %v3426_v4  ;;  %v3440_v4 = vld [vmem:[%s4306_s2 + $0xd0] sm:$0xff]  }
 0x22f   :  { %3184 = vmatprep.subr.bf16.mxu0 %v3511_v1 }
 0x232   :  { %3185 = vmatpush3.bf16.msra.mxu0 %v3427_v6  ;;  %v3442_v6 = vld [vmem:[%s4306_s2 + $0xd8] sm:$0xff]  }
 0x233   :  { %3186 = vmatprep.subr.bf16.mxu0 %v3511_v1 }
 0x236   :  { %3187 = vmatpush3.bf16.msra.mxu0 %v3428_v7  ;;  %v3444_v7 = vld [vmem:[%s4306_s2 + $0xe0] sm:$0xff]  }
 0x237   :  { %3188 = vmatprep.subr.bf16.mxu0 %v3511_v1 }
 0x23a   :  { %3189 = vmatpush3.bf16.msra.mxu0 %v3429_v8  ;;  %v3446_v8 = vld [vmem:[%s4306_s2 + $0xe8] sm:$0xff]  }
 0x23b   :  { %3190 = vmatprep.subr.bf16.mxu0 %v3511_v1 }
 0x23c   :  { %v1150_v11 = vpop.f32.mrb[20].mxu1 }
 0x23d   :  { %v1151_v12 = vadd.f32 %v2714_v9, %v1150_v11  ;;  %v3178_v13 = vpop.f32.mrb[21].mxu1  ;;  %v3449_v11 = vld [vmem:[%s4310_s6 + $0xc0] sm:$0xff]  }
 0x23e   :  { %3191 = vmatpush3.bf16.msra.mxu0 %v3430_v10  ;;  %v1153_v14 = vpop.f32.mrb[22].mxu1  ;;  %v3448_v10 = vld [vmem:[%s4306_s2 + $0xf8] sm:$0xff]   ;;  %v3451_v13 = vld [vmem:[%s4310_s6 + $0xd0] sm:$0xff]  }
 0x23f   :  { %v1273_v16 = vpack.c.bf16 %v1151_v12, %v1151_v12  ;;  %v3954_v17 = vadd.f32 %v2714_v9, %v1153_v14  ;;  %v3179_v18 = vpop.f32.mrb[23].mxu1  ;;  %3192 = vmatprep.subr.bf16.mxu0 %v3511_v1  ;;  %v3447_v9 = vld [vmem:[%s4306_s2 + $0xf0] sm:$0xff]   ;;  %v3450_v12 = vld [vmem:[%s4310_s6 + $0xc8] sm:$0xff]   ;;  %v3452_v14 = vld [vmem:[%s4310_s6 + $0xd8] sm:$0xff]  }
 0x240   :  { %v383_v18 = vadd.f32 %v3789_v0, %v3794_v5 }
 0x241   :  { %v1279_v20 = vsel %vm390_vm1, %v1273_v16, 0  ;;  %v1274_v52 = vpack.c.bf16 %v3954_v17, %v3954_v17  ;;  %v3454_v16 = vld [vmem:[%s4310_s6 + $0xe8] sm:$0xff]   ;;  %v3455_v17 = vld [vmem:[%s4310_s6 + $0xf0] sm:$0xff]  }
 0x242   :  { %3193 = vmatpush3.bf16.msra.mxu0 %v3431_v15  ;;  %3201 = vmatpush3.bf16.xpose.msra.mxu1 %v1279_v20  ;;  %v3453_v15 = vld [vmem:[%s4310_s6 + $0xe0] sm:$0xff]   ;;  %v3456_v20 = vld [vmem:[%s4310_s6 + $0xf8] sm:$0xff]  }
 0x243   :  { %3194 = vmatprep.subr.bf16.mxu0 %v3511_v1  ;;  %3206 = vmatprep.subr.bf16.mxu1 %v3511_v1  ;;  %v1325_v58 = vsel %vm390_vm1, %v1274_v52, 0 }
 0x246   :  { %3195 = vmatpush3.bf16.msra.mxu0 %v3432_v21  ;;  %v1858_v21 = vpack.c.bf16 %v383_v18, %v383_v18 }
 0x247   :  { %3232 = vmatprep.subr.bf16.mxu0 %v3511_v1 }
 0x249   :  { %3197 = vmatmul.mubr.bf16.vlgmr.msra.gmra.mrb[24].mxu0 %v3654_v19 }
 0x24a   :  { %3233 = vmatpush3.bf16.msra.mxu0 %v3433_v22  ;;  %3248 = vmatprep.mubr.msk.bf16.mxu0 %vm3512_vm0, %v3511_v1  ;;  %v1910_v22 = vsel %vm1862_vm4, %v1858_v21, 0 }
 0x24b   :  { %3234 = vmatprep.subr.bf16.mxu0 %v3511_v1 }
 0x24e   :  { %3235 = vmatpush3.bf16.msra.mxu0 %v3434_v23 }
 0x24f   :  { %3236 = vmatprep.subr.bf16.mxu0 %v3511_v1 }
 0x252   :  { %3237 = vmatpush3.bf16.msra.mxu0 %v3435_v24 }
 0x253   :  { %3238 = vmatprep.subr.bf16.mxu0 %v3511_v1 }
 0x256   :  { %3239 = vmatpush3.bf16.msra.mxu0 %v3437_v25  ;;  %v2794_v25 = vld [vmem:[%s4309_s5 + $0x3] ss:$0 sm:$0xff] }
 0x257   :  { %3240 = vmatprep.subr.bf16.mxu0 %v3511_v1 }
 0x25a   :  { %3241 = vmatpush3.bf16.msra.mxu0 %v3439_v26 }
 0x25b   :  { %3242 = vmatprep.subr.bf16.mxu0 %v3511_v1 }
 0x25e   :  { %3243 = vmatpush3.bf16.msra.mxu0 %v3441_v27 }
 0x25f   :  { %3244 = vmatprep.subr.bf16.mxu0 %v3511_v1 }
 0x262   :  { %3245 = vmatpush3.bf16.msra.mxu0 %v3443_v28 }
 0x263   :  { %3246 = vmatprep.subr.bf16.mxu0 %v3511_v1 }
 0x266   :  { %3247 = vmatpush3.bf16.msra.mxu0 %v3445_v29 }
 0x267   :  { %3272 = vmatprep.subr.bf16.mxu0 %v3511_v1 }
 0x269   :  { %3249 = vmatmul.mubr.bf16.vlgmr.msra.gmra.mrb[28].mxu0 %v3654_v19 }
 0x26a   :  { %3274 = vmatprep.mubr.msk.bf16.mxu0 %vm3512_vm0, %v3511_v1 }
 0x2d4   :  { %v873_v32 = vpop.f32.mrb[12].mxu0 }
 0x2d5   :  { %v925_v34 = vmul.f32 0.35355338, %v873_v32  ;;  %v3132_v35 = vpop.f32.mrb[13].mxu0 }
 0x2d6   :  { %v876_v36 = vpop.f32.mrb[14].mxu0 }
 0x2d7   :  { %v4015_v39 = vsel %vm48_vm2, -1e+09, %v925_v34  ;;  %v3133_v40 = vpop.f32.mrb[15].mxu0 }
 0x2d8   :  { %v1813_v41 = vmax.f32 %v4011_v38, %v4015_v39 }
 0x2dc   :  { %v919_v43 = vpop.f32.mrb[16].mxu0 }
 0x2dd   :  { %v926_v44 = vmul.f32 0.35355338, %v919_v43  ;;  %v3138_v45 = vpop.f32.mrb[17].mxu0 }
 0x2de   :  { %v922_v46 = vpop.f32.mrb[18].mxu0 }
 0x2df   :  { %v4032_v48 = vsel %vm49_vm3, -1e+09, %v926_v44  ;;  %v3139_v49 = vpop.f32.mrb[19].mxu0 }
 0x2e0   :  { %v1814_v50 = vmax.f32 %v4028_v47, %v4032_v48 }
 0x2fc   :  { %v1036_v51 = vpop.f32.mrb[20].mxu0 }
 0x2fd   :  { %v1037_v53 = vadd.f32 %v2688_v37, %v1036_v51  ;;  %v3158_v54 = vpop.f32.mrb[21].mxu0 }
 0x2fe   :  { %v1039_v55 = vpop.f32.mrb[22].mxu0 }
 0x2ff   :  { %v1271_v56 = vpack.c.bf16 %v1037_v53, %v1037_v53  ;;  %v3159_v57 = vpop.f32.mrb[23].mxu0  ;;  %v1040_v59 = vadd.f32 %v2688_v37, %v1039_v55  ;;  %v2768_v55 = vld [vmem:[%s4307_s3 + $0x3] ss:$0 sm:$0xff] }
 0x301   :  { %3203 = vmatmul.mubr.msk.bf16.vlgmr.msra.gmra.mrb[24].mxu1 %vm390_vm1, %v1271_v56  ;;  %v1272_v63 = vpack.c.bf16 %v1040_v59, %v1040_v59 }
 0x302   :  { %3207 = vmatpush3.bf16.xpose.msra.mxu1 %v1325_v58  ;;  %3208 = vmatprep.mubr.msk.bf16.mxu1 %vm3512_vm0, %v3511_v1 }
 0x303   :  { %3212 = vmatprep.subr.bf16.mxu1 %v3511_v1 }
 0x309   :  { %3209 = vmatmul.mubr.msk.bf16.vlgmr.msra.gmra.mrb[28].mxu1 %vm390_vm1, %v1272_v63 }
 0x30a   :  { %3213 = vmatpush3.bf16.msra.mxu1 %v3436_v61  ;;  %3228 = vmatprep.mubr.msk.bf16.mxu1 %vm3512_vm0, %v3511_v1 }
 0x30b   :  { %3214 = vmatprep.subr.bf16.mxu1 %v3511_v1 }
 0x30e   :  { %3215 = vmatpush3.bf16.msra.mxu1 %v3438_v2 }
 0x30f   :  { %3216 = vmatprep.subr.bf16.mxu1 %v3511_v1 }
 0x312   :  { %3217 = vmatpush3.bf16.msra.mxu1 %v3440_v4  ;;  %v1857_v4 = vpack.c.bf16 %v3792_v3, %v3792_v3 }
 0x313   :  { %3218 = vmatprep.subr.bf16.mxu1 %v3511_v1 }
 0x316   :  { %3219 = vmatpush3.bf16.msra.mxu1 %v3442_v6 }
 0x317   :  { %3220 = vmatprep.subr.bf16.mxu1 %v3511_v1 }
 0x31a   :  { %3221 = vmatpush3.bf16.msra.mxu1 %v3444_v7  ;;  %v1864_v7 = vsel %vm1862_vm4, %v1857_v4, 0 }
 0x31b   :  { %3222 = vmatprep.subr.bf16.mxu1 %v3511_v1 }
 0x31c   :  { %v4123_v0 = vpop.f32.mrb[24].mxu0 }
 0x31d   :  { %v3198_v5 = vpop.f32.mrb[25].mxu0 }
 0x31e   :  { %3223 = vmatpush3.bf16.msra.mxu1 %v3446_v8  ;;  %v4125_v23 = vpop.f32.mrb[26].mxu0  ;;  %v4160_v8 = vld [vmem:[%s4311_s7 + $0x3] ss:$0 sm:$0xff] }
 0x31f   :  { %3224 = vmatprep.subr.bf16.mxu1 %v3511_v1  ;;  %v3199_v24 = vpop.f32.mrb[27].mxu0 }
 0x322   :  { %3225 = vmatpush3.bf16.msra.mxu1 %v3447_v9 }
 0x323   :  { %3226 = vmatprep.subr.bf16.mxu1 %v3511_v1 }
 0x326   :  { %3227 = vmatpush3.bf16.msra.mxu1 %v3448_v10 }
 0x327   :  { %3252 = vmatprep.subr.bf16.mxu1 %v3511_v1 }
 0x329   :  { %3229 = vmatmul.mubr.bf16.vlgmr.msra.gmra.mrb[32].mxu1 %v3654_v19 }
 0x32a   :  { %3253 = vmatpush3.bf16.msra.mxu1 %v3449_v11  ;;  %3268 = vmatprep.mubr.msk.bf16.mxu1 %vm3512_vm0, %v3511_v1 }
 0x32b   :  { %3254 = vmatprep.subr.bf16.mxu1 %v3511_v1 }
 0x32e   :  { %3255 = vmatpush3.bf16.msra.mxu1 %v3450_v12 }
 0x32f   :  { %3256 = vmatprep.subr.bf16.mxu1 %v3511_v1 }
 0x332   :  { %3257 = vmatpush3.bf16.msra.mxu1 %v3451_v13 }
 0x333   :  { %3258 = vmatprep.subr.bf16.mxu1 %v3511_v1 }
 0x336   :  { %3259 = vmatpush3.bf16.msra.mxu1 %v3452_v14 }
 0x337   :  { %3260 = vmatprep.subr.bf16.mxu1 %v3511_v1 }
 0x33a   :  { %3261 = vmatpush3.bf16.msra.mxu1 %v3453_v15 }
 0x33b   :  { %3262 = vmatprep.subr.bf16.mxu1 %v3511_v1 }
 0x33c   :  { %v1592_v26 = vpop.f32.mrb[28].mxu0 }
 0x33d   :  { %v1593_v27 = vadd.f32 %v2794_v25, %v1592_v26  ;;  %v3250_v28 = vpop.f32.mrb[29].mxu0 }
 0x33e   :  { %3263 = vmatpush3.bf16.msra.mxu1 %v3454_v16 }
 0x33f   :  { %3264 = vmatprep.subr.bf16.mxu1 %v3511_v1  ;;  %v1715_v29 = vpack.c.bf16 %v1593_v27, %v1593_v27 }
 0x341   :  { %v1721_v34 = vsel %vm390_vm1, %v1715_v29, 0 }
 0x342   :  { %3265 = vmatpush3.bf16.msra.mxu1 %v3455_v17  ;;  %3273 = vmatpush3.bf16.xpose.msra.mxu0 %v1721_v34 }
 0x343   :  { %3266 = vmatprep.subr.bf16.mxu1 %v3511_v1  ;;  %3278 = vmatprep.subr.bf16.mxu0 %v3511_v1 }
 0x346   :  { %3267 = vmatpush3.bf16.msra.mxu1 %v3456_v20 }
 0x347   :  { %3290 = vmatprep.subr.bf16.mxu1 %v3511_v1 }
 0x349   :  { %3269 = vmatmul.mubr.bf16.vlgmr.msra.gmra.mrb[36].mxu1 %v3654_v19  ;;  %v1595_v19 = vpop.f32.mrb[30].mxu0 }
 0x34a   :  { %3291 = vmatpush3.bf16.msra.mxu1 %v1910_v22  ;;  %3292 = vmatprep.mubr.msk.bf16.mxu1 %vm3512_vm0, %v3511_v1  ;;  %v1596_v31 = vadd.f32 %v2794_v25, %v1595_v19  ;;  %v3251_v32 = vpop.f32.mrb[31].mxu0 }
 0x34b   :  { %3302 = vmatprep.subr.bf16.mxu1 %v3511_v1 }
 0x34c   :  { %v1716_v57 = vpack.c.bf16 %v1596_v31, %v1596_v31 }
 0x34e   :  { %v1767_v2 = vsel %vm390_vm1, %v1716_v57, 0 }
 0x3d4   :  { %v1315_v35 = vpop.f32.mrb[24].mxu1 }
 0x3d5   :  { %v1367_v36 = vmul.f32 0.35355338, %v1315_v35  ;;  %v3204_v40 = vpop.f32.mrb[25].mxu1 }
 0x3d6   :  { %v1318_v42 = vpop.f32.mrb[26].mxu1 }
 0x3d7   :  { %v1369_v43 = vsel %vm48_vm2, -1e+09, %v1367_v36  ;;  %v3205_v44 = vpop.f32.mrb[27].mxu1 }
 0x3d8   :  { %v1815_v45 = vmax.f32 %v1813_v41, %v1369_v43 }
 0x3dc   :  { %v1361_v46 = vpop.f32.mrb[28].mxu1 }
 0x3dd   :  { %v1368_v49 = vmul.f32 0.35355338, %v1361_v46  ;;  %v3210_v37 = vpop.f32.mrb[29].mxu1 }
 0x3de   :  { %v1364_v51 = vpop.f32.mrb[30].mxu1 }
 0x3df   :  { %v1370_v52 = vsel %vm49_vm3, -1e+09, %v1368_v49  ;;  %v3211_v53 = vpop.f32.mrb[31].mxu1 }
 0x3e0   :  { %v1816_v54 = vmax.f32 %v1814_v50, %v1370_v52 }
 0x3fc   :  { %v1478_v56 = vpop.f32.mrb[32].mxu1 }
 0x3fd   :  { %v1479_v58 = vadd.f32 %v2768_v55, %v1478_v56  ;;  %v3230_v41 = vpop.f32.mrb[33].mxu1 }
 0x3fe   :  { %v1481_v59 = vpop.f32.mrb[34].mxu1 }
 0x3ff   :  { %v1713_v61 = vpack.c.bf16 %v1479_v58, %v1479_v58  ;;  %v3231_v63 = vpop.f32.mrb[35].mxu1  ;;  %v1482_v50 = vadd.f32 %v2768_v55, %v1481_v59 }
 0x401   :  { %3275 = vmatmul.mubr.msk.bf16.vlgmr.msra.gmra.mrb[32].mxu0 %vm390_vm1, %v1713_v61  ;;  %v1714_v6 = vpack.c.bf16 %v1482_v50, %v1482_v50 }
 0x402   :  { %3279 = vmatpush3.bf16.xpose.msra.mxu0 %v1767_v2  ;;  %3280 = vmatprep.mubr.msk.bf16.mxu0 %vm3512_vm0, %v3511_v1 }
 0x403   :  { %3284 = vmatprep.subr.bf16.mxu0 %v3511_v1 }
 0x409   :  { %3281 = vmatmul.mubr.msk.bf16.vlgmr.msra.gmra.mrb[36].mxu0 %vm390_vm1, %v1714_v6 }
 0x40a   :  { %3285 = vmatpush3.bf16.msra.mxu0 %v1864_v7  ;;  %3286 = vmatprep.mubr.msk.bf16.mxu0 %vm3512_vm0, %v3511_v1 }
 0x40b   :  { %3296 = vmatprep.subr.bf16.mxu0 %v3511_v1 }
 0x41c   :  { %v4162_v9 = vpop.f32.mrb[36].mxu1 }
 0x41d   :  { %v3270_v10 = vpop.f32.mrb[37].mxu1 }
 0x41e   :  { %v1709_v3 = vpop.f32.mrb[38].mxu1 }
 0x41f   :  { %v4165_v11 = vadd.f32 %v4160_v8, %v1709_v3  ;;  %v3271_v12 = vpop.f32.mrb[39].mxu1 }
 0x4d4   :  { %v1757_v13 = vpop.f32.mrb[32].mxu0 }
 0x4d5   :  { %v1809_v14 = vmul.f32 0.35355338, %v1757_v13  ;;  %v3276_v15 = vpop.f32.mrb[33].mxu0 }
 0x4d6   :  { %v1760_v16 = vpop.f32.mrb[34].mxu0 }
 0x4d7   :  { %v1811_v17 = vsel %vm48_vm2, -1e+09, %v1809_v14  ;;  %v3277_v18 = vpop.f32.mrb[35].mxu0 }
 0x4d8   :  { %v1817_v20 = vmax.f32 %v1815_v45, %v1811_v17 }
 0x4da   :  { %v1819_v21 = vsub.f32 %v4011_v38, %v1817_v20  ;;  %v1825_v22 = vsub.f32 %v4015_v39, %v1817_v20  ;;  %v1831_v5 = vsub.f32 %v1369_v43, %v1817_v20  ;;  %v1837_v24 = vsub.f32 %v1811_v17, %v1817_v20 }
 0x4dc   :  { %v1821_v25 = vmul.f32 1.442695, %v1819_v21  ;;  %v1827_v26 = vmul.f32 1.442695, %v1825_v22  ;;  %v1833_v27 = vmul.f32 1.442695, %v1831_v5 }
 0x4dd   :  { %v1803_v28 = vpop.f32.mrb[36].mxu0  ;;  %v1839_v19 = vmul.f32 1.442695, %v1837_v24  ;;  %v1953_v21 = vld [vmem:[%s4312_s8] sm:$0xf] }
 0x4de   :  { %3457 = vpow2.f32 %v1821_v25  ;;  %v1810_v29 = vmul.f32 0.35355338, %v1803_v28  ;;  %v3282_v31 = vpop.f32.mrb[37].mxu0  ;;  %v2106_v22 = vsel %vm1862_vm4, %v1953_v21, 0  ;;  %v2835_v5 = vld [vmem:[%s4312_s8 + $0x4] sm:$0xf] }
 0x4df   :  { %3459 = vpow2.f32 %v1827_v26  ;;  %v1806_v32 = vpop.f32.mrb[38].mxu0  ;;  %v2059_v24 = vsel %vm1862_vm4, %v2835_v5, 0  ;;  %v2740_v26 = vld [vmem:[%s4311_s7 + $0x2] ss:$0 sm:$0xff] }
 0x4e0   :  { %v1812_v30 = vsel %vm49_vm3, -1e+09, %v1810_v29  ;;  %v3283_v34 = vpop.f32.mrb[39].mxu0  ;;  %3461 = vpow2.f32 %v1833_v27  ;;  %v1268_v29 = vadd.f32 %v2740_v26, %v4125_v23 }
 0x4e1   :  { %v1818_v38 = vmax.f32 %v1816_v54, %v1812_v30  ;;  %3463 = vpow2.f32 %v1839_v19 }
 0x4e2   :  { %v2154_v31 = vpack.c.bf16 %v1268_v29, %v1268_v29 }
 0x4e3   :  { %v1820_v39 = vsub.f32 %v4028_v47, %v1818_v38  ;;  %v1826_v35 = vsub.f32 %v4032_v48, %v1818_v38  ;;  %v1832_v36 = vsub.f32 %v1370_v52, %v1818_v38  ;;  %v1838_v40 = vsub.f32 %v1812_v30, %v1818_v38  ;;  %v2660_v52 = vld [vmem:[%s4311_s7 + $0x1] ss:$0 sm:$0xff] }
 0x4e4   :  { %v823_v41 = vadd.f32 %v2660_v52, %v3921_v60  ;;  %v826_v3 = vadd.f32 %v2660_v52, %v3923_v62 }
 0x4e5   :  { %v1823_v42 = vmul.f32 1.442695, %v1820_v39  ;;  %v1829_v43 = vmul.f32 1.442695, %v1826_v35  ;;  %v1835_v44 = vmul.f32 1.442695, %v1832_v36 }
 0x4e6   :  { %v1841_v46 = vmul.f32 1.442695, %v1838_v40  ;;  %v1958_v63 = vpack.c.bf16 %v823_v41, %v823_v41  ;;  %v1959_v12 = vpack.c.bf16 %v826_v3, %v826_v3  ;;  %v2304_v3 = vpack.c.bf16 %v4165_v11, %v4165_v11 }
 0x4e7   :  { %3465 = vpow2.f32 %v1823_v42  ;;  %v1265_v42 = vadd.f32 %v2740_v26, %v4123_v0 }
 0x4e8   :  { %v3458_v45 = vpop.eup %3457  ;;  %3467 = vpow2.f32 %v1829_v43  ;;  %v1964_v10 = vsel %vm1862_vm4, %v1958_v63, 0  ;;  %v2010_v62 = vsel %vm1862_vm4, %v1959_v12, 0  ;;  %v2205_v43 = vsel %vm1862_vm4, %v2154_v31, 0 }
 0x4e9   :  { %v3460_v49 = vpop.eup %3459  ;;  %3469 = vpow2.f32 %v1835_v44  ;;  %v1707_v44 = vadd.f32 %v4160_v8, %v4162_v9  ;;  %v2153_v23 = vpack.c.bf16 %v1265_v42, %v1265_v42 }
 0x4ea   :  { %v1843_v33 = vadd.f32 %v3460_v49, %v3458_v45  ;;  %v3462_v37 = vpop.eup %3461  ;;  %3471 = vpow2.f32 %v1841_v46 }
 0x4eb   :  { %v3464_v51 = vpop.eup %3463  ;;  %v2303_v46 = vpack.c.bf16 %v1707_v44, %v1707_v44 }
 0x4ec   :  { %v1845_v53 = vadd.f32 %v3462_v37, %v1843_v33 }
 0x4ed   :  { %v2309_v8 = vsel %vm1862_vm4, %v2303_v46, 0 }
 0x4ee   :  { %v1847_v54 = vadd.f32 %v3464_v51, %v1845_v53  ;;  %v2159_v53 = vsel %vm1862_vm4, %v2153_v23, 0 }
 0x4f0   :  { %3473 = vrcp.f32 %v1847_v54 }
 0x4f1   :  { %v3466_v47 = vpop.eup %3465 }
 0x4f2   :  { %v3468_v48 = vpop.eup %3467 }
 0x4f3   :  { %v1844_v55 = vadd.f32 %v3468_v48, %v3466_v47  ;;  %v3470_v56 = vpop.eup %3469 }
 0x4f4   :  { %v3472_v58 = vpop.eup %3471 }
 0x4f5   :  { %v1846_v57 = vadd.f32 %v3470_v56, %v1844_v55 }
 0x4f7   :  { %v1848_v59 = vadd.f32 %v3472_v58, %v1846_v57 }
 0x4f9   :  { %3475 = vrcp.f32 %v1848_v59 }
 0x4fa   :  { %v3474_v61 = vpop.eup %3473 }
 0x4fb   :  { %v1853_v2 = vmul.f32 %v3474_v61, %v3458_v45  ;;  %v1954_v50 = vmul.f32 %v3474_v61, %v3460_v49  ;;  %v4179_v4 = vmul.f32 %v3474_v61, %v3462_v37  ;;  %v4181_v6 = vmul.f32 %v3474_v61, %v3464_v51 }
 0x4fd   :  { %v1855_v7 = vpack.c.bf16 %v1853_v2, %v1853_v2  ;;  %v1956_v17 = vpack.c.bf16 %v1954_v50, %v1954_v50  ;;  %v2151_v54 = vpack.c.bf16 %v4179_v4, %v4179_v4 }
 0x4ff   :  { %3287 = vmatmul.mubr.msk.bf16.vlgmr.msra.gmra.mrb[40].mxu0 %vm390_vm1, %v1855_v7 }
 0x500   :  { %3297 = vmatpush3.bf16.msra.mxu0 %v1964_v10  ;;  %3298 = vmatprep.mubr.msk.bf16.mxu0 %vm3512_vm0, %v3511_v1 }
 0x501   :  { %3308 = vmatprep.subr.bf16.mxu0 %v3511_v1 }
 0x503   :  { %v3476_v60 = vpop.eup %3475 }
 0x504   :  { %v1854_v13 = vmul.f32 %v3476_v60, %v3466_v47  ;;  %v1955_v14 = vmul.f32 %v3476_v60, %v3468_v48  ;;  %v2150_v15 = vmul.f32 %v3476_v60, %v3470_v56  ;;  %v4189_v16 = vmul.f32 %v3476_v60, %v3472_v58  ;;  %v2840_v48 = vld [vmem:[%s4312_s8 + $0x8] sm:$0xf] }
 0x505   :  { %v2301_v47 = vpack.c.bf16 %v4181_v6, %v4181_v6  ;;  %v2254_v52 = vsel %vm1862_vm4, %v2840_v48, 0 }
 0x506   :  { %v1856_v18 = vpack.c.bf16 %v1854_v13, %v1854_v13  ;;  %v1957_v20 = vpack.c.bf16 %v1955_v14, %v1955_v14  ;;  %v2152_v0 = vpack.c.bf16 %v2150_v15, %v2150_v15  ;;  %v2302_v11 = vpack.c.bf16 %v4189_v16, %v4189_v16 }
 0x507   :  { %3299 = vmatmul.mubr.msk.bf16.vlgmr.msra.gmra.mrb[44].mxu0 %vm390_vm1, %v1956_v17 }
 0x508   :  { %3293 = vmatmul.mubr.msk.bf16.vlgmr.msra.gmra.mrb[40].mxu1 %vm390_vm1, %v1856_v18  ;;  %3310 = vmatprep.mubr.msk.bf16.mxu0 %vm3512_vm0, %v3511_v1 }
 0x509   :  { %3303 = vmatpush3.bf16.msra.mxu1 %v2010_v62  ;;  %3304 = vmatprep.mubr.msk.bf16.mxu1 %vm3512_vm0, %v3511_v1  ;;  %v2355_v62 = vsel %vm1862_vm4, %v2304_v3, 0 }
 0x50a   :  { %3314 = vmatprep.subr.bf16.mxu1 %v3511_v1  ;;  %3309 = vmatpush3.bf16.msra.mxu0 %v2059_v24 }
 0x50b   :  { %3320 = vmatprep.subr.bf16.mxu0 %v3511_v1 }
 0x510   :  { %3305 = vmatmul.mubr.msk.bf16.vlgmr.msra.gmra.mrb[44].mxu1 %vm390_vm1, %v1957_v20 }
 0x511   :  { %3316 = vmatprep.mubr.msk.bf16.mxu1 %vm3512_vm0, %v3511_v1  ;;  %3315 = vmatpush3.bf16.msra.mxu1 %v2106_v22  ;;  %v2844_v22 = vld [vmem:[%s4312_s8 + $0xc] sm:$0xf] }
 0x512   :  { %3326 = vmatprep.subr.bf16.mxu1 %v3511_v1  ;;  %v2404_v5 = vsel %vm1862_vm4, %v2844_v22, 0 }
 0x5d2   :  { %v1900_v25 = vpop.f32.mrb[40].mxu0 }
 0x5d3   :  { %v3288_v27 = vpop.f32.mrb[41].mxu0 }
 0x5d4   :  { %v1903_v28 = vpop.f32.mrb[42].mxu0 }
 0x5d5   :  { %v3289_v19 = vpop.f32.mrb[43].mxu0 }
 0x5da   :  { %v2000_v32 = vpop.f32.mrb[44].mxu0 }
 0x5db   :  { %v1946_v30 = vpop.f32.mrb[40].mxu1  ;;  %v3300_v34 = vpop.f32.mrb[45].mxu0 }
 0x5dc   :  { %v1952_v38 = vpack.c.bf16 %v1946_v30, %v1900_v25  ;;  %v3294_v39 = vpop.f32.mrb[41].mxu1  ;;  %v2003_v35 = vpop.f32.mrb[46].mxu0  ;;  %v2846_v34 = vld [vmem:[%s4313_s9] ss:$0 sm:$0xff] }
 0x5dd   :  { %v1949_v36 = vpop.f32.mrb[42].mxu1  ;;  %v3301_v40 = vpop.f32.mrb[47].mxu0 }
 0x5de   :  { %v3295_v45 = vpop.f32.mrb[43].mxu1  ;;  %3317 = vmatmul.mubr.msk.bf16.vlgmr.msra.gmra.mrb[48].mxu1 %vm390_vm1, %v1952_v38 }
 0x5df   :  { %3327 = vmatpush3.bf16.msra.mxu1 %v2205_v43  ;;  %3328 = vmatprep.mubr.msk.bf16.mxu1 %vm3512_vm0, %v3511_v1 }
 0x5e0   :  { %3338 = vmatprep.subr.bf16.mxu1 %v3511_v1 }
 0x5e3   :  { %v2046_v49 = vpop.f32.mrb[44].mxu1 }
 0x5e4   :  { %v2052_v33 = vpack.c.bf16 %v2046_v49, %v2000_v32  ;;  %v3306_v37 = vpop.f32.mrb[45].mxu1 }
 0x5e5   :  { %v2049_v51 = vpop.f32.mrb[46].mxu1 }
 0x5e6   :  { %v3307_v9 = vpop.f32.mrb[47].mxu1  ;;  %3311 = vmatmul.mubr.msk.bf16.vlgmr.msra.gmra.mrb[48].mxu0 %vm390_vm1, %v2052_v33  ;;  %3329 = vmatmul.mubr.msk.bf16.vlgmr.msra.gmra.mrb[52].mxu1 %vm390_vm1, %v2152_v0 }
 0x5e7   :  { %3321 = vmatpush3.bf16.msra.mxu0 %v2159_v53  ;;  %3339 = vmatpush3.bf16.msra.mxu1 %v2309_v8 }
 0x5e8   :  { %3322 = vmatprep.mubr.msk.bf16.mxu0 %vm3512_vm0, %v3511_v1  ;;  %3340 = vmatprep.mubr.msk.bf16.mxu1 %vm3512_vm0, %v3511_v1 }
 0x5e9   :  { %3332 = vmatprep.subr.bf16.mxu0 %v3511_v1  ;;  %3350 = vmatprep.subr.bf16.mxu1 %v3511_v1 }
 0x5ee   :  { %3323 = vmatmul.mubr.msk.bf16.vlgmr.msra.gmra.mrb[52].mxu0 %vm390_vm1, %v2151_v54  ;;  %3341 = vmatmul.mubr.msk.bf16.vlgmr.msra.gmra.mrb[56].mxu1 %vm390_vm1, %v2301_v47 }
 0x5ef   :  { %3334 = vmatprep.mubr.msk.bf16.mxu0 %vm3512_vm0, %v3511_v1  ;;  %3352 = vmatprep.mubr.msk.bf16.mxu1 %vm3512_vm0, %v3511_v1 }
 0x5f0   :  { %3333 = vmatpush3.bf16.msra.mxu0 %v2254_v52  ;;  %3351 = vmatpush3.bf16.msra.mxu1 %v2404_v5 }
 0x5f1   :  { %3344 = vmatprep.subr.bf16.mxu0 %v3511_v1 }
 0x6b1   :  { %v2142_v55 = vpop.f32.mrb[48].mxu1 }
 0x6b2   :  { %v3318_v56 = vpop.f32.mrb[49].mxu1 }
 0x6b3   :  { %v2145_v57 = vpop.f32.mrb[50].mxu1 }
 0x6b4   :  { %v3319_v58 = vpop.f32.mrb[51].mxu1 }
 0x6b9   :  { %v2095_v41 = vpop.f32.mrb[48].mxu0  ;;  %v2241_v59 = vpop.f32.mrb[52].mxu1 }
 0x6ba   :  { %v2143_v61 = vadd.f32 %v2142_v55, %v2095_v41  ;;  %v3312_v63 = vpop.f32.mrb[49].mxu0  ;;  %v3330_v2 = vpop.f32.mrb[53].mxu1 }
 0x6bb   :  { %v2098_v50 = vpop.f32.mrb[50].mxu0  ;;  %v2244_v4 = vpop.f32.mrb[54].mxu1 }
 0x6bc   :  { %v2146_v6 = vadd.f32 %v2145_v57, %v2098_v50  ;;  %v3313_v7 = vpop.f32.mrb[51].mxu0  ;;  %v3331_v10 = vpop.f32.mrb[55].mxu1 }
 0x6c1   :  { %v2195_v60 = vpop.f32.mrb[52].mxu0  ;;  %v2345_v12 = vpop.f32.mrb[56].mxu1 }
 0x6c2   :  { %v2247_v13 = vpack.c.bf16 %v2241_v59, %v2195_v60  ;;  %v3324_v14 = vpop.f32.mrb[53].mxu0  ;;  %v3342_v15 = vpop.f32.mrb[57].mxu1 }
 0x6c3   :  { %v2198_v17 = vpop.f32.mrb[54].mxu0  ;;  %v2348_v18 = vpop.f32.mrb[58].mxu1 }
 0x6c4   :  { %v3325_v20 = vpop.f32.mrb[55].mxu0  ;;  %3335 = vmatmul.mubr.msk.bf16.vlgmr.msra.gmra.mrb[56].mxu0 %vm390_vm1, %v2247_v13  ;;  %v3343_v21 = vpop.f32.mrb[59].mxu1 }
 0x6c5   :  { %3345 = vmatpush3.bf16.msra.mxu0 %v2355_v62  ;;  %3346 = vmatprep.mubr.msk.bf16.mxu0 %vm3512_vm0, %v3511_v1 }
 0x6cc   :  { %3347 = vmatmul.mubr.msk.bf16.vlgmr.msra.gmra.mrb[60].mxu0 %vm390_vm1, %v2302_v11 }
 0x797   :  { %v2290_v24 = vpop.f32.mrb[56].mxu0 }
 0x798   :  { %v2297_v25 = vadd.f32 %v2290_v24, %v2143_v61  ;;  %v3336_v26 = vpop.f32.mrb[57].mxu0 }
 0x799   :  { %v2293_v27 = vpop.f32.mrb[58].mxu0 }
 0x79a   :  { %v2298_v28 = vadd.f32 %v2293_v27, %v2146_v6  ;;  %v3337_v19 = vpop.f32.mrb[59].mxu0 }
 0x79b   :  { %v2522_v19 = vlaneseq }
 0x79f   :  { %v2391_v29 = vpop.f32.mrb[60].mxu0 }
 0x7a0   :  { %v2397_v1 = vpack.c.bf16 %v2391_v29, %v2345_v12  ;;  %v3348_v31 = vpop.f32.mrb[61].mxu0 }
 0x7a1   :  { %v2394_v32 = vpop.f32.mrb[62].mxu0  ;;  %v2458_v31 = vld [vmem:[%s4314_s10] sm:$0x1]  ;;  %s3513_s10 = smov [#allocation2]  }
 0x7a2   :  { %v3349_v16 = vpop.f32.mrb[63].mxu0  ;;  %3353 = vmatmul.mubr.msk.bf16.vlgmr.msra.gmra.mrb[60].mxu1 %vm390_vm1, %v2397_v1  ;;  %v2523_v1 = vshrl.u32 %v2522_v19, 7  ;;  %s2551_s13 = sshll.u32 %s3513_s10, 4  ;;  %s2552_s13 = int_to_ptr.vmem [resolvable:$true] %s2551_s13 }
 0x7a3   :  { %s3487_s5 = scalar_lea.vmem %s2552_s13, 256  ;;  %p3492_p1 = scmp.lt.s32.totalorder %s2552_s13, %s2552_s13 }
 0x7a4   :  { %v2524_v32 = vsub.s32 0, %v2523_v1  ;;  %p3488_p0 = scmp.ne.s32.totalorder %s2552_s13, %s3487_s5  ;;  %p3493_p2 = scmp.lt.s32.totalorder %s3487_s5, %s3487_s5 }
 0x7a6   :  { %p3494_p3 = por %p3493_p2, %p3492_p1 }
 0x7a8   :  { %p3495_p4 = pnand %p3494_p3, %p3488_p0 }
 0x875   :  { %v2440_v30 = vpop.f32.mrb[60].mxu1 }
 0x876   :  { %v2447_v38 = vadd.f32 %v2440_v30, %v2297_v25  ;;  %v3354_v39 = vpop.f32.mrb[61].mxu1 }
 0x877   :  { %v2443_v35 = vpop.f32.mrb[62].mxu1 }
 0x878   :  { %v4266_v36 = vadd.f32 %v2846_v34, %v2447_v38  ;;  %v2448_v40 = vadd.f32 %v2443_v35, %v2298_v28  ;;  %v3355_v42 = vpop.f32.mrb[63].mxu1 }
 0x87a   :  { %v2460_v43 = vrot.slane %v4266_v36, 4  ;;  %v2472_v44 = vmul.f32 %v4266_v36, %v4266_v36  ;;  %v4271_v45 = vadd.f32 %v2846_v34, %v2448_v40 }
 0x87c   :  { %v2461_v23 = vadd.f32 %v2460_v43, %v4266_v36  ;;  %v2474_v46 = vrot.slane %v2472_v44, 4  ;;  %v2466_v49 = vrot.slane %v4271_v45, 4  ;;  %v2473_v33 = vmul.f32 %v4271_v45, %v4271_v45 }
 0x87e   :  { %v2462_v37 = vrot.slane %v2461_v23, 2  ;;  %v2475_v0 = vadd.f32 %v2474_v46, %v2472_v44  ;;  %v2467_v51 = vadd.f32 %v2466_v49, %v4271_v45  ;;  %v2480_v53 = vrot.slane %v2473_v33, 4  ;;  %v2847_v44 = vld [vmem:[%s4315_s11] ss:$0 sm:$0xff] }
 0x880   :  { %v2463_v8 = vadd.f32 %v2462_v37, %v2461_v23  ;;  %v2476_v9 = vrot.slane %v2475_v0, 2  ;;  %v2468_v54 = vrot.slane %v2467_v51, 2  ;;  %v2481_v47 = vadd.f32 %v2480_v53, %v2473_v33  ;;  %v3485_v23 = vld [vmem:[%s4304_s0] sm:$0xff] }
 0x882   :  { %v2464_v48 = vrot.slane %v2463_v8, 1  ;;  %v2477_v52 = vadd.f32 %v2476_v9, %v2475_v0  ;;  %v2469_v55 = vadd.f32 %v2468_v54, %v2467_v51  ;;  %v2482_v56 = vrot.slane %v2481_v47, 2 }
 0x884   :  { %v2465_v57 = vadd.f32 %v2464_v48, %v2463_v8  ;;  %v2470_v58 = vrot.slane %v2469_v55, 1  ;;  %v2483_v41 = vadd.f32 %v2482_v56, %v2481_v47  ;;  %v2478_v59 = vrot.slane %v2477_v52, 1 }
 0x886   :  { %v2486_v61 = vmul.f32 0.125, %v2465_v57  ;;  %v2471_v63 = vadd.f32 %v2470_v58, %v2469_v55  ;;  %v2484_v50 = vrot.slane %v2483_v41, 1  ;;  %v2479_v6 = vadd.f32 %v2478_v59, %v2477_v52 }
 0x888   :  { %v2488_v2 = vmul.f32 8.0, %v2486_v61  ;;  %v2487_v4 = vmul.f32 0.125, %v2471_v63  ;;  %v2485_v60 = vadd.f32 %v2484_v50, %v2483_v41  ;;  %v2518_v38 = vsub.f32 %v4266_v36, %v2486_v61  ;;  %v3486_v36 = vld [vmem:[%s4304_s0 + $0x8] sm:$0xff] }
 0x88a   :  { %v2490_v7 = vmul.f32 %v2488_v2, %v2486_v61  ;;  %v2489_v10 = vmul.f32 8.0, %v2487_v4  ;;  %v2519_v42 = vsub.f32 %v4271_v45, %v2487_v4 }
 0x88c   :  { %v2492_v3 = vsub.f32 %v2479_v6, %v2490_v7  ;;  %v2491_v12 = vmul.f32 %v2489_v10, %v2487_v4 }
 0x88e   :  { %v2494_v13 = vmax.f32 %v2492_v3, 0.0  ;;  %v2493_v14 = vsub.f32 %v2485_v60, %v2491_v12 }
 0x890   :  { %v2496_v15 = vmul.f32 0.14285715, %v2494_v13  ;;  %v2495_v17 = vmax.f32 %v2493_v14, 0.0 }
 0x892   :  { %3477 = vrsqrt.f32 %v2496_v15  ;;  %v2497_v18 = vmul.f32 0.14285715, %v2495_v17  ;;  %vm2500_vm5 = vcmp.eq.f32.partialorder %v2496_v15, inf  ;;  %v2503_v21 = vand.u32 2147483648, %v2496_v15 }
 0x893   :  { %vm2502_vm6 = vcmp.eq.f32.partialorder %v2496_v15, 0.0 }
 0x894   :  { %3479 = vrsqrt.f32 %v2497_v18  ;;  %vm2507_vm7 = vcmp.eq.f32.partialorder %v2497_v18, inf  ;;  %v2510_v26 = vand.u32 2147483648, %v2497_v18  ;;  %vm2509_vm8 = vcmp.eq.f32.partialorder %v2497_v18, 0.0 }
 0x89c   :  { %v3478_v62 = vpop.eup %3477 }
 0x89d   :  { %v2499_v20 = vmul.f32 %v3478_v62, %v2496_v15 }
 0x89e   :  { %v3480_v11 = vpop.eup %3479 }
 0x89f   :  { %v2501_v22 = vsel %vm2500_vm5, %v2496_v15, %v2499_v20  ;;  %v2506_v24 = vmul.f32 %v3480_v11, %v2497_v18 }
 0x8a0   :  { %v2504_v5 = vsel %vm2502_vm6, %v2503_v21, %v2501_v22 }
 0x8a1   :  { %v2512_v25 = vadd.f32 1e-10, %v2504_v5  ;;  %v2508_v27 = vsel %vm2507_vm7, %v2497_v18, %v2506_v24 }
 0x8a2   :  { %v2511_v28 = vsel %vm2509_vm8, %v2510_v26, %v2508_v27 }
 0x8a3   :  { %3481 = vrcp.f32 %v2512_v25  ;;  %v2513_v29 = vadd.f32 1e-10, %v2511_v28 }
 0x8a5   :  { %3483 = vrcp.f32 %v2513_v29 }
 0x8ad   :  { %v3482_v16 = vpop.eup %3481 }
 0x8ae   :  { %v2516_v30 = vmul.f32 %v3482_v16, %v2458_v31 }
 0x8af   :  { %v3484_v34 = vpop.eup %3483 }
 0x8b0   :  { %v2525_v39 = vrot.slane %v2516_v30, %v2524_v32  ;;  %v2517_v35 = vmul.f32 %v3484_v34, %v2458_v31 }
 0x8b2   :  { %v2532_v40 = vmul.f32 %v2525_v39, %v2518_v38  ;;  %v2529_v43 = vrot.slane %v2517_v35, %v2524_v32 }
 0x8b4   :  { %v2534_v46 = vadd.f32 %v3485_v23, %v2532_v40  ;;  %v2533_v49 = vmul.f32 %v2529_v43, %v2519_v42 }
 0x8b6   :  { %v2542_v33 = vadd.f32 %v2847_v44, %v2534_v46  ;;  %v2535_v37 = vadd.f32 %v3486_v36, %v2533_v49 }
 0x8b8   :  { %2544 = vst [vmem:[#allocation2] sm:$0xff] %v2542_v33  ;;  %v2543_v45 = vadd.f32 %v2847_v44, %v2535_v37 }
 0x8ba   :  { %2545 = vst [vmem:[#allocation2 + $0x8] sm:$0xff] %v2543_v45 }
 0x8bb   :  { %3498 = shalt.err (!%p3495_p4)
}
 0x8bc   :  { %s3499_s3 = scalar_lea.hbm %s4316_s12, 256 }
 0x8bd   :  { %p3500_p5 = scmp.ne.s32.totalorder %s4316_s12, %s3499_s3  ;;  %p3503_p6 = scmp.lt.u32.totalorder %s3499_s3, %s4316_s12 }
 0x8bf   :  { %p3505_p7 = pnand %p3503_p6, %p3500_p5 }
 0x8c1   :  { %3508 = shalt.err (!%p3505_p7)
}
 0x8c2   :  { %s3514_s4 = smov 128   ;;  %s3515_s19 = smov 8  }
 0x8c3   :  { %2557 = dma.vmem_to_hbm [thread:$0]  %s2552_s13, 256, %s4316_s12, [#allocation3], %s3514_s4, %s3514_s4, %s3515_s19  }
 0x8c4   :  { %3509 = dma.done.wait [#allocation3], 256  }
 0x8c5   :  { %3510 = vsyncadd [#allocation3], 4294967040 }
 0x8c6   :  { %2561 = vsyncpa [#allocation3], 1 }

</bundles_post_ra>
